<compile_context>
chip_gen: v6e
topology: v6e:2x2x1
jax: 0.10.0
libtpu: 0.0.40
codegen_flags: <defaults>
</compile_context>

<pallas_src>
import jax
import jax.numpy as jnp
from jax.experimental import pallas as pl
from jax.experimental.pallas import tpu as pltpu

EPS = 1e-5


# ----------------------------- helpers (glue) ------------------------------

def _pick_tm(M, cap):
    """Largest row tile that divides M, is a multiple of 8, and is <= cap."""
    if M <= cap or M % 8 != 0:
        return M
    best = M
    for d in range(8, cap + 1, 8):
        if M % d == 0:
            best = d
    return best


def _pad1(v, n):
    return jnp.pad(v, (0, n - v.shape[0]))


def _pad2(a, r, c):
    return jnp.pad(a, ((0, r - a.shape[0]), (0, c - a.shape[1])))


def _pool_patches(x, KH, KW):
    """Per-pool-position im2col.

    x: (B, H, W, C).  Returns 4 patch matrices, one per position (dy, dx) of a
    2x2 max-pool window over the VALID conv output, each (B*PH*PW, KH*KW*C)
    with feature order (kh, kw, cin), plus (PH, PW).  Total bytes equal a
    single plain im2col (every conv-output row feeds exactly one pool window).
    """
    B, H, W, C = x.shape
    OH, OW = H - KH + 1, W - KW + 1
    PH, PW = OH // 2, OW // 2
    mats = []
    for dy in range(2):
        for dx in range(2):
            cols = []
            for i in range(KH):
                for j in range(KW):
                    cols.append(x[:, dy + i: dy + i + 2 * PH: 2,
                                     dx + j: dx + j + 2 * PW: 2, :])
            mats.append(jnp.concatenate(cols, axis=-1)
                        .reshape(B * PH * PW, KH * KW * C))
    return mats, (PH, PW)


# ----------------------------- Pallas kernels ------------------------------

def _conv_pool_relu_kernel(a0_ref, a1_ref, a2_ref, a3_ref, w_ref, shift_ref,
                           o_ref):
    """One Conv2d + BN(eval) + MaxPool2d(2) + ReLU stage for a tile of pooled rows.

    a{p}_ref: (TM, K) bf16 im2col patches for pool-window position p.
    w_ref:    (K, Cout) bf16 conv weights with the BN scale folded in.
    shift_ref:(1, Cout) f32 folded conv-bias/BN shift (same for the 4 positions,
              so adding it after the max is exact).
    """
    w = w_ref[...]
    m = jnp.dot(a0_ref[...], w, preferred_element_type=jnp.float32)
    m = jnp.maximum(m, jnp.dot(a1_ref[...], w, preferred_element_type=jnp.float32))
    m = jnp.maximum(m, jnp.dot(a2_ref[...], w, preferred_element_type=jnp.float32))
    m = jnp.maximum(m, jnp.dot(a3_ref[...], w, preferred_element_type=jnp.float32))
    o_ref[...] = jnp.maximum(m + shift_ref[...], 0.0).astype(o_ref.dtype)


def _fc_head_kernel(x_ref, w1_ref, s1_ref, t1_ref, w2_ref, s2_ref, t2_ref,
                    w3_ref, b3_ref, wd_ref, bd_ref, cls_ref, dom_ref):
    """Entire class + domain classifier head for a tile of batch rows.

    x: (TB, 800) bf16.  w1: (800, 256) = [c_fc1 | d_fc1] padded to 128 lanes
    each.  w2/w3: class fc2 / fc3 padded to (128,128).  wd: domain fc2 padded
    to (128,128).  s*/t*: folded BN scale/shift (f32).  Outputs are (TB,128)
    lane-dense f32 slabs; valid columns are sliced outside.
    """
    hp = w2_ref.shape[0]                                   # padded hidden width
    h = jnp.dot(x_ref[...], w1_ref[...], preferred_element_type=jnp.float32)
    h = jnp.maximum(h * s1_ref[...] + t1_ref[...], 0.0)    # (TB, 2*hp)
    hc = h[:, :hp].astype(jnp.bfloat16)                    # class path
    hd = h[:, hp:].astype(jnp.bfloat16)                    # domain path
    # Dropout (c_drop1): eval-mode identity.
    h2 = jnp.dot(hc, w2_ref[...], preferred_element_type=jnp.float32)
    h2 = jnp.maximum(h2 * s2_ref[...] + t2_ref[...], 0.0)
    cls_ref[...] = (jnp.dot(h2.astype(jnp.bfloat16), w3_ref[...],
                            preferred_element_type=jnp.float32) + b3_ref[...])
    dom_ref[...] = (jnp.dot(hd, wd_ref[...],
                            preferred_element_type=jnp.float32) + bd_ref[...])


# --------------------------- layer compositions ----------------------------

def conv_bn_pool_relu(x_nhwc, w_oihw, bias, *, gamma, beta, mean, var,
                      tm_cap=512):
    """Conv2d(k, VALID, stride 1) + BatchNorm2d(eval) + MaxPool2d(2) + ReLU,
    fused into one Pallas kernel (per-pool-position im2col matmuls)."""
    B, H, W, Cin = x_nhwc.shape
    Cout, _, KH, KW = w_oihw.shape
    mats, (PH, PW) = _pool_patches(x_nhwc, KH, KW)
    K = KH * KW * Cin
    M = B * PH * PW

    scale = gamma / jnp.sqrt(var + EPS)
    shift = (beta + (bias - mean) * scale).reshape(1, Cout).astype(jnp.float32)
    # (Cout,Cin,KH,KW) -> (KH,KW,Cin,Cout) -> (K,Cout); fold BN scale into cols.
    wmat = (jnp.transpose(w_oihw, (2, 3, 1, 0)).reshape(K, Cout)
            * scale[None, :]).astype(jnp.bfloat16)
    mats = [m.astype(jnp.bfloat16) for m in mats]

    TM = _pick_tm(M, tm_cap)
    out = pl.pallas_call(
        _conv_pool_relu_kernel,
        out_shape=jax.ShapeDtypeStruct((M, Cout), jnp.bfloat16),
        grid=(M // TM,),
        in_specs=[pl.BlockSpec((TM, K), lambda i: (i, 0)) for _ in range(4)]
                + [pl.BlockSpec((K, Cout), lambda i: (0, 0)),
                   pl.BlockSpec((1, Cout), lambda i: (0, 0))],
        out_specs=pl.BlockSpec((TM, Cout), lambda i: (i, 0)),
        compiler_params=pltpu.CompilerParams(
            dimension_semantics=("parallel",)),
    )(*mats, wmat, shift)
    return out.reshape(B, PH, PW, Cout)


def fc_head(feature, p):
    """Class + domain classifiers in a single Pallas kernel."""
    B, F = feature.shape                      # F = 800
    HP = 128                                  # padded hidden/output lane width

    def bn_fold(bn, bias):
        s = bn['gamma'] / jnp.sqrt(bn['var'] + EPS)
        t = bn['beta'] + (bias - bn['mean']) * s
        return s, t

    c_s1, c_t1 = bn_fold(p['c_bn1'], p['c_fc1_b'])
    d_s1, d_t1 = bn_fold(p['d_bn1'], p['d_fc1_b'])
    c_s2, c_t2 = bn_fold(p['c_bn2'], p['c_fc2_b'])

    w1 = jnp.concatenate([_pad2(p['c_fc1_w'].T, F, HP),
                          _pad2(p['d_fc1_w'].T, F, HP)], axis=1)     # (800, 256)
    s1 = jnp.concatenate([_pad1(c_s1, HP), _pad1(d_s1, HP)]).reshape(1, 2 * HP)
    t1 = jnp.concatenate([_pad1(c_t1, HP), _pad1(d_t1, HP)]).reshape(1, 2 * HP)
    w2 = _pad2(p['c_fc2_w'].T, HP, HP)
    s2 = _pad1(c_s2, HP).reshape(1, HP)
    t2 = _pad1(c_t2, HP).reshape(1, HP)
    w3 = _pad2(p['c_fc3_w'].T, HP, HP)
    b3 = _pad1(p['c_fc3_b'], HP).reshape(1, HP)
    wd = _pad2(p['d_fc2_w'].T, HP, HP)
    bd = _pad1(p['d_fc2_b'], HP).reshape(1, HP)
    n_cls = p['c_fc3_w'].shape[0]
    n_dom = p['d_fc2_w'].shape[0]

    Bp = -(-B // 8) * 8                       # pad rows to a sublane multiple
    x = feature.astype(jnp.bfloat16)
    if Bp != B:
        x = jnp.pad(x, ((0, Bp - B), (0, 0)))
    TB = _pick_tm(Bp, 256)

    cls, dom = pl.pallas_call(
        _fc_head_kernel,
        out_shape=(jax.ShapeDtypeStruct((Bp, HP), jnp.float32),
                   jax.ShapeDtypeStruct((Bp, HP), jnp.float32)),
        grid=(Bp // TB,),
        in_specs=[
            pl.BlockSpec((TB, F), lambda i: (i, 0)),
            pl.BlockSpec((F, 2 * HP), lambda i: (0, 0)),
            pl.BlockSpec((1, 2 * HP), lambda i: (0, 0)),
            pl.BlockSpec((1, 2 * HP), lambda i: (0, 0)),
            pl.BlockSpec((HP, HP), lambda i: (0, 0)),
            pl.BlockSpec((1, HP), lambda i: (0, 0)),
            pl.BlockSpec((1, HP), lambda i: (0, 0)),
            pl.BlockSpec((HP, HP), lambda i: (0, 0)),
            pl.BlockSpec((1, HP), lambda i: (0, 0)),
            pl.BlockSpec((HP, HP), lambda i: (0, 0)),
            pl.BlockSpec((1, HP), lambda i: (0, 0)),
        ],
        out_specs=(pl.BlockSpec((TB, HP), lambda i: (i, 0)),
                   pl.BlockSpec((TB, HP), lambda i: (i, 0))),
        compiler_params=pltpu.CompilerParams(
            dimension_semantics=("parallel",)),
    )(x,
      w1.astype(jnp.bfloat16), s1.astype(jnp.float32), t1.astype(jnp.float32),
      w2.astype(jnp.bfloat16), s2.astype(jnp.float32), t2.astype(jnp.float32),
      w3.astype(jnp.bfloat16), b3.astype(jnp.float32),
      wd.astype(jnp.bfloat16), bd.astype(jnp.float32))
    return cls[:B, :n_cls], dom[:B, :n_dom]


# ------------------------------ parameters ---------------------------------

def init_params(key):
    ks = iter(jax.random.split(key, 40))

    def nrm(shape, s=0.05):
        return s * jax.random.normal(next(ks), shape, jnp.float32)

    def bn(n):
        return dict(
            gamma=1.0 + 0.1 * jax.random.normal(next(ks), (n,), jnp.float32),
            beta=0.1 * jax.random.normal(next(ks), (n,), jnp.float32),
            mean=0.1 * jax.random.normal(next(ks), (n,), jnp.float32),
            var=1.0 + 0.1 * jax.random.uniform(next(ks), (n,), jnp.float32),
        )

    return dict(
        conv1_w=nrm((64, 3, 5, 5)), conv1_b=nrm((64,)), bn1=bn(64),
        conv2_w=nrm((50, 64, 5, 5)), conv2_b=nrm((50,)), bn2=bn(50),
        c_fc1_w=nrm((100, 50 * 4 * 4)), c_fc1_b=nrm((100,)), c_bn1=bn(100),
        c_fc2_w=nrm((100, 100)), c_fc2_b=nrm((100,)), c_bn2=bn(100),
        c_fc3_w=nrm((10, 100)), c_fc3_b=nrm((10,)),
        d_fc1_w=nrm((100, 50 * 4 * 4)), d_fc1_b=nrm((100,)), d_bn1=bn(100),
        d_fc2_w=nrm((2, 100)), d_fc2_b=nrm((2,)),
    )


# ------------------------------ full forward --------------------------------

def _forward(params, input_data):
    B, Cin, H, W = input_data.shape
    x = jnp.transpose(input_data.astype(jnp.float32), (0, 2, 3, 1))  # NCHW->NHWC

    w1 = params['conv1_w']                                   # (64, 3, 5, 5)
    if Cin == 1:
        # torch: input_data.expand(B, 3, 28, 28) duplicates the one channel;
        # conv over 3 identical channels == conv over 1 channel with the
        # weights summed over Cin (3x smaller K for conv1).
        w1 = jnp.sum(w1, axis=1, keepdims=True)              # (64, 1, 5, 5)

    f = conv_bn_pool_relu(x, w1, params['conv1_b'], **params['bn1'],
                          tm_cap=1024)                       # (B, 12, 12, 64)
    # Dropout2d: eval-mode identity.
    f = conv_bn_pool_relu(f, params['conv2_w'], params['conv2_b'],
                          **params['bn2'], tm_cap=256)       # (B, 4, 4, 50)

    # feature.view(-1, 50*4*4) with PyTorch's NCHW channel-major flatten order.
    feature = jnp.transpose(f, (0, 3, 1, 2)).reshape(B, 50 * 4 * 4)
    # ReverseLayerF: identity in the forward pass.
    return fc_head(feature, params)


_forward_jit = jax.jit(_forward)


def cnn_model_forward(params, input_data, alpha=None):
    """Matches CNNModel.forward(input_data, alpha) -> (class_output, domain_output).
    alpha only scales gradients (ReverseLayerF), so it never enters the trace."""
    del alpha
    return _forward_jit(params, input_data)


if __name__ == "__main__":
    key = jax.random.PRNGKey(0)
    pkey, xkey = jax.random.split(key)
    params = init_params(pkey)

    # MNIST-style single-channel input; forward handles the 1->3 expand.
    x = jax.random.normal(xkey, (2, 1, 28, 28), jnp.float32)
    alpha = 0.1

    class_out, domain_out = cnn_model_forward(params, x, alpha)
    jax.block_until_ready((class_out, domain_out))

    assert class_out.shape == (2, 10), class_out.shape
    assert domain_out.shape == (2, 2), domain_out.shape
    assert bool(jnp.all(jnp.isfinite(class_out))) and bool(jnp.all(jnp.isfinite(domain_out)))
    print("KERNEL_OK")
</pallas_src>

<mosaic_0001>
module attributes {stable_mosaic.version = 11 : i64} {
  func.func @_conv_pool_relu_kernel(%arg0: i32, %arg1: memref<288x25xbf16, #tpu.memory_space<vmem>>, %arg2: memref<288x25xbf16, #tpu.memory_space<vmem>>, %arg3: memref<288x25xbf16, #tpu.memory_space<vmem>>, %arg4: memref<288x25xbf16, #tpu.memory_space<vmem>>, %arg5: memref<25x64xbf16, #tpu.memory_space<vmem>>, %arg6: memref<1x64xf32, #tpu.memory_space<vmem>>, %arg7: memref<288x64xbf16, #tpu.memory_space<vmem>>) attributes {dimension_semantics = [#tpu.dimension_semantics<parallel>], iteration_bounds = array<i64: 1>, scalar_prefetch = 0 : i64, scratch_operands = 0 : i64, tpu.core_type = #tpu.core_type<tc>, window_params = [{transform_indices = @transform_0, window_bounds = array<i64: 288, 25>}, {transform_indices = @transform_1, window_bounds = array<i64: 288, 25>}, {transform_indices = @transform_2, window_bounds = array<i64: 288, 25>}, {transform_indices = @transform_3, window_bounds = array<i64: 288, 25>}, {pipeline_mode = #tpu.pipeline_mode<synchronous>, transform_indices = @transform_4, window_bounds = array<i64: 25, 64>}, {pipeline_mode = #tpu.pipeline_mode<synchronous>, transform_indices = @transform_5, window_bounds = array<i64: 1, 64>}, {transform_indices = @transform_6, window_bounds = array<i64: 288, 64>}]} {
    %c0 = arith.constant 0 : index
    %c0_0 = arith.constant 0 : index
    %0 = vector.load %arg5[%c0, %c0_0] : memref<25x64xbf16, #tpu.memory_space<vmem>>, vector<25x64xbf16>
    %c0_1 = arith.constant 0 : index
    %c0_2 = arith.constant 0 : index
    %1 = vector.load %arg1[%c0_1, %c0_2] : memref<288x25xbf16, #tpu.memory_space<vmem>>, vector<288x25xbf16>
    %cst = arith.constant dense<0.000000e+00> : vector<288x64xf32>
    %2 = tpu.matmul %1, %0, %cst {dimension_numbers = #tpu.dot_dimension_numbers<[1], [0], [0], [1], [0, 0, 1, 1], [], []>} : vector<288x25xbf16>, vector<25x64xbf16>, vector<288x64xf32> -> vector<288x64xf32>
    %c0_3 = arith.constant 0 : index
    %c0_4 = arith.constant 0 : index
    %3 = vector.load %arg2[%c0_3, %c0_4] : memref<288x25xbf16, #tpu.memory_space<vmem>>, vector<288x25xbf16>
    %cst_5 = arith.constant dense<0.000000e+00> : vector<288x64xf32>
    %4 = tpu.matmul %3, %0, %cst_5 {dimension_numbers = #tpu.dot_dimension_numbers<[1], [0], [0], [1], [0, 0, 1, 1], [], []>} : vector<288x25xbf16>, vector<25x64xbf16>, vector<288x64xf32> -> vector<288x64xf32>
    %5 = arith.maximumf %2, %4 : vector<288x64xf32>
    %c0_6 = arith.constant 0 : index
    %c0_7 = arith.constant 0 : index
    %6 = vector.load %arg3[%c0_6, %c0_7] : memref<288x25xbf16, #tpu.memory_space<vmem>>, vector<288x25xbf16>
    %cst_8 = arith.constant dense<0.000000e+00> : vector<288x64xf32>
    %7 = tpu.matmul %6, %0, %cst_8 {dimension_numbers = #tpu.dot_dimension_numbers<[1], [0], [0], [1], [0, 0, 1, 1], [], []>} : vector<288x25xbf16>, vector<25x64xbf16>, vector<288x64xf32> -> vector<288x64xf32>
    %8 = arith.maximumf %5, %7 : vector<288x64xf32>
    %c0_9 = arith.constant 0 : index
    %c0_10 = arith.constant 0 : index
    %9 = vector.load %arg4[%c0_9, %c0_10] : memref<288x25xbf16, #tpu.memory_space<vmem>>, vector<288x25xbf16>
    %cst_11 = arith.constant dense<0.000000e+00> : vector<288x64xf32>
    %10 = tpu.matmul %9, %0, %cst_11 {dimension_numbers = #tpu.dot_dimension_numbers<[1], [0], [0], [1], [0, 0, 1, 1], [], []>} : vector<288x25xbf16>, vector<25x64xbf16>, vector<288x64xf32> -> vector<288x64xf32>
    %11 = arith.maximumf %8, %10 : vector<288x64xf32>
    %c0_12 = arith.constant 0 : index
    %c0_13 = arith.constant 0 : index
    %12 = vector.load %arg6[%c0_12, %c0_13] : memref<1x64xf32, #tpu.memory_space<vmem>>, vector<1x64xf32>
    %13 = vector.broadcast %12 : vector<1x64xf32> to vector<288x64xf32>
    %14 = arith.addf %11, %13 : vector<288x64xf32>
    %cst_14 = arith.constant 0.000000e+00 : f32
    %15 = vector.broadcast %cst_14 : f32 to vector<288x64xf32>
    %16 = arith.maximumf %14, %15 : vector<288x64xf32>
    %17 = arith.truncf %16 : vector<288x64xf32> to vector<288x64xbf16>
    %c0_15 = arith.constant 0 : index
    %c0_16 = arith.constant 0 : index
    %18 = vector.load %arg7[%c0_15, %c0_16] : memref<288x64xbf16, #tpu.memory_space<vmem>>, vector<288x64xbf16>
    tpu.vector_store %arg7[%c0_15, %c0_16], %17 {strides = array<i32>} : memref<288x64xbf16, #tpu.memory_space<vmem>>, vector<288x64xbf16>,
    return
  }
  func.func @transform_0(%arg0: i32) -> (i32, i32) {
    %c0_i32 = arith.constant 0 : i32
    %c0_i32_0 = arith.constant 0 : i32
    return %arg0, %c0_i32 : i32, i32
  }
  func.func @transform_1(%arg0: i32) -> (i32, i32) {
    %c0_i32 = arith.constant 0 : i32
    %c0_i32_0 = arith.constant 0 : i32
    return %arg0, %c0_i32 : i32, i32
  }
  func.func @transform_2(%arg0: i32) -> (i32, i32) {
    %c0_i32 = arith.constant 0 : i32
    %c0_i32_0 = arith.constant 0 : i32
    return %arg0, %c0_i32 : i32, i32
  }
  func.func @transform_3(%arg0: i32) -> (i32, i32) {
    %c0_i32 = arith.constant 0 : i32
    %c0_i32_0 = arith.constant 0 : i32
    return %arg0, %c0_i32 : i32, i32
  }
  func.func @transform_4(%arg0: i32) -> (i32, i32) {
    %c0_i32 = arith.constant 0 : i32
    %c0_i32_0 = arith.constant 0 : i32
    %c0_i32_1 = arith.constant 0 : i32
    return %c0_i32, %c0_i32_0 : i32, i32
  }
  func.func @transform_5(%arg0: i32) -> (i32, i32) {
    %c0_i32 = arith.constant 0 : i32
    %c0_i32_0 = arith.constant 0 : i32
    %c0_i32_1 = arith.constant 0 : i32
    return %c0_i32, %c0_i32_0 : i32, i32
  }
  func.func @transform_6(%arg0: i32) -> (i32, i32) {
    %c0_i32 = arith.constant 0 : i32
    %c0_i32_0 = arith.constant 0 : i32
    return %arg0, %c0_i32 : i32, i32
  }
}

module attributes {stable_mosaic.version = 11 : i64} {
  func.func @_conv_pool_relu_kernel(%arg0: i32, %arg1: memref<32x1600xbf16, #tpu.memory_space<vmem>>, %arg2: memref<32x1600xbf16, #tpu.memory_space<vmem>>, %arg3: memref<32x1600xbf16, #tpu.memory_space<vmem>>, %arg4: memref<32x1600xbf16, #tpu.memory_space<vmem>>, %arg5: memref<1600x50xbf16, #tpu.memory_space<vmem>>, %arg6: memref<1x50xf32, #tpu.memory_space<vmem>>, %arg7: memref<32x50xbf16, #tpu.memory_space<vmem>>) attributes {dimension_semantics = [#tpu.dimension_semantics<parallel>], iteration_bounds = array<i64: 1>, scalar_prefetch = 0 : i64, scratch_operands = 0 : i64, tpu.core_type = #tpu.core_type<tc>, window_params = [{transform_indices = @transform_0, window_bounds = array<i64: 32, 1600>}, {transform_indices = @transform_1, window_bounds = array<i64: 32, 1600>}, {transform_indices = @transform_2, window_bounds = array<i64: 32, 1600>}, {transform_indices = @transform_3, window_bounds = array<i64: 32, 1600>}, {pipeline_mode = #tpu.pipeline_mode<synchronous>, transform_indices = @transform_4, window_bounds = array<i64: 1600, 50>}, {pipeline_mode = #tpu.pipeline_mode<synchronous>, transform_indices = @transform_5, window_bounds = array<i64: 1, 50>}, {transform_indices = @transform_6, window_bounds = array<i64: 32, 50>}]} {
    %c0 = arith.constant 0 : index
    %c0_0 = arith.constant 0 : index
    %0 = vector.load %arg5[%c0, %c0_0] : memref<1600x50xbf16, #tpu.memory_space<vmem>>, vector<1600x50xbf16>
    %c0_1 = arith.constant 0 : index
    %c0_2 = arith.constant 0 : index
    %1 = vector.load %arg1[%c0_1, %c0_2] : memref<32x1600xbf16, #tpu.memory_space<vmem>>, vector<32x1600xbf16>
    %cst = arith.constant dense<0.000000e+00> : vector<32x50xf32>
    %2 = tpu.matmul %1, %0, %cst {dimension_numbers = #tpu.dot_dimension_numbers<[1], [0], [0], [1], [0, 0, 1, 1], [], []>} : vector<32x1600xbf16>, vector<1600x50xbf16>, vector<32x50xf32> -> vector<32x50xf32>
    %c0_3 = arith.constant 0 : index
    %c0_4 = arith.constant 0 : index
    %3 = vector.load %arg2[%c0_3, %c0_4] : memref<32x1600xbf16, #tpu.memory_space<vmem>>, vector<32x1600xbf16>
    %cst_5 = arith.constant dense<0.000000e+00> : vector<32x50xf32>
    %4 = tpu.matmul %3, %0, %cst_5 {dimension_numbers = #tpu.dot_dimension_numbers<[1], [0], [0], [1], [0, 0, 1, 1], [], []>} : vector<32x1600xbf16>, vector<1600x50xbf16>, vector<32x50xf32> -> vector<32x50xf32>
    %5 = arith.maximumf %2, %4 : vector<32x50xf32>
    %c0_6 = arith.constant 0 : index
    %c0_7 = arith.constant 0 : index
    %6 = vector.load %arg3[%c0_6, %c0_7] : memref<32x1600xbf16, #tpu.memory_space<vmem>>, vector<32x1600xbf16>
    %cst_8 = arith.constant dense<0.000000e+00> : vector<32x50xf32>
    %7 = tpu.matmul %6, %0, %cst_8 {dimension_numbers = #tpu.dot_dimension_numbers<[1], [0], [0], [1], [0, 0, 1, 1], [], []>} : vector<32x1600xbf16>, vector<1600x50xbf16>, vector<32x50xf32> -> vector<32x50xf32>
    %8 = arith.maximumf %5, %7 : vector<32x50xf32>
    %c0_9 = arith.constant 0 : index
    %c0_10 = arith.constant 0 : index
    %9 = vector.load %arg4[%c0_9, %c0_10] : memref<32x1600xbf16, #tpu.memory_space<vmem>>, vector<32x1600xbf16>
    %cst_11 = arith.constant dense<0.000000e+00> : vector<32x50xf32>
    %10 = tpu.matmul %9, %0, %cst_11 {dimension_numbers = #tpu.dot_dimension_numbers<[1], [0], [0], [1], [0, 0, 1, 1], [], []>} : vector<32x1600xbf16>, vector<1600x50xbf16>, vector<32x50xf32> -> vector<32x50xf32>
    %11 = arith.maximumf %8, %10 : vector<32x50xf32>
    %c0_12 = arith.constant 0 : index
    %c0_13 = arith.constant 0 : index
    %12 = vector.load %arg6[%c0_12, %c0_13] : memref<1x50xf32, #tpu.memory_space<vmem>>, vector<1x50xf32>
    %13 = vector.broadcast %12 : vector<1x50xf32> to vector<32x50xf32>
    %14 = arith.addf %11, %13 : vector<32x50xf32>
    %cst_14 = arith.constant 0.000000e+00 : f32
    %15 = vector.broadcast %cst_14 : f32 to vector<32x50xf32>
    %16 = arith.maximumf %14, %15 : vector<32x50xf32>
    %17 = arith.truncf %16 : vector<32x50xf32> to vector<32x50xbf16>
    %c0_15 = arith.constant 0 : index
    %c0_16 = arith.constant 0 : index
    %18 = vector.load %arg7[%c0_15, %c0_16] : memref<32x50xbf16, #tpu.memory_space<vmem>>, vector<32x50xbf16>
    tpu.vector_store %arg7[%c0_15, %c0_16], %17 {strides = array<i32>} : memref<32x50xbf16, #tpu.memory_space<vmem>>, vector<32x50xbf16>,
    return
  }
  func.func @transform_0(%arg0: i32) -> (i32, i32) {
    %c0_i32 = arith.constant 0 : i32
    %c0_i32_0 = arith.constant 0 : i32
    return %arg0, %c0_i32 : i32, i32
  }
  func.func @transform_1(%arg0: i32) -> (i32, i32) {
    %c0_i32 = arith.constant 0 : i32
    %c0_i32_0 = arith.constant 0 : i32
    return %arg0, %c0_i32 : i32, i32
  }
  func.func @transform_2(%arg0: i32) -> (i32, i32) {
    %c0_i32 = arith.constant 0 : i32
    %c0_i32_0 = arith.constant 0 : i32
    return %arg0, %c0_i32 : i32, i32
  }
  func.func @transform_3(%arg0: i32) -> (i32, i32) {
    %c0_i32 = arith.constant 0 : i32
    %c0_i32_0 = arith.constant 0 : i32
    return %arg0, %c0_i32 : i32, i32
  }
  func.func @transform_4(%arg0: i32) -> (i32, i32) {
    %c0_i32 = arith.constant 0 : i32
    %c0_i32_0 = arith.constant 0 : i32
    %c0_i32_1 = arith.constant 0 : i32
    return %c0_i32, %c0_i32_0 : i32, i32
  }
  func.func @transform_5(%arg0: i32) -> (i32, i32) {
    %c0_i32 = arith.constant 0 : i32
    %c0_i32_0 = arith.constant 0 : i32
    %c0_i32_1 = arith.constant 0 : i32
    return %c0_i32, %c0_i32_0 : i32, i32
  }
  func.func @transform_6(%arg0: i32) -> (i32, i32) {
    %c0_i32 = arith.constant 0 : i32
    %c0_i32_0 = arith.constant 0 : i32
    return %arg0, %c0_i32 : i32, i32
  }
}

module attributes {stable_mosaic.version = 11 : i64} {
  func.func @_fc_head_kernel(%arg0: i32, %arg1: memref<8x800xbf16, #tpu.memory_space<vmem>>, %arg2: memref<800x256xbf16, #tpu.memory_space<vmem>>, %arg3: memref<1x256xf32, #tpu.memory_space<vmem>>, %arg4: memref<1x256xf32, #tpu.memory_space<vmem>>, %arg5: memref<128x128xbf16, #tpu.memory_space<vmem>>, %arg6: memref<1x128xf32, #tpu.memory_space<vmem>>, %arg7: memref<1x128xf32, #tpu.memory_space<vmem>>, %arg8: memref<128x128xbf16, #tpu.memory_space<vmem>>, %arg9: memref<1x128xf32, #tpu.memory_space<vmem>>, %arg10: memref<128x128xbf16, #tpu.memory_space<vmem>>, %arg11: memref<1x128xf32, #tpu.memory_space<vmem>>, %arg12: memref<8x128xf32, #tpu.memory_space<vmem>>, %arg13: memref<8x128xf32, #tpu.memory_space<vmem>>) attributes {dimension_semantics = [#tpu.dimension_semantics<parallel>], iteration_bounds = array<i64: 1>, scalar_prefetch = 0 : i64, scratch_operands = 0 : i64, tpu.core_type = #tpu.core_type<tc>, window_params = [{transform_indices = @transform_0, window_bounds = array<i64: 8, 800>}, {pipeline_mode = #tpu.pipeline_mode<synchronous>, transform_indices = @transform_1, window_bounds = array<i64: 800, 256>}, {pipeline_mode = #tpu.pipeline_mode<synchronous>, transform_indices = @transform_2, window_bounds = array<i64: 1, 256>}, {pipeline_mode = #tpu.pipeline_mode<synchronous>, transform_indices = @transform_3, window_bounds = array<i64: 1, 256>}, {pipeline_mode = #tpu.pipeline_mode<synchronous>, transform_indices = @transform_4, window_bounds = array<i64: 128, 128>}, {pipeline_mode = #tpu.pipeline_mode<synchronous>, transform_indices = @transform_5, window_bounds = array<i64: 1, 128>}, {pipeline_mode = #tpu.pipeline_mode<synchronous>, transform_indices = @transform_6, window_bounds = array<i64: 1, 128>}, {pipeline_mode = #tpu.pipeline_mode<synchronous>, transform_indices = @transform_7, window_bounds = array<i64: 128, 128>}, {pipeline_mode = #tpu.pipeline_mode<synchronous>, transform_indices = @transform_8, window_bounds = array<i64: 1, 128>}, {pipeline_mode = #tpu.pipeline_mode<synchronous>, transform_indices = @transform_9, window_bounds = array<i64: 128, 128>}, {pipeline_mode = #tpu.pipeline_mode<synchronous>, transform_indices = @transform_10, window_bounds = array<i64: 1, 128>}, {transform_indices = @transform_11, window_bounds = array<i64: 8, 128>}, {transform_indices = @transform_12, window_bounds = array<i64: 8, 128>}]} {
    %c0 = arith.constant 0 : index
    %c0_0 = arith.constant 0 : index
    %0 = vector.load %arg1[%c0, %c0_0] : memref<8x800xbf16, #tpu.memory_space<vmem>>, vector<8x800xbf16>
    %c0_1 = arith.constant 0 : index
    %c0_2 = arith.constant 0 : index
    %1 = vector.load %arg2[%c0_1, %c0_2] : memref<800x256xbf16, #tpu.memory_space<vmem>>, vector<800x256xbf16>
    %cst = arith.constant dense<0.000000e+00> : vector<8x256xf32>
    %2 = tpu.matmul %0, %1, %cst {dimension_numbers = #tpu.dot_dimension_numbers<[1], [0], [0], [1], [0, 0, 1, 1], [], []>} : vector<8x800xbf16>, vector<800x256xbf16>, vector<8x256xf32> -> vector<8x256xf32>
    %c0_3 = arith.constant 0 : index
    %c0_4 = arith.constant 0 : index
    %3 = vector.load %arg3[%c0_3, %c0_4] : memref<1x256xf32, #tpu.memory_space<vmem>>, vector<1x256xf32>
    %4 = vector.broadcast %3 : vector<1x256xf32> to vector<8x256xf32>
    %5 = arith.mulf %2, %4 : vector<8x256xf32>
    %c0_5 = arith.constant 0 : index
    %c0_6 = arith.constant 0 : index
    %6 = vector.load %arg4[%c0_5, %c0_6] : memref<1x256xf32, #tpu.memory_space<vmem>>, vector<1x256xf32>
    %7 = vector.broadcast %6 : vector<1x256xf32> to vector<8x256xf32>
    %8 = arith.addf %5, %7 : vector<8x256xf32>
    %cst_7 = arith.constant 0.000000e+00 : f32
    %9 = vector.broadcast %cst_7 : f32 to vector<8x256xf32>
    %10 = arith.maximumf %8, %9 : vector<8x256xf32>
    %11 = vector.extract_strided_slice %10 {offsets = [0, 0], sizes = [8, 128], strides = [1, 1]} : vector<8x256xf32> to vector<8x128xf32>
    %12 = arith.truncf %11 : vector<8x128xf32> to vector<8x128xbf16>
    %13 = vector.extract_strided_slice %10 {offsets = [0, 128], sizes = [8, 128], strides = [1, 1]} : vector<8x256xf32> to vector<8x128xf32>
    %14 = arith.truncf %13 : vector<8x128xf32> to vector<8x128xbf16>
    %c0_8 = arith.constant 0 : index
    %c0_9 = arith.constant 0 : index
    %15 = vector.load %arg5[%c0_8, %c0_9] : memref<128x128xbf16, #tpu.memory_space<vmem>>, vector<128x128xbf16>
    %cst_10 = arith.constant dense<0.000000e+00> : vector<8x128xf32>
    %16 = tpu.matmul %12, %15, %cst_10 {dimension_numbers = #tpu.dot_dimension_numbers<[1], [0], [0], [1], [0, 0, 1, 1], [], []>} : vector<8x128xbf16>, vector<128x128xbf16>, vector<8x128xf32> -> vector<8x128xf32>
    %c0_11 = arith.constant 0 : index
    %c0_12 = arith.constant 0 : index
    %17 = vector.load %arg6[%c0_11, %c0_12] : memref<1x128xf32, #tpu.memory_space<vmem>>, vector<1x128xf32>
    %18 = vector.broadcast %17 : vector<1x128xf32> to vector<8x128xf32>
    %19 = arith.mulf %16, %18 : vector<8x128xf32>
    %c0_13 = arith.constant 0 : index
    %c0_14 = arith.constant 0 : index
    %20 = vector.load %arg7[%c0_13, %c0_14] : memref<1x128xf32, #tpu.memory_space<vmem>>, vector<1x128xf32>
    %21 = vector.broadcast %20 : vector<1x128xf32> to vector<8x128xf32>
    %22 = arith.addf %19, %21 : vector<8x128xf32>
    %cst_15 = arith.constant 0.000000e+00 : f32
    %23 = vector.broadcast %cst_15 : f32 to vector<8x128xf32>
    %24 = arith.maximumf %22, %23 : vector<8x128xf32>
    %25 = arith.truncf %24 : vector<8x128xf32> to vector<8x128xbf16>
    %c0_16 = arith.constant 0 : index
    %c0_17 = arith.constant 0 : index
    %26 = vector.load %arg8[%c0_16, %c0_17] : memref<128x128xbf16, #tpu.memory_space<vmem>>, vector<128x128xbf16>
    %cst_18 = arith.constant dense<0.000000e+00> : vector<8x128xf32>
    %27 = tpu.matmul %25, %26, %cst_18 {dimension_numbers = #tpu.dot_dimension_numbers<[1], [0], [0], [1], [0, 0, 1, 1], [], []>} : vector<8x128xbf16>, vector<128x128xbf16>, vector<8x128xf32> -> vector<8x128xf32>
    %c0_19 = arith.constant 0 : index
    %c0_20 = arith.constant 0 : index
    %28 = vector.load %arg9[%c0_19, %c0_20] : memref<1x128xf32, #tpu.memory_space<vmem>>, vector<1x128xf32>
    %29 = vector.broadcast %28 : vector<1x128xf32> to vector<8x128xf32>
    %30 = arith.addf %27, %29 : vector<8x128xf32>
    %c0_21 = arith.constant 0 : index
    %c0_22 = arith.constant 0 : index
    %31 = vector.load %arg12[%c0_21, %c0_22] : memref<8x128xf32, #tpu.memory_space<vmem>>, vector<8x128xf32>
    tpu.vector_store %arg12[%c0_21, %c0_22], %30 {strides = array<i32>} : memref<8x128xf32, #tpu.memory_space<vmem>>, vector<8x128xf32>,
    %c0_23 = arith.constant 0 : index
    %c0_24 = arith.constant 0 : index
    %32 = vector.load %arg10[%c0_23, %c0_24] : memref<128x128xbf16, #tpu.memory_space<vmem>>, vector<128x128xbf16>
    %cst_25 = arith.constant dense<0.000000e+00> : vector<8x128xf32>
    %33 = tpu.matmul %14, %32, %cst_25 {dimension_numbers = #tpu.dot_dimension_numbers<[1], [0], [0], [1], [0, 0, 1, 1], [], []>} : vector<8x128xbf16>, vector<128x128xbf16>, vector<8x128xf32> -> vector<8x128xf32>
    %c0_26 = arith.constant 0 : index
    %c0_27 = arith.constant 0 : index
    %34 = vector.load %arg11[%c0_26, %c0_27] : memref<1x128xf32, #tpu.memory_space<vmem>>, vector<1x128xf32>
    %35 = vector.broadcast %34 : vector<1x128xf32> to vector<8x128xf32>
    %36 = arith.addf %33, %35 : vector<8x128xf32>
    %c0_28 = arith.constant 0 : index
    %c0_29 = arith.constant 0 : index
    %37 = vector.load %arg13[%c0_28, %c0_29] : memref<8x128xf32, #tpu.memory_space<vmem>>, vector<8x128xf32>
    tpu.vector_store %arg13[%c0_28, %c0_29], %36 {strides = array<i32>} : memref<8x128xf32, #tpu.memory_space<vmem>>, vector<8x128xf32>,
    return
  }
  func.func @transform_0(%arg0: i32) -> (i32, i32) {
    %c0_i32 = arith.constant 0 : i32
    %c0_i32_0 = arith.constant 0 : i32
    return %arg0, %c0_i32 : i32, i32
  }
  func.func @transform_1(%arg0: i32) -> (i32, i32) {
    %c0_i32 = arith.constant 0 : i32
    %c0_i32_0 = arith.constant 0 : i32
    %c0_i32_1 = arith.constant 0 : i32
    return %c0_i32, %c0_i32_0 : i32, i32
  }
  func.func @transform_2(%arg0: i32) -> (i32, i32) {
    %c0_i32 = arith.constant 0 : i32
    %c0_i32_0 = arith.constant 0 : i32
    %c0_i32_1 = arith.constant 0 : i32
    return %c0_i32, %c0_i32_0 : i32, i32
  }
  func.func @transform_3(%arg0: i32) -> (i32, i32) {
    %c0_i32 = arith.constant 0 : i32
    %c0_i32_0 = arith.constant 0 : i32
    %c0_i32_1 = arith.constant 0 : i32
    return %c0_i32, %c0_i32_0 : i32, i32
  }
  func.func @transform_4(%arg0: i32) -> (i32, i32) {
    %c0_i32 = arith.constant 0 : i32
    %c0_i32_0 = arith.constant 0 : i32
    %c0_i32_1 = arith.constant 0 : i32
    return %c0_i32, %c0_i32_0 : i32, i32
  }
  func.func @transform_5(%arg0: i32) -> (i32, i32) {
    %c0_i32 = arith.constant 0 : i32
    %c0_i32_0 = arith.constant 0 : i32
    %c0_i32_1 = arith.constant 0 : i32
    return %c0_i32, %c0_i32_0 : i32, i32
  }
  func.func @transform_6(%arg0: i32) -> (i32, i32) {
    %c0_i32 = arith.constant 0 : i32
    %c0_i32_0 = arith.constant 0 : i32
    %c0_i32_1 = arith.constant 0 : i32
    return %c0_i32, %c0_i32_0 : i32, i32
  }
  func.func @transform_7(%arg0: i32) -> (i32, i32) {
    %c0_i32 = arith.constant 0 : i32
    %c0_i32_0 = arith.constant 0 : i32
    %c0_i32_1 = arith.constant 0 : i32
    return %c0_i32, %c0_i32_0 : i32, i32
  }
  func.func @transform_8(%arg0: i32) -> (i32, i32) {
    %c0_i32 = arith.constant 0 : i32
    %c0_i32_0 = arith.constant 0 : i32
    %c0_i32_1 = arith.constant 0 : i32
    return %c0_i32, %c0_i32_0 : i32, i32
  }
  func.func @transform_9(%arg0: i32) -> (i32, i32) {
    %c0_i32 = arith.constant 0 : i32
    %c0_i32_0 = arith.constant 0 : i32
    %c0_i32_1 = arith.constant 0 : i32
    return %c0_i32, %c0_i32_0 : i32, i32
  }
  func.func @transform_10(%arg0: i32) -> (i32, i32) {
    %c0_i32 = arith.constant 0 : i32
    %c0_i32_0 = arith.constant 0 : i32
    %c0_i32_1 = arith.constant 0 : i32
    return %c0_i32, %c0_i32_0 : i32, i32
  }
  func.func @transform_11(%arg0: i32) -> (i32, i32) {
    %c0_i32 = arith.constant 0 : i32
    %c0_i32_0 = arith.constant 0 : i32
    return %arg0, %c0_i32 : i32, i32
  }
  func.func @transform_12(%arg0: i32) -> (i32, i32) {
    %c0_i32 = arith.constant 0 : i32
    %c0_i32_0 = arith.constant 0 : i32
    return %arg0, %c0_i32 : i32, i32
  }
}

</mosaic_0001>

<bundles_post_ra>
// kernel: _forward.3
= control target key start
LH: loop header
LB: loop body
LE: loop exit
PB: predicated region body
PF: predicated region fallthrough
CT: control target
= control target key end

     0   :  { %vm220_vm0 = vcmask 1043456   ;;  %vm221_vm1 = vcmask 1044480   ;;  %v2381_v1 = vmov 65535   ;;  %vm165_vm2 = vcmask 203776   ;;  %s3220_s4 = inlined_call_operand.vmem [shape: bf16[25,64], index: 4, kind: input, shape index: {}]   ;;  %s3221_s0 = inlined_call_operand.vmem [shape: bf16[288,25], index: 0, kind: input, shape index: {}]   ;;  %s3222_s1 = inlined_call_operand.vmem [shape: bf16[288,25], index: 1, kind: input, shape index: {}]   ;;  %s3223_s2 = inlined_call_operand.vmem [shape: bf16[288,25], index: 2, kind: input, shape index: {}]   ;;  %s3224_s3 = inlined_call_operand.vmem [shape: bf16[288,25], index: 3, kind: input, shape index: {}]   ;;  %s3225_s5 = inlined_call_operand.vmem [shape: f32[1,64], index: 5, kind: input, shape index: {}]   ;;  %s3226_s6 = inlined_call_operand.vmem [shape: bf16[288,64], index: 6, kind: output, shape index: {}]  }
   0x1   :  { %v2307_v0 = vld [vmem:[%s3220_s4 + $0x8] sm:$0x1f]   ;;  %v222_v2 = vsel %vm220_vm0, 4294967295, %v2381_v1  ;;  %v2309_v4 = vld [vmem:[%s3221_s0] sm:$0xff]   ;;  %v2313_v10 = vld [vmem:[%s3221_s0 + $0x10] sm:$0xff]   ;;  %vm1806_vm3 = vcmask 519168  }
   0x2   :  { %v223_v3 = vsel %vm221_vm1, %v222_v2, 0  ;;  %v2308_v6 = vld [vmem:[%s3220_s4] sm:$0xff]   ;;  %2150 = vmatprep.mubr.msk.bf16.mxu0 %vm165_vm2, %v2309_v4  ;;  %v2311_v8 = vld [vmem:[%s3221_s0 + $0x8] sm:$0xff]   ;;  %v2314_v11 = vld [vmem:[%s3222_s1 + $0x10] sm:$0xff]  }
   0x3   :  { %v225_v5 = vand.u32 %v2307_v0, %v223_v3  ;;  %v2310_v7 = vld [vmem:[%s3222_s1] sm:$0xff]   ;;  %v2312_v9 = vld [vmem:[%s3222_s1 + $0x8] sm:$0xff]   ;;  %v2315_v12 = vld [vmem:[%s3221_s0 + $0x18] sm:$0xff]  }
   0x4   :  { %2190 = vmatprep.mubr.msk.bf16.mxu1 %vm165_vm2, %v2310_v7  ;;  %v2316_v13 = vld [vmem:[%s3222_s1 + $0x18] sm:$0xff]   ;;  %v2317_v14 = vld [vmem:[%s3221_s0 + $0x20] sm:$0xff]   ;;  %v2319_v16 = vld [vmem:[%s3221_s0 + $0x28] sm:$0xff]  }
   0x5   :  { %2146 = vmatprep.subr.bf16.mxu0 %v225_v5  ;;  %2186 = vmatprep.subr.bf16.mxu1 %v225_v5  ;;  %v2318_v15 = vld [vmem:[%s3222_s1 + $0x20] sm:$0xff]   ;;  %v2320_v17 = vld [vmem:[%s3222_s1 + $0x28] sm:$0xff]   ;;  %v2321_v18 = vld [vmem:[%s3221_s0 + $0x30] sm:$0xff]  }
   0x6   :  { %2147 = vmatpush3.bf16.msra.mxu0 %v225_v5  ;;  %2187 = vmatpush3.bf16.msra.mxu1 %v225_v5  ;;  %v2322_v19 = vld [vmem:[%s3222_s1 + $0x30] sm:$0xff]   ;;  %v2323_v20 = vld [vmem:[%s3221_s0 + $0x38] sm:$0xff]   ;;  %v2325_v22 = vld [vmem:[%s3221_s0 + $0x40] sm:$0xff]  }
   0x7   :  { %2148 = vmatprep.subr.bf16.mxu0 %v2308_v6  ;;  %2188 = vmatprep.subr.bf16.mxu1 %v2308_v6  ;;  %v2324_v21 = vld [vmem:[%s3222_s1 + $0x38] sm:$0xff]   ;;  %v2326_v23 = vld [vmem:[%s3222_s1 + $0x40] sm:$0xff]   ;;  %v2327_v24 = vld [vmem:[%s3221_s0 + $0x48] sm:$0xff]  }
   0x8   :  { %v2328_v25 = vld [vmem:[%s3222_s1 + $0x48] sm:$0xff]   ;;  %v2329_v26 = vld [vmem:[%s3221_s0 + $0x50] sm:$0xff]   ;;  %v2331_v28 = vld [vmem:[%s3221_s0 + $0x58] sm:$0xff]  }
   0x9   :  { %v2330_v27 = vld [vmem:[%s3222_s1 + $0x50] sm:$0xff]   ;;  %v2332_v29 = vld [vmem:[%s3222_s1 + $0x58] sm:$0xff]   ;;  %v2333_v30 = vld [vmem:[%s3221_s0 + $0x60] sm:$0xff]  }
   0xa   :  { %2149 = vmatpush3.bf16.msra.mxu0 %v2308_v6  ;;  %2189 = vmatpush3.bf16.msra.mxu1 %v2308_v6  ;;  %v2334_v31 = vld [vmem:[%s3222_s1 + $0x60] sm:$0xff]   ;;  %v2335_v32 = vld [vmem:[%s3221_s0 + $0x68] sm:$0xff]   ;;  %v2337_v34 = vld [vmem:[%s3221_s0 + $0x70] sm:$0xff]  }
   0xb   :  { %2226 = vmatprep.subr.bf16.mxu0 %v225_v5  ;;  %2266 = vmatprep.subr.bf16.mxu1 %v225_v5  ;;  %v2336_v33 = vld [vmem:[%s3222_s1 + $0x68] sm:$0xff]   ;;  %v2338_v35 = vld [vmem:[%s3222_s1 + $0x70] sm:$0xff]   ;;  %v2339_v36 = vld [vmem:[%s3221_s0 + $0x78] sm:$0xff]  }
   0xc   :  { %v2340_v37 = vld [vmem:[%s3222_s1 + $0x78] sm:$0xff]   ;;  %v2341_v38 = vld [vmem:[%s3221_s0 + $0x80] sm:$0xff]   ;;  %v2343_v40 = vld [vmem:[%s3221_s0 + $0x88] sm:$0xff]  }
   0xd   :  { %2151 = vmatmul.mubr.msk.bf16.vlgmr.msra.gmra.mxu0 %vm165_vm2, %v2311_v8  ;;  %2191 = vmatmul.mubr.msk.bf16.vlgmr.msra.gmra.mxu1 %vm165_vm2, %v2312_v9  ;;  %v2342_v39 = vld [vmem:[%s3222_s1 + $0x80] sm:$0xff]   ;;  %v2344_v41 = vld [vmem:[%s3222_s1 + $0x88] sm:$0xff]   ;;  %v2349_v46 = vld [vmem:[%s3223_s2 + $0x10] sm:$0xff]  }
   0xe   :  { %2227 = vmatpush3.bf16.msra.mxu0 %v225_v5  ;;  %2267 = vmatpush3.bf16.msra.mxu1 %v225_v5  ;;  %v2345_v42 = vld [vmem:[%s3223_s2] sm:$0xff]   ;;  %v2347_v44 = vld [vmem:[%s3223_s2 + $0x8] sm:$0xff]   ;;  %v2350_v47 = vld [vmem:[%s3224_s3 + $0x10] sm:$0xff]  }
   0xf   :  { %2154 = vmatprep.mubr.msk.bf16.mxu0 %vm165_vm2, %v2313_v10  ;;  %2194 = vmatprep.mubr.msk.bf16.mxu1 %vm165_vm2, %v2314_v11  ;;  %v2346_v43 = vld [vmem:[%s3224_s3] sm:$0xff]   ;;  %v2348_v45 = vld [vmem:[%s3224_s3 + $0x8] sm:$0xff]   ;;  %v2351_v48 = vld [vmem:[%s3223_s2 + $0x18] sm:$0xff]  }
  0x10   :  { %2228 = vmatprep.subr.bf16.mxu0 %v2308_v6  ;;  %2268 = vmatprep.subr.bf16.mxu1 %v2308_v6  ;;  %v2352_v49 = vld [vmem:[%s3224_s3 + $0x18] sm:$0xff]   ;;  %v2353_v50 = vld [vmem:[%s3223_s2 + $0x20] sm:$0xff]   ;;  %v2355_v52 = vld [vmem:[%s3223_s2 + $0x28] sm:$0xff]  }
  0x11   :  { %v2354_v51 = vld [vmem:[%s3224_s3 + $0x20] sm:$0xff]   ;;  %v2356_v53 = vld [vmem:[%s3224_s3 + $0x28] sm:$0xff]   ;;  %v2357_v54 = vld [vmem:[%s3223_s2 + $0x30] sm:$0xff]  }
  0x12   :  { %2229 = vmatpush3.bf16.msra.mxu0 %v2308_v6  ;;  %2269 = vmatpush3.bf16.msra.mxu1 %v2308_v6  ;;  %v2358_v55 = vld [vmem:[%s3224_s3 + $0x30] sm:$0xff]   ;;  %v2359_v56 = vld [vmem:[%s3223_s2 + $0x38] sm:$0xff]   ;;  %v2361_v58 = vld [vmem:[%s3223_s2 + $0x40] sm:$0xff]  }
  0x13   :  { %v2360_v57 = vld [vmem:[%s3224_s3 + $0x38] sm:$0xff]   ;;  %v2362_v59 = vld [vmem:[%s3224_s3 + $0x40] sm:$0xff]   ;;  %v2363_v60 = vld [vmem:[%s3223_s2 + $0x48] sm:$0xff]  }
  0x14   :  { %v2364_v61 = vld [vmem:[%s3224_s3 + $0x48] sm:$0xff]   ;;  %v2365_v62 = vld [vmem:[%s3223_s2 + $0x50] sm:$0xff]   ;;  %v2367_v0 = vld [vmem:[%s3223_s2 + $0x58] sm:$0xff]  }
  0x15   :  { %2155 = vmatmul.mubr.msk.bf16.gmra.mxu0 %vm165_vm2, %v2315_v12  ;;  %2195 = vmatmul.mubr.msk.bf16.gmra.mxu1 %vm165_vm2, %v2316_v13  ;;  %v2366_v63 = vld [vmem:[%s3224_s3 + $0x50] sm:$0xff]   ;;  %v2368_v1 = vld [vmem:[%s3224_s3 + $0x58] sm:$0xff]   ;;  %v2369_v2 = vld [vmem:[%s3223_s2 + $0x60] sm:$0xff]  }
  0x16   :  { %2158 = vmatprep.mubr.msk.bf16.mxu0 %vm165_vm2, %v2317_v14  ;;  %2198 = vmatprep.mubr.msk.bf16.mxu1 %vm165_vm2, %v2318_v15  ;;  %v2370_v3 = vld [vmem:[%s3224_s3 + $0x60] sm:$0xff]   ;;  %v2371_v4 = vld [vmem:[%s3223_s2 + $0x68] sm:$0xff]   ;;  %v2373_v6 = vld [vmem:[%s3223_s2 + $0x70] sm:$0xff]  }
  0x17   :  { %v2372_v5 = vld [vmem:[%s3224_s3 + $0x68] sm:$0xff]   ;;  %v2374_v7 = vld [vmem:[%s3224_s3 + $0x70] sm:$0xff]   ;;  %v2375_v8 = vld [vmem:[%s3223_s2 + $0x78] sm:$0xff]  }
  0x18   :  { %v2376_v9 = vld [vmem:[%s3224_s3 + $0x78] sm:$0xff]   ;;  %v2377_v10 = vld [vmem:[%s3223_s2 + $0x80] sm:$0xff]   ;;  %v2379_v12 = vld [vmem:[%s3223_s2 + $0x88] sm:$0xff]  }
  0x19   :  { %v2378_v11 = vld [vmem:[%s3224_s3 + $0x80] sm:$0xff]   ;;  %v2380_v13 = vld [vmem:[%s3224_s3 + $0x88] sm:$0xff]  }
  0x1d   :  { %2159 = vmatmul.mubr.msk.bf16.gmra.mxu0 %vm165_vm2, %v2319_v16  ;;  %2199 = vmatmul.mubr.msk.bf16.gmra.mxu1 %vm165_vm2, %v2320_v17 }
  0x1e   :  { %2162 = vmatprep.mubr.msk.bf16.mxu0 %vm165_vm2, %v2321_v18  ;;  %2202 = vmatprep.mubr.msk.bf16.mxu1 %vm165_vm2, %v2322_v19 }
  0x25   :  { %2163 = vmatmul.mubr.msk.bf16.gmra.mxu0 %vm165_vm2, %v2323_v20  ;;  %2203 = vmatmul.mubr.msk.bf16.gmra.mxu1 %vm165_vm2, %v2324_v21 }
  0x26   :  { %2166 = vmatprep.mubr.msk.bf16.mxu0 %vm165_vm2, %v2325_v22  ;;  %2206 = vmatprep.mubr.msk.bf16.mxu1 %vm165_vm2, %v2326_v23 }
  0x2d   :  { %2167 = vmatmul.mubr.msk.bf16.gmra.mxu0 %vm165_vm2, %v2327_v24  ;;  %2207 = vmatmul.mubr.msk.bf16.gmra.mxu1 %vm165_vm2, %v2328_v25 }
  0x2e   :  { %2170 = vmatprep.mubr.msk.bf16.mxu0 %vm165_vm2, %v2329_v26  ;;  %2210 = vmatprep.mubr.msk.bf16.mxu1 %vm165_vm2, %v2330_v27 }
  0x35   :  { %2171 = vmatmul.mubr.msk.bf16.gmra.mxu0 %vm165_vm2, %v2331_v28  ;;  %2211 = vmatmul.mubr.msk.bf16.gmra.mxu1 %vm165_vm2, %v2332_v29 }
  0x36   :  { %2174 = vmatprep.mubr.msk.bf16.mxu0 %vm165_vm2, %v2333_v30  ;;  %2214 = vmatprep.mubr.msk.bf16.mxu1 %vm165_vm2, %v2334_v31 }
  0x3d   :  { %2175 = vmatmul.mubr.msk.bf16.gmra.mxu0 %vm165_vm2, %v2335_v32  ;;  %2215 = vmatmul.mubr.msk.bf16.gmra.mxu1 %vm165_vm2, %v2336_v33 }
  0x3e   :  { %2178 = vmatprep.mubr.msk.bf16.mxu0 %vm165_vm2, %v2337_v34  ;;  %2218 = vmatprep.mubr.msk.bf16.mxu1 %vm165_vm2, %v2338_v35 }
  0x45   :  { %2179 = vmatmul.mubr.msk.bf16.gmra.mxu0 %vm165_vm2, %v2339_v36  ;;  %2219 = vmatmul.mubr.msk.bf16.gmra.mxu1 %vm165_vm2, %v2340_v37 }
  0x46   :  { %2182 = vmatprep.mubr.msk.bf16.mxu0 %vm165_vm2, %v2341_v38  ;;  %2222 = vmatprep.mubr.msk.bf16.mxu1 %vm165_vm2, %v2342_v39 }
  0x4d   :  { %2183 = vmatmul.mubr.msk.bf16.gmra.mxu0 %vm165_vm2, %v2343_v40  ;;  %2223 = vmatmul.mubr.msk.bf16.gmra.mxu1 %vm165_vm2, %v2344_v41 }
  0x4e   :  { %2230 = vmatprep.mubr.msk.bf16.mxu0 %vm165_vm2, %v2345_v42  ;;  %2270 = vmatprep.mubr.msk.bf16.mxu1 %vm165_vm2, %v2346_v43 }
  0x55   :  { %2231 = vmatmul.mubr.msk.bf16.vlgmr.msra.gmra.mxu0 %vm165_vm2, %v2347_v44  ;;  %2271 = vmatmul.mubr.msk.bf16.vlgmr.msra.gmra.mxu1 %vm165_vm2, %v2348_v45 }
  0x56   :  { %2234 = vmatprep.mubr.msk.bf16.mxu0 %vm165_vm2, %v2349_v46  ;;  %2274 = vmatprep.mubr.msk.bf16.mxu1 %vm165_vm2, %v2350_v47 }
  0x5d   :  { %2235 = vmatmul.mubr.msk.bf16.gmra.mxu0 %vm165_vm2, %v2351_v48  ;;  %2275 = vmatmul.mubr.msk.bf16.gmra.mxu1 %vm165_vm2, %v2352_v49 }
  0x5e   :  { %2238 = vmatprep.mubr.msk.bf16.mxu0 %vm165_vm2, %v2353_v50  ;;  %2278 = vmatprep.mubr.msk.bf16.mxu1 %vm165_vm2, %v2354_v51 }
  0x65   :  { %2239 = vmatmul.mubr.msk.bf16.gmra.mxu0 %vm165_vm2, %v2355_v52  ;;  %2279 = vmatmul.mubr.msk.bf16.gmra.mxu1 %vm165_vm2, %v2356_v53 }
  0x66   :  { %2242 = vmatprep.mubr.msk.bf16.mxu0 %vm165_vm2, %v2357_v54  ;;  %2282 = vmatprep.mubr.msk.bf16.mxu1 %vm165_vm2, %v2358_v55 }
  0x6d   :  { %2243 = vmatmul.mubr.msk.bf16.gmra.mxu0 %vm165_vm2, %v2359_v56  ;;  %2283 = vmatmul.mubr.msk.bf16.gmra.mxu1 %vm165_vm2, %v2360_v57 }
  0x6e   :  { %2246 = vmatprep.mubr.msk.bf16.mxu0 %vm165_vm2, %v2361_v58  ;;  %2286 = vmatprep.mubr.msk.bf16.mxu1 %vm165_vm2, %v2362_v59 }
  0x75   :  { %2247 = vmatmul.mubr.msk.bf16.gmra.mxu0 %vm165_vm2, %v2363_v60  ;;  %2287 = vmatmul.mubr.msk.bf16.gmra.mxu1 %vm165_vm2, %v2364_v61 }
  0x76   :  { %2250 = vmatprep.mubr.msk.bf16.mxu0 %vm165_vm2, %v2365_v62  ;;  %2290 = vmatprep.mubr.msk.bf16.mxu1 %vm165_vm2, %v2366_v63 }
  0x7d   :  { %2251 = vmatmul.mubr.msk.bf16.gmra.mxu0 %vm165_vm2, %v2367_v0  ;;  %2291 = vmatmul.mubr.msk.bf16.gmra.mxu1 %vm165_vm2, %v2368_v1 }
  0x7e   :  { %2254 = vmatprep.mubr.msk.bf16.mxu0 %vm165_vm2, %v2369_v2  ;;  %2294 = vmatprep.mubr.msk.bf16.mxu1 %vm165_vm2, %v2370_v3 }
  0x85   :  { %2255 = vmatmul.mubr.msk.bf16.gmra.mxu0 %vm165_vm2, %v2371_v4  ;;  %2295 = vmatmul.mubr.msk.bf16.gmra.mxu1 %vm165_vm2, %v2372_v5 }
  0x86   :  { %2258 = vmatprep.mubr.msk.bf16.mxu0 %vm165_vm2, %v2373_v6  ;;  %2298 = vmatprep.mubr.msk.bf16.mxu1 %vm165_vm2, %v2374_v7 }
  0x8d   :  { %2259 = vmatmul.mubr.msk.bf16.gmra.mxu0 %vm165_vm2, %v2375_v8  ;;  %2299 = vmatmul.mubr.msk.bf16.gmra.mxu1 %vm165_vm2, %v2376_v9 }
  0x8e   :  { %2262 = vmatprep.mubr.msk.bf16.mxu0 %vm165_vm2, %v2377_v10  ;;  %2302 = vmatprep.mubr.msk.bf16.mxu1 %vm165_vm2, %v2378_v11 }
  0x95   :  { %2263 = vmatmul.mubr.msk.bf16.gmra.mxu0 %vm165_vm2, %v2379_v12  ;;  %2303 = vmatmul.mubr.msk.bf16.gmra.mxu1 %vm165_vm2, %v2380_v13 }
  0xcd   :  { %v2711_v14 = vpop.f32.mrf.mxu0  ;;  %v2713_v15 = vpop.f32.mrf.mxu1 }
  0xcf   :  { %v2717_v17 = vpop.f32.mrf.mxu0  ;;  %v2719_v18 = vpop.f32.mrf.mxu1 }
  0xd1   :  { %v2723_v20 = vpop.f32.mrf.mxu0  ;;  %v2725_v21 = vpop.f32.mrf.mxu1 }
  0xd3   :  { %v2729_v23 = vpop.f32.mrf.mxu0  ;;  %v2731_v24 = vpop.f32.mrf.mxu1 }
  0xd5   :  { %v2735_v26 = vpop.f32.mrf.mxu0  ;;  %v2737_v27 = vpop.f32.mrf.mxu1 }
  0xd7   :  { %v2741_v29 = vpop.f32.mrf.mxu0  ;;  %v2743_v30 = vpop.f32.mrf.mxu1 }
  0xd9   :  { %v2747_v32 = vpop.f32.mrf.mxu0  ;;  %v2749_v33 = vpop.f32.mrf.mxu1 }
  0xdb   :  { %v2753_v35 = vpop.f32.mrf.mxu0  ;;  %v2755_v36 = vpop.f32.mrf.mxu1 }
  0xdd   :  { %v2759_v38 = vpop.f32.mrf.mxu0  ;;  %v2761_v39 = vpop.f32.mrf.mxu1 }
  0xdf   :  { %v2765_v41 = vpop.f32.mrf.mxu0  ;;  %v2767_v42 = vpop.f32.mrf.mxu1 }
  0xe1   :  { %v2771_v44 = vpop.f32.mrf.mxu0  ;;  %v2773_v45 = vpop.f32.mrf.mxu1 }
  0xe3   :  { %v2777_v47 = vpop.f32.mrf.mxu0  ;;  %v2779_v48 = vpop.f32.mrf.mxu1 }
  0xe5   :  { %v2783_v50 = vpop.f32.mrf.mxu0  ;;  %v2785_v51 = vpop.f32.mrf.mxu1 }
  0xe7   :  { %v2789_v53 = vpop.f32.mrf.mxu0  ;;  %v2791_v54 = vpop.f32.mrf.mxu1 }
  0xe9   :  { %v2795_v56 = vpop.f32.mrf.mxu0  ;;  %v2797_v57 = vpop.f32.mrf.mxu1 }
  0xeb   :  { %v2801_v59 = vpop.f32.mrf.mxu0  ;;  %v2803_v60 = vpop.f32.mrf.mxu1 }
  0xed   :  { %v2807_v62 = vpop.f32.mrf.mxu0  ;;  %v2809_v63 = vpop.f32.mrf.mxu1 }
  0xef   :  { %v2813_v1 = vpop.f32.mrf.mxu0  ;;  %v2815_v2 = vpop.f32.mrf.mxu1 }
  0xf1   :  { %v2819_v4 = vpop.f32.mrf.mxu0  ;;  %v2821_v5 = vpop.f32.mrf.mxu1 }
  0xf3   :  { %v2825_v7 = vpop.f32.mrf.mxu0  ;;  %v2827_v8 = vpop.f32.mrf.mxu1 }
  0xf5   :  { %v2831_v10 = vpop.f32.mrf.mxu0  ;;  %v2833_v11 = vpop.f32.mrf.mxu1 }
  0xf7   :  { %v2837_v13 = vpop.f32.mrf.mxu0  ;;  %v2839_v3 = vpop.f32.mrf.mxu1 }
  0xf9   :  { %v2843_v0 = vpop.f32.mrf.mxu0  ;;  %v2845_v61 = vpop.f32.mrf.mxu1 }
  0xfb   :  { %v2849_v58 = vpop.f32.mrf.mxu0  ;;  %v2851_v55 = vpop.f32.mrf.mxu1 }
  0xfc   :  { %3252 = vst [vmem:[#allocation2_spill] sm:$0xff] %v2851_v55 }
  0xfd   :  { %v2855_v52 = vpop.f32.mrf.mxu0  ;;  %v2857_v49 = vpop.f32.mrf.mxu1 }
  0xfe   :  { %3253 = vst [vmem:[#allocation3_spill] sm:$0xff] %v2855_v52  ;;  %3254 = vst [vmem:[#allocation4_spill] sm:$0xff] %v2857_v49 }
  0xff   :  { %v2861_v46 = vpop.f32.mrf.mxu0  ;;  %v2863_v43 = vpop.f32.mrf.mxu1 }
 0x100   :  { %3255 = vst [vmem:[#allocation5_spill] sm:$0xff] %v2861_v46  ;;  %3256 = vst [vmem:[#allocation6_spill] sm:$0xff] %v2863_v43 }
 0x101   :  { %v2867_v40 = vpop.f32.mrf.mxu0  ;;  %v2869_v37 = vpop.f32.mrf.mxu1 }
 0x102   :  { %3257 = vst [vmem:[#allocation7_spill] sm:$0xff] %v2867_v40  ;;  %3258 = vst [vmem:[#allocation8_spill] sm:$0xff] %v2869_v37  ;;  %v3277_v40 = vmax.f32 %v2711_v14, %v2713_v15  ;;  %v3279_v14 = vmax.f32 %v2723_v20, %v2725_v21  ;;  %v3281_v20 = vmax.f32 %v2735_v26, %v2737_v27 }
 0x103   :  { %v2873_v34 = vpop.f32.mrf.mxu0  ;;  %v2875_v31 = vpop.f32.mrf.mxu1 }
 0x104   :  { %3259 = vst [vmem:[#allocation9_spill] sm:$0xff] %v2873_v34  ;;  %3260 = vst [vmem:[#allocation10_spill] sm:$0xff] %v2875_v31 }
 0x105   :  { %v2879_v28 = vpop.f32.mrf.mxu0  ;;  %v2881_v25 = vpop.f32.mrf.mxu1 }
 0x106   :  { %3261 = vst [vmem:[#allocation11_spill] sm:$0xff] %v2879_v28  ;;  %3262 = vst [vmem:[#allocation12_spill] sm:$0xff] %v2881_v25 }
 0x107   :  { %v2885_v22 = vpop.f32.mrf.mxu0  ;;  %v2887_v19 = vpop.f32.mrf.mxu1 }
 0x108   :  { %3263 = vst [vmem:[#allocation13_spill] sm:$0xff] %v2885_v22  ;;  %3264 = vst [vmem:[#allocation14_spill] sm:$0xff] %v2887_v19 }
 0x109   :  { %v2891_v16 = vpop.f32.mrf.mxu0  ;;  %v2893_v37 = vpop.f32.mrf.mxu1 }
 0x10a   :  { %3265 = vst [vmem:[#allocation15_spill] sm:$0xff] %v2891_v16  ;;  %3266 = vst [vmem:[#allocation16_spill] sm:$0xff] %v2893_v37 }
 0x10b   :  { %v2897_v31 = vpop.f32.mrf.mxu0  ;;  %v2899_v34 = vpop.f32.mrf.mxu1 }
 0x10c   :  { %3267 = vst [vmem:[#allocation17_spill] sm:$0xff] %v2897_v31  ;;  %3268 = vst [vmem:[#allocation18_spill] sm:$0xff] %v2899_v34 }
 0x10d   :  { %v2903_v25 = vpop.f32.mrf.mxu0  ;;  %v2905_v28 = vpop.f32.mrf.mxu1 }
 0x10e   :  { %3269 = vst [vmem:[#allocation19_spill] sm:$0xff] %v2903_v25  ;;  %3270 = vst [vmem:[#allocation20_spill] sm:$0xff] %v2905_v28 }
 0x10f   :  { %v2909_v19 = vpop.f32.mrf.mxu0  ;;  %v2911_v22 = vpop.f32.mrf.mxu1 }
 0x110   :  { %3271 = vst [vmem:[#allocation21_spill] sm:$0xff] %v2909_v19  ;;  %3272 = vst [vmem:[#allocation22_spill] sm:$0xff] %v2911_v22  ;;  %v2933_v22 = vld [vmem:[%s3225_s5] ss:$0 sm:$0xff] }
 0x111   :  { %v2915_v37 = vpop.f32.mrf.mxu0  ;;  %v2917_v16 = vpop.f32.mrf.mxu1 }
 0x112   :  { %3273 = vst [vmem:[#allocation23_spill] sm:$0xff] %v2915_v37  ;;  %3274 = vst [vmem:[#allocation24_spill] sm:$0xff] %v2917_v16  ;;  %v3278_v37 = vmax.f32 %v2717_v17, %v2719_v18 }
 0x113   :  { %v2921_v34 = vpop.f32.mrf.mxu0  ;;  %v2923_v31 = vpop.f32.mrf.mxu1 }
 0x114   :  { %3275 = vst [vmem:[#allocation25_spill] sm:$0xff] %v2921_v34  ;;  %3276 = vst [vmem:[#allocation26_spill] sm:$0xff] %v2923_v31 }
 0x115   :  { %v2232_v28 = vpop.f32.mrf.mxu0  ;;  %v2272_v25 = vpop.f32.mrf.mxu1 }
 0x116   :  { %v1156_v6 = vmax.f32 %v3277_v40, %v2232_v28 }
 0x117   :  { %v1011_v19 = vpop.f32.mrf.mxu0  ;;  %v1404_v9 = vpop.f32.mrf.mxu1 }
 0x118   :  { %v1549_v16 = vmax.f32 %v1156_v6, %v2272_v25  ;;  %v1154_v43 = vmax.f32 %v3278_v37, %v1011_v19  ;;  %v3280_v25 = vmax.f32 %v2729_v23, %v2731_v24 }
 0x119   :  { %v2233_v46 = vpop.f32.mrf.mxu0  ;;  %v2273_v12 = vpop.f32.mrf.mxu1 }
 0x11a   :  { %v1592_v31 = vadd.f32 %v2933_v22, %v1549_v16  ;;  %v1547_v34 = vmax.f32 %v1154_v43, %v1404_v9  ;;  %v1157_v15 = vmax.f32 %v3279_v14, %v2233_v46 }
 0x11b   :  { %v1014_v28 = vpop.f32.mrf.mxu0  ;;  %v1407_v40 = vpop.f32.mrf.mxu1 }
 0x11c   :  { %v1628_v49 = vmax.f32 %v1592_v31, 0.0  ;;  %v1590_v52 = vadd.f32 %v2933_v22, %v1547_v34  ;;  %v1550_v55 = vmax.f32 %v1157_v15, %v2273_v12  ;;  %v1155_v17 = vmax.f32 %v3280_v25, %v1014_v28 }
 0x11d   :  { %v2236_v18 = vpop.f32.mrf.mxu0  ;;  %v2276_v19 = vpop.f32.mrf.mxu1  ;;  %v3283_v15 = vmax.f32 %v2747_v32, %v2749_v33 }
 0x11e   :  { %v2032_v37 = vpack.c.bf16 %v1628_v49, %v1628_v49  ;;  %v1626_v16 = vmax.f32 %v1590_v52, 0.0  ;;  %v1593_v43 = vadd.f32 %v2933_v22, %v1550_v55  ;;  %v1548_v6 = vmax.f32 %v1155_v17, %v1407_v40 }
 0x11f   :  { %v1160_v21 = vmax.f32 %v3281_v20, %v2236_v18  ;;  %v1027_v31 = vpop.f32.mrf.mxu0  ;;  %v1420_v46 = vpop.f32.mrf.mxu1  ;;  %v3282_v49 = vmax.f32 %v2741_v29, %v2743_v30 }
 0x120   :  { %1809 = vst.msk [vmem:[%s3226_s6 + $0x8] sm:$0xf] %vm1806_vm3, %v2032_v37  ;;  %v2030_v23 = vpack.c.bf16 %v1626_v16, %v1626_v16  ;;  %v1629_v24 = vmax.f32 %v1593_v43, 0.0  ;;  %v1591_v34 = vadd.f32 %v2933_v22, %v1548_v6 }
 0x121   :  { %v1158_v52 = vmax.f32 %v3282_v49, %v1027_v31  ;;  %v1553_v55 = vmax.f32 %v1160_v21, %v2276_v19  ;;  %v2237_v9 = vpop.f32.mrf.mxu0  ;;  %v2277_v12 = vpop.f32.mrf.mxu1  ;;  %v3284_v19 = vmax.f32 %v2753_v35, %v2755_v36  ;;  %v3285_v21 = vmax.f32 %v2759_v38, %v2761_v39 }
 0x122   :  { %1807 = vst.msk [vmem:[%s3226_s6] sm:$0xf] %vm1806_vm3, %v2030_v23  ;;  %v2033_v26 = vpack.c.bf16 %v1629_v24, %v1629_v24  ;;  %v1627_v27 = vmax.f32 %v1591_v34, 0.0  ;;  %v1161_v28 = vmax.f32 %v3283_v15, %v2237_v9 }
 0x123   :  { %v1551_v14 = vmax.f32 %v1158_v52, %v1420_v46  ;;  %v1596_v40 = vadd.f32 %v2933_v22, %v1553_v55  ;;  %v1030_v25 = vpop.f32.mrf.mxu0  ;;  %v1423_v29 = vpop.f32.mrf.mxu1  ;;  %v3286_v52 = vmax.f32 %v2765_v41, %v2767_v42 }
 0x124   :  { %1810 = vst.msk [vmem:[%s3226_s6 + $0xc] sm:$0xf] %vm1806_vm3, %v2033_v26  ;;  %v2031_v30 = vpack.c.bf16 %v1627_v27, %v1627_v27  ;;  %v1554_v18 = vmax.f32 %v1161_v28, %v2277_v12  ;;  %v1159_v37 = vmax.f32 %v3284_v19, %v1030_v25  ;;  %v3287_v27 = vmax.f32 %v2771_v44, %v2773_v45 }
 0x125   :  { %v1594_v17 = vadd.f32 %v2933_v22, %v1551_v14  ;;  %v1632_v16 = vmax.f32 %v1596_v40, 0.0  ;;  %v2240_v32 = vpop.f32.mrf.mxu0  ;;  %v2280_v33 = vpop.f32.mrf.mxu1 }
 0x126   :  { %1808 = vst.msk [vmem:[%s3226_s6 + $0x4] sm:$0xf] %vm1806_vm3, %v2031_v30  ;;  %v1597_v6 = vadd.f32 %v2933_v22, %v1554_v18  ;;  %v1552_v20 = vmax.f32 %v1159_v37, %v1423_v29  ;;  %v1164_v31 = vmax.f32 %v3285_v21, %v2240_v32  ;;  %v3288_v29 = vmax.f32 %v2777_v47, %v2779_v48 }
 0x127   :  { %v1630_v43 = vmax.f32 %v1594_v17, 0.0  ;;  %v2036_v46 = vpack.c.bf16 %v1632_v16, %v1632_v16  ;;  %v1043_v23 = vpop.f32.mrf.mxu0  ;;  %v1436_v35 = vpop.f32.mrf.mxu1  ;;  %v3289_v16 = vmax.f32 %v2783_v50, %v2785_v51  ;;  %v3290_v21 = vmax.f32 %v2789_v53, %v2791_v54 }
 0x128   :  { %v1633_v24 = vmax.f32 %v1597_v6, 0.0  ;;  %v1595_v34 = vadd.f32 %v2933_v22, %v1552_v20  ;;  %v1557_v49 = vmax.f32 %v1164_v31, %v2280_v33  ;;  %v1162_v55 = vmax.f32 %v3286_v52, %v1043_v23 }
 0x129   :  { %v2034_v36 = vpack.c.bf16 %v1630_v43, %v1630_v43  ;;  %1813 = vst.msk [vmem:[%s3226_s6 + $0x18] sm:$0xf] %vm1806_vm3, %v2036_v46  ;;  %v2241_v9 = vpop.f32.mrf.mxu0  ;;  %v2281_v38 = vpop.f32.mrf.mxu1 }
 0x12a   :  { %v2037_v39 = vpack.c.bf16 %v1633_v24, %v1633_v24  ;;  %v1631_v12 = vmax.f32 %v1595_v34, 0.0  ;;  %v1600_v26 = vadd.f32 %v2933_v22, %v1557_v49  ;;  %v1165_v14 = vmax.f32 %v3287_v27, %v2241_v9 }
 0x12b   :  { %1811 = vst.msk [vmem:[%s3226_s6 + $0x10] sm:$0xf] %vm1806_vm3, %v2034_v36  ;;  %v1555_v15 = vmax.f32 %v1162_v55, %v1436_v35  ;;  %v1046_v28 = vpop.f32.mrf.mxu0  ;;  %v1439_v40 = vpop.f32.mrf.mxu1  ;;  %v3291_v34 = vmax.f32 %v2795_v56, %v2797_v57 }
 0x12c   :  { %1814 = vst.msk [vmem:[%s3226_s6 + $0x1c] sm:$0xf] %vm1806_vm3, %v2037_v39  ;;  %v2035_v41 = vpack.c.bf16 %v1631_v12, %v1631_v12  ;;  %v1636_v42 = vmax.f32 %v1600_v26, 0.0  ;;  %v1558_v25 = vmax.f32 %v1165_v14, %v2281_v38  ;;  %v1163_v30 = vmax.f32 %v3288_v29, %v1046_v28 }
 0x12d   :  { %v1598_v17 = vadd.f32 %v2933_v22, %v1555_v15  ;;  %v2244_v18 = vpop.f32.mrf.mxu0  ;;  %v2284_v44 = vpop.f32.mrf.mxu1  ;;  %v3292_v38 = vmax.f32 %v2801_v59, %v2803_v60  ;;  %v3293_v15 = vmax.f32 %v2807_v62, %v2809_v63  ;;  %v3294_v29 = vmax.f32 %v2813_v1, %v2815_v2 }
 0x12e   :  { %1812 = vst.msk [vmem:[%s3226_s6 + $0x14] sm:$0xf] %vm1806_vm3, %v2035_v41  ;;  %v2040_v45 = vpack.c.bf16 %v1636_v42, %v1636_v42  ;;  %v1601_v19 = vadd.f32 %v2933_v22, %v1558_v25  ;;  %v1556_v37 = vmax.f32 %v1163_v30, %v1439_v40  ;;  %v1168_v32 = vmax.f32 %v3289_v16, %v2244_v18 }
 0x12f   :  { %v1634_v33 = vmax.f32 %v1598_v17, 0.0  ;;  %v1059_v47 = vpop.f32.mrf.mxu0  ;;  %v1452_v48 = vpop.f32.mrf.mxu1 }
 0x130   :  { %1817 = vst.msk [vmem:[%s3226_s6 + $0x28] sm:$0xf] %vm1806_vm3, %v2040_v45  ;;  %v1637_v43 = vmax.f32 %v1601_v19, 0.0  ;;  %v1599_v6 = vadd.f32 %v2933_v22, %v1556_v37  ;;  %v1561_v20 = vmax.f32 %v1168_v32, %v2284_v44  ;;  %v1166_v31 = vmax.f32 %v3290_v21, %v1059_v47 }
 0x131   :  { %v2038_v46 = vpack.c.bf16 %v1634_v33, %v1634_v33  ;;  %v2245_v23 = vpop.f32.mrf.mxu0  ;;  %v2285_v50 = vpop.f32.mrf.mxu1  ;;  %v3295_v19 = vmax.f32 %v2819_v4, %v2821_v5 }
 0x132   :  { %v2041_v51 = vpack.c.bf16 %v1637_v43, %v1637_v43  ;;  %v1635_v35 = vmax.f32 %v1599_v6, 0.0  ;;  %v1604_v36 = vadd.f32 %v2933_v22, %v1561_v20  ;;  %v1559_v24 = vmax.f32 %v1166_v31, %v1452_v48 }
 0x133   :  { %1815 = vst.msk [vmem:[%s3226_s6 + $0x20] sm:$0xf] %vm1806_vm3, %v2038_v46  ;;  %v1169_v49 = vmax.f32 %v3291_v34, %v2245_v23  ;;  %v1062_v52 = vpop.f32.mrf.mxu0  ;;  %v1455_v53 = vpop.f32.mrf.mxu1  ;;  %v3296_v43 = vmax.f32 %v2825_v7, %v2827_v8  ;;  %v3297_v46 = vmax.f32 %v2831_v10, %v2833_v11 }
 0x134   :  { %1818 = vst.msk [vmem:[%s3226_s6 + $0x2c] sm:$0xf] %vm1806_vm3, %v2041_v51  ;;  %v2039_v54 = vpack.c.bf16 %v1635_v35, %v1635_v35  ;;  %v1640_v55 = vmax.f32 %v1604_v36, 0.0  ;;  %v1602_v9 = vadd.f32 %v2933_v22, %v1559_v24  ;;  %v1167_v39 = vmax.f32 %v3292_v38, %v1062_v52 }
 0x135   :  { %v1562_v12 = vmax.f32 %v1169_v49, %v2285_v50  ;;  %v2248_v26 = vpop.f32.mrf.mxu0  ;;  %v2288_v27 = vpop.f32.mrf.mxu1  ;;  %v3298_v24 = vmax.f32 %v2837_v13, %v2839_v3 }
 0x136   :  { %1816 = vst.msk [vmem:[%s3226_s6 + $0x24] sm:$0xf] %vm1806_vm3, %v2039_v54  ;;  %v2044_v56 = vpack.c.bf16 %v1640_v55, %v1640_v55  ;;  %v1638_v57 = vmax.f32 %v1602_v9, 0.0  ;;  %v1560_v14 = vmax.f32 %v1167_v39, %v1455_v53  ;;  %v1172_v28 = vmax.f32 %v3293_v15, %v2248_v26 }
 0x137   :  { %v1605_v40 = vadd.f32 %v2933_v22, %v1562_v12  ;;  %v1075_v41 = vpop.f32.mrf.mxu0  ;;  %v1468_v59 = vpop.f32.mrf.mxu1  ;;  %v3299_v55 = vmax.f32 %v2843_v0, %v2845_v61 }
 0x138   :  { %1821 = vst.msk [vmem:[%s3226_s6 + $0x38] sm:$0xf] %vm1806_vm3, %v2044_v56  ;;  %v2042_v60 = vpack.c.bf16 %v1638_v57, %v1638_v57  ;;  %v1603_v42 = vadd.f32 %v2933_v22, %v1560_v14  ;;  %v1565_v25 = vmax.f32 %v1172_v28, %v2288_v27  ;;  %v1170_v30 = vmax.f32 %v3294_v29, %v1075_v41  ;;  %v3300_v27 = vld [vmem:[#allocation2_spill] sm:$0xff] }
 0x139   :  { %v1641_v17 = vmax.f32 %v1605_v40, 0.0  ;;  %v2249_v62 = vpop.f32.mrf.mxu0  ;;  %v2289_v63 = vpop.f32.mrf.mxu1  ;;  %v3301_v56 = vmax.f32 %v2849_v58, %v3300_v27 }
 0x13a   :  { %1819 = vst.msk [vmem:[%s3226_s6 + $0x30] sm:$0xf] %vm1806_vm3, %v2042_v60  ;;  %v1639_v18 = vmax.f32 %v1603_v42, 0.0  ;;  %v1608_v44 = vadd.f32 %v2933_v22, %v1565_v25  ;;  %v1563_v45 = vmax.f32 %v1170_v30, %v1468_v59  ;;  %v1173_v37 = vmax.f32 %v3295_v19, %v2249_v62  ;;  %v3302_v59 = vld [vmem:[#allocation3_spill] sm:$0xff]  ;;  %v3303_v60 = vld [vmem:[#allocation4_spill] sm:$0xff] }
 0x13b   :  { %v2045_v16 = vpack.c.bf16 %v1641_v17, %v1641_v17  ;;  %v1078_v32 = vpop.f32.mrf.mxu0  ;;  %v1471_v1 = vpop.f32.mrf.mxu1  ;;  %v3304_v42 = vmax.f32 %v3302_v59, %v3303_v60 }
 0x13c   :  { %v2043_v2 = vpack.c.bf16 %v1639_v18, %v1639_v18  ;;  %v1644_v33 = vmax.f32 %v1608_v44, 0.0  ;;  %v1606_v47 = vadd.f32 %v2933_v22, %v1563_v45  ;;  %v1566_v48 = vmax.f32 %v1173_v37, %v2289_v63  ;;  %v3305_v63 = vld [vmem:[#allocation5_spill] sm:$0xff]  ;;  %v3306_v18 = vld [vmem:[#allocation6_spill] sm:$0xff] }
 0x13d   :  { %1822 = vst.msk [vmem:[%s3226_s6 + $0x3c] sm:$0xf] %vm1806_vm3, %v2045_v16  ;;  %v1171_v6 = vmax.f32 %v3296_v43, %v1078_v32  ;;  %v2252_v20 = vpop.f32.mrf.mxu0  ;;  %v2292_v4 = vpop.f32.mrf.mxu1  ;;  %v3307_v44 = vmax.f32 %v3305_v63, %v3306_v18 }
 0x13e   :  { %1820 = vst.msk [vmem:[%s3226_s6 + $0x34] sm:$0xf] %vm1806_vm3, %v2043_v2  ;;  %v2048_v5 = vpack.c.bf16 %v1644_v33, %v1644_v33  ;;  %v1642_v21 = vmax.f32 %v1606_v47, 0.0  ;;  %v1609_v31 = vadd.f32 %v2933_v22, %v1566_v48  ;;  %v1176_v23 = vmax.f32 %v3297_v46, %v2252_v20  ;;  %v3308_v33 = vld [vmem:[#allocation7_spill] sm:$0xff]  ;;  %v3309_v47 = vld [vmem:[#allocation8_spill] sm:$0xff]  ;;  %v3311_v46 = vld [vmem:[#allocation9_spill] sm:$0xff] }
 0x13f   :  { %v1564_v50 = vmax.f32 %v1171_v6, %v1471_v1  ;;  %v1091_v51 = vpop.f32.mrf.mxu0  ;;  %v1484_v35 = vpop.f32.mrf.mxu1  ;;  %v3310_v48 = vmax.f32 %v3308_v33, %v3309_v47 }
 0x140   :  { %1825 = vst.msk [vmem:[%s3226_s6 + $0x48] sm:$0xf] %vm1806_vm3, %v2048_v5  ;;  %v2046_v7 = vpack.c.bf16 %v1642_v21, %v1642_v21  ;;  %v1645_v8 = vmax.f32 %v1609_v31, 0.0  ;;  %v1569_v36 = vmax.f32 %v1176_v23, %v2292_v4  ;;  %v1174_v34 = vmax.f32 %v3298_v24, %v1091_v51  ;;  %v3312_v23 = vld [vmem:[#allocation10_spill] sm:$0xff] }
 0x141   :  { %v1607_v49 = vadd.f32 %v2933_v22, %v1564_v50  ;;  %v2253_v52 = vpop.f32.mrf.mxu0  ;;  %v2293_v10 = vpop.f32.mrf.mxu1  ;;  %v3313_v50 = vmax.f32 %v3311_v46, %v3312_v23 }
 0x142   :  { %1823 = vst.msk [vmem:[%s3226_s6 + $0x40] sm:$0xf] %vm1806_vm3, %v2046_v7  ;;  %v2049_v11 = vpack.c.bf16 %v1645_v8, %v1645_v8  ;;  %v1612_v53 = vadd.f32 %v2933_v22, %v1569_v36  ;;  %v1567_v54 = vmax.f32 %v1174_v34, %v1484_v35  ;;  %v1177_v9 = vmax.f32 %v3299_v55, %v2253_v52  ;;  %v3315_v52 = vld [vmem:[#allocation12_spill] sm:$0xff] }
 0x143   :  { %v1643_v38 = vmax.f32 %v1607_v49, 0.0  ;;  %v1094_v3 = vpop.f32.mrf.mxu0  ;;  %v1487_v13 = vpop.f32.mrf.mxu1  ;;  %v3314_v49 = vld [vmem:[#allocation11_spill] sm:$0xff] }
 0x144   :  { %1826 = vst.msk [vmem:[%s3226_s6 + $0x4c] sm:$0xf] %vm1806_vm3, %v2049_v11  ;;  %v1648_v39 = vmax.f32 %v1612_v53, 0.0  ;;  %v1610_v12 = vadd.f32 %v2933_v22, %v1567_v54  ;;  %v1570_v26 = vmax.f32 %v1177_v9, %v2293_v10  ;;  %v1175_v57 = vmax.f32 %v3301_v56, %v1094_v3 }
 0x145   :  { %v2047_v14 = vpack.c.bf16 %v1643_v38, %v1643_v38  ;;  %v2256_v15 = vpop.f32.mrf.mxu0  ;;  %v2296_v61 = vpop.f32.mrf.mxu1  ;;  %v3316_v10 = vmax.f32 %v3314_v49, %v3315_v52 }
 0x146   :  { %v2052_v0 = vpack.c.bf16 %v1648_v39, %v1648_v39  ;;  %v1646_v28 = vmax.f32 %v1610_v12, 0.0  ;;  %v1613_v40 = vadd.f32 %v2933_v22, %v1570_v26  ;;  %v1568_v41 = vmax.f32 %v1175_v57, %v1487_v13  ;;  %v3317_v39 = vld [vmem:[#allocation13_spill] sm:$0xff]  ;;  %v3318_v12 = vld [vmem:[#allocation14_spill] sm:$0xff] }
 0x147   :  { %1824 = vst.msk [vmem:[%s3226_s6 + $0x44] sm:$0xf] %vm1806_vm3, %v2047_v14  ;;  %v1180_v25 = vmax.f32 %v3304_v42, %v2256_v15  ;;  %v1107_v29 = vpop.f32.mrf.mxu0  ;;  %v1500_v58 = vpop.f32.mrf.mxu1  ;;  %v3319_v26 = vmax.f32 %v3317_v39, %v3318_v12 }
 0x148   :  { %1829 = vst.msk [vmem:[%s3226_s6 + $0x58] sm:$0xf] %vm1806_vm3, %v2052_v0  ;;  %v2050_v30 = vpack.c.bf16 %v1646_v28, %v1646_v28  ;;  %v1649_v17 = vmax.f32 %v1613_v40, 0.0  ;;  %v1611_v62 = vadd.f32 %v2933_v22, %v1568_v41  ;;  %v1178_v45 = vmax.f32 %v3307_v44, %v1107_v29  ;;  %v3320_v0 = vld [vmem:[#allocation15_spill] sm:$0xff]  ;;  %v3321_v28 = vld [vmem:[#allocation16_spill] sm:$0xff] }
 0x149   :  { %v1573_v19 = vmax.f32 %v1180_v25, %v2296_v61  ;;  %v2257_v37 = vpop.f32.mrf.mxu0  ;;  %v2297_v16 = vpop.f32.mrf.mxu1  ;;  %v3322_v40 = vmax.f32 %v3320_v0, %v3321_v28 }
 0x14a   :  { %1827 = vst.msk [vmem:[%s3226_s6 + $0x50] sm:$0xf] %vm1806_vm3, %v2050_v30  ;;  %v2053_v32 = vpack.c.bf16 %v1649_v17, %v1649_v17  ;;  %v1647_v1 = vmax.f32 %v1611_v62, 0.0  ;;  %v1571_v2 = vmax.f32 %v1178_v45, %v1500_v58  ;;  %v1181_v43 = vmax.f32 %v3310_v48, %v2257_v37  ;;  %v3323_v30 = vld [vmem:[#allocation17_spill] sm:$0xff]  ;;  %v3324_v17 = vld [vmem:[#allocation18_spill] sm:$0xff] }
 0x14b   :  { %v1616_v6 = vadd.f32 %v2933_v22, %v1573_v19  ;;  %v1110_v20 = vpop.f32.mrf.mxu0  ;;  %v1503_v4 = vpop.f32.mrf.mxu1  ;;  %v3325_v62 = vmax.f32 %v3323_v30, %v3324_v17 }
 0x14c   :  { %1830 = vst.msk [vmem:[%s3226_s6 + $0x5c] sm:$0xf] %vm1806_vm3, %v2053_v32  ;;  %v2051_v5 = vpack.c.bf16 %v1647_v1, %v1647_v1  ;;  %v1614_v21 = vadd.f32 %v2933_v22, %v1571_v2  ;;  %v1574_v31 = vmax.f32 %v1181_v43, %v2297_v16  ;;  %v1179_v51 = vmax.f32 %v3313_v50, %v1110_v20  ;;  %v3326_v32 = vld [vmem:[#allocation19_spill] sm:$0xff]  ;;  %v3327_v1 = vld [vmem:[#allocation20_spill] sm:$0xff] }
 0x14d   :  { %v1652_v35 = vmax.f32 %v1616_v6, 0.0  ;;  %v2260_v7 = vpop.f32.mrf.mxu0  ;;  %v2300_v8 = vpop.f32.mrf.mxu1  ;;  %v3328_v2 = vmax.f32 %v3326_v32, %v3327_v1 }
 0x14e   :  { %1828 = vst.msk [vmem:[%s3226_s6 + $0x54] sm:$0xf] %vm1806_vm3, %v2051_v5  ;;  %v1650_v36 = vmax.f32 %v1614_v21, 0.0  ;;  %v1617_v24 = vadd.f32 %v2933_v22, %v1574_v31  ;;  %v1572_v34 = vmax.f32 %v1179_v51, %v1503_v4  ;;  %v1184_v11 = vmax.f32 %v3316_v10, %v2260_v7  ;;  %v3329_v5 = vld [vmem:[#allocation21_spill] sm:$0xff]  ;;  %v3330_v21 = vld [vmem:[#allocation22_spill] sm:$0xff] }
 0x14f   :  { %v2056_v53 = vpack.c.bf16 %v1652_v35, %v1652_v35  ;;  %v1123_v54 = vpop.f32.mrf.mxu0  ;;  %v1516_v55 = vpop.f32.mrf.mxu1  ;;  %v3331_v31 = vmax.f32 %v3329_v5, %v3330_v21 }
 0x150   :  { %v2054_v9 = vpack.c.bf16 %v1650_v36, %v1650_v36  ;;  %v1653_v38 = vmax.f32 %v1617_v24, 0.0  ;;  %v1615_v3 = vadd.f32 %v2933_v22, %v1572_v34  ;;  %v1577_v13 = vmax.f32 %v1184_v11, %v2300_v8  ;;  %v3332_v24 = vld [vmem:[#allocation23_spill] sm:$0xff]  ;;  %v3333_v34 = vld [vmem:[#allocation24_spill] sm:$0xff] }
 0x151   :  { %1833 = vst.msk [vmem:[%s3226_s6 + $0x68] sm:$0xf] %vm1806_vm3, %v2056_v53  ;;  %v1182_v27 = vmax.f32 %v3319_v26, %v1123_v54  ;;  %v2261_v56 = vpop.f32.mrf.mxu0  ;;  %v2301_v57 = vpop.f32.mrf.mxu1  ;;  %v3334_v49 = vmax.f32 %v3332_v24, %v3333_v34 }
 0x152   :  { %1831 = vst.msk [vmem:[%s3226_s6 + $0x60] sm:$0xf] %vm1806_vm3, %v2054_v9  ;;  %v2057_v14 = vpack.c.bf16 %v1653_v38, %v1653_v38  ;;  %v1651_v15 = vmax.f32 %v1615_v3, 0.0  ;;  %v1620_v61 = vadd.f32 %v2933_v22, %v1577_v13  ;;  %v1185_v41 = vmax.f32 %v3322_v40, %v2261_v56  ;;  %v3336_v9 = vld [vmem:[#allocation26_spill] sm:$0xff] }
 0x153   :  { %v1575_v59 = vmax.f32 %v1182_v27, %v1516_v55  ;;  %v1126_v60 = vpop.f32.mrf.mxu0  ;;  %v1519_v42 = vpop.f32.mrf.mxu1  ;;  %v3335_v55 = vld [vmem:[#allocation25_spill] sm:$0xff] }
 0x154   :  { %1834 = vst.msk [vmem:[%s3226_s6 + $0x6c] sm:$0xf] %vm1806_vm3, %v2057_v14  ;;  %v2055_v25 = vpack.c.bf16 %v1651_v15, %v1651_v15  ;;  %v1656_v29 = vmax.f32 %v1620_v61, 0.0  ;;  %v1578_v58 = vmax.f32 %v1185_v41, %v2301_v57  ;;  %v1183_v63 = vmax.f32 %v3325_v62, %v1126_v60 }
 0x155   :  { %v1618_v18 = vadd.f32 %v2933_v22, %v1575_v59  ;;  %v2264_v44 = vpop.f32.mrf.mxu0  ;;  %v2304_v45 = vpop.f32.mrf.mxu1  ;;  %v3337_v38 = vmax.f32 %v3335_v55, %v3336_v9 }
 0x156   :  { %1832 = vst.msk [vmem:[%s3226_s6 + $0x64] sm:$0xf] %vm1806_vm3, %v2055_v25  ;;  %v2060_v19 = vpack.c.bf16 %v1656_v29, %v1656_v29  ;;  %v1621_v37 = vadd.f32 %v2933_v22, %v1578_v58  ;;  %v1576_v16 = vmax.f32 %v1183_v63, %v1519_v42  ;;  %v1188_v33 = vmax.f32 %v3328_v2, %v2264_v44 }
 0x157   :  { %v1654_v47 = vmax.f32 %v1618_v18, 0.0  ;;  %v1139_v48 = vpop.f32.mrf.mxu0  ;;  %v1532_v43 = vpop.f32.mrf.mxu1 }
 0x158   :  { %1837 = vst.msk [vmem:[%s3226_s6 + $0x78] sm:$0xf] %vm1806_vm3, %v2060_v19  ;;  %v1657_v6 = vmax.f32 %v1621_v37, 0.0  ;;  %v1619_v20 = vadd.f32 %v2933_v22, %v1576_v16  ;;  %v1581_v4 = vmax.f32 %v1188_v33, %v2304_v45  ;;  %v1186_v46 = vmax.f32 %v3331_v31, %v1139_v48 }
 0x159   :  { %v2058_v23 = vpack.c.bf16 %v1654_v47, %v1654_v47  ;;  %v2265_v50 = vpop.f32.mrf.mxu0  ;;  %v2305_v51 = vpop.f32.mrf.mxu1 }
 0x15a   :  { %v2061_v35 = vpack.c.bf16 %v1657_v6, %v1657_v6  ;;  %v1655_v7 = vmax.f32 %v1619_v20, 0.0  ;;  %v1624_v8 = vadd.f32 %v2933_v22, %v1581_v4  ;;  %v1579_v36 = vmax.f32 %v1186_v46, %v1532_v43 }
 0x15b   :  { %1835 = vst.msk [vmem:[%s3226_s6 + $0x70] sm:$0xf] %vm1806_vm3, %v2058_v23  ;;  %v1189_v52 = vmax.f32 %v3334_v49, %v2265_v50  ;;  %v1142_v10 = vpop.f32.mrf.mxu0  ;;  %v1535_v39 = vpop.f32.mrf.mxu1 }
 0x15c   :  { %1838 = vst.msk [vmem:[%s3226_s6 + $0x7c] sm:$0xf] %vm1806_vm3, %v2061_v35  ;;  %v2059_v11 = vpack.c.bf16 %v1655_v7, %v1655_v7  ;;  %v1660_v53 = vmax.f32 %v1624_v8, 0.0  ;;  %v1622_v54 = vadd.f32 %v2933_v22, %v1579_v36  ;;  %v1187_v3 = vmax.f32 %v3337_v38, %v1142_v10 }
 0x15d   :  { %v1582_v13 = vmax.f32 %v1189_v52, %v2305_v51 }
 0x15e   :  { %1836 = vst.msk [vmem:[%s3226_s6 + $0x74] sm:$0xf] %vm1806_vm3, %v2059_v11  ;;  %v2064_v12 = vpack.c.bf16 %v1660_v53, %v1660_v53  ;;  %v1658_v26 = vmax.f32 %v1622_v54, 0.0  ;;  %v1580_v27 = vmax.f32 %v1187_v3, %v1535_v39 }
 0x15f   :  { %v1625_v56 = vadd.f32 %v2933_v22, %v1582_v13 }
 0x160   :  { %1841 = vst.msk [vmem:[%s3226_s6 + $0x88] sm:$0xf] %vm1806_vm3, %v2064_v12  ;;  %v2062_v57 = vpack.c.bf16 %v1658_v26, %v1658_v26  ;;  %v1623_v14 = vadd.f32 %v2933_v22, %v1580_v27 }
 0x161   :  { %v1661_v15 = vmax.f32 %v1625_v56, 0.0 }
 0x162   :  { %1839 = vst.msk [vmem:[%s3226_s6 + $0x80] sm:$0xf] %vm1806_vm3, %v2062_v57  ;;  %v1659_v61 = vmax.f32 %v1623_v14, 0.0 }
 0x163   :  { %v2065_v0 = vpack.c.bf16 %v1661_v15, %v1661_v15 }
 0x164   :  { %v2063_v28 = vpack.c.bf16 %v1659_v61, %v1659_v61 }
 0x165   :  { %1842 = vst.msk [vmem:[%s3226_s6 + $0x8c] sm:$0xf] %vm1806_vm3, %v2065_v0 }
 0x166   :  { %1840 = vst.msk [vmem:[%s3226_s6 + $0x84] sm:$0xf] %vm1806_vm3, %v2063_v28 }

// kernel: _forward.4
= control target key start
LH: loop header
LB: loop body
LE: loop exit
PB: predicated region body
PF: predicated region fallthrough
CT: control target
= control target key end

     0   :  { %vm982_vm0 = vcmask 523264   ;;  %vm2896_vm1 = vcmask 404480   ;;  %s6080_s4 = inlined_call_operand.vmem [shape: bf16[1600,50], index: 4, kind: input, shape index: {}]   ;;  %s6081_s0 = inlined_call_operand.vmem [shape: bf16[32,1600], index: 0, kind: input, shape index: {}]   ;;  %s6082_s1 = inlined_call_operand.vmem [shape: bf16[32,1600], index: 1, kind: input, shape index: {}]   ;;  %s6083_s2 = inlined_call_operand.vmem [shape: bf16[32,1600], index: 2, kind: input, shape index: {}]   ;;  %s6084_s3 = inlined_call_operand.vmem [shape: bf16[32,1600], index: 3, kind: input, shape index: {}]   ;;  %s6085_s5 = inlined_call_operand.vmem [shape: f32[1,50], index: 5, kind: input, shape index: {}]   ;;  %s6086_s6 = inlined_call_operand.vmem [shape: bf16[32,50], index: 6, kind: output, shape index: {}]  }
   0x1   :  { %v4260_v0 = vld [vmem:[%s6080_s4 + $0x78] sm:$0xff]   ;;  %v4283_v4 = vld [vmem:[%s6080_s4 + $0x70] sm:$0xff]   ;;  %v4307_v8 = vld [vmem:[%s6080_s4 + $0x68] sm:$0xff]  }
   0x2   :  { %v4265_v1 = vld [vmem:[%s6080_s4 + $0xf8] sm:$0xff]   ;;  %3126 = vmatprep.subr.bf16.mxu0 %v4260_v0  ;;  %v4289_v5 = vld [vmem:[%s6080_s4 + $0xf0] sm:$0xff]   ;;  %v4313_v9 = vld [vmem:[%s6080_s4 + $0xe8] sm:$0xff]  }
   0x3   :  { %v4271_v2 = vld [vmem:[%s6080_s4 + $0x38] sm:$0xff]   ;;  %3154 = vmatprep.subr.bf16.mxu1 %v4265_v1  ;;  %v4295_v6 = vld [vmem:[%s6080_s4 + $0x30] sm:$0xff]   ;;  %v4319_v10 = vld [vmem:[%s6080_s4 + $0x28] sm:$0xff]  }
   0x4   :  { %v4277_v3 = vld [vmem:[%s6080_s4 + $0xb8] sm:$0xff]   ;;  %3127 = vmatpush3.bf16.msra.mxu0 %v4271_v2  ;;  %v4301_v7 = vld [vmem:[%s6080_s4 + $0xb0] sm:$0xff]   ;;  %v4325_v11 = vld [vmem:[%s6080_s4 + $0xa8] sm:$0xff]  }
   0x5   :  { %3155 = vmatpush3.bf16.msra.mxu1 %v4277_v3  ;;  %3128 = vmatprep.subr.bf16.mxu0 %v4283_v4  ;;  %v4331_v12 = vld [vmem:[%s6080_s4 + $0x60] sm:$0xff]   ;;  %v4355_v16 = vld [vmem:[%s6080_s4 + $0x58] sm:$0xff]   ;;  %v4379_v20 = vld [vmem:[%s6080_s4 + $0x50] sm:$0xff]  }
   0x6   :  { %3156 = vmatprep.subr.bf16.mxu1 %v4289_v5  ;;  %v4337_v13 = vld [vmem:[%s6080_s4 + $0xe0] sm:$0xff]   ;;  %v4361_v17 = vld [vmem:[%s6080_s4 + $0xd8] sm:$0xff]   ;;  %v4385_v21 = vld [vmem:[%s6080_s4 + $0xd0] sm:$0xff]  }
   0x7   :  { %v4343_v14 = vld [vmem:[%s6080_s4 + $0x20] sm:$0xff]   ;;  %v4367_v18 = vld [vmem:[%s6080_s4 + $0x18] sm:$0xff]   ;;  %v4391_v22 = vld [vmem:[%s6080_s4 + $0x10] sm:$0xff]  }
   0x8   :  { %3129 = vmatpush3.bf16.msra.mxu0 %v4295_v6  ;;  %v4349_v15 = vld [vmem:[%s6080_s4 + $0xa0] sm:$0xff]   ;;  %v4373_v19 = vld [vmem:[%s6080_s4 + $0x98] sm:$0xff]   ;;  %v4397_v23 = vld [vmem:[%s6080_s4 + $0x90] sm:$0xff]  }
   0x9   :  { %3157 = vmatpush3.bf16.msra.mxu1 %v4301_v7  ;;  %3130 = vmatprep.subr.bf16.mxu0 %v4307_v8  ;;  %v4403_v24 = vld [vmem:[%s6080_s4 + $0x48] sm:$0xff]   ;;  %v4427_v28 = vld [vmem:[%s6080_s4 + $0x40] sm:$0xff]   ;;  %v4464_v36 = vld [vmem:[%s6080_s4 + $0x178] sm:$0xff]  }
   0xa   :  { %3158 = vmatprep.subr.bf16.mxu1 %v4313_v9  ;;  %v4409_v25 = vld [vmem:[%s6080_s4 + $0xc8] sm:$0xff]   ;;  %v4433_v29 = vld [vmem:[%s6080_s4 + $0xc0] sm:$0xff]   ;;  %v4469_v37 = vld [vmem:[%s6080_s4 + $0x1f8] sm:$0xff]  }
   0xb   :  { %v4415_v26 = vld [vmem:[%s6080_s4 + $0x8] sm:$0xff]   ;;  %v4439_v30 = vld [vmem:[%s6080_s4] sm:$0xff]   ;;  %v4475_v38 = vld [vmem:[%s6080_s4 + $0x138] sm:$0xff]  }
   0xc   :  { %3131 = vmatpush3.bf16.msra.mxu0 %v4319_v10  ;;  %v4421_v27 = vld [vmem:[%s6080_s4 + $0x88] sm:$0xff]   ;;  %v4445_v31 = vld [vmem:[%s6080_s4 + $0x80] sm:$0xff]   ;;  %v4481_v39 = vld [vmem:[%s6080_s4 + $0x1b8] sm:$0xff]  }
   0xd   :  { %3159 = vmatpush3.bf16.msra.mxu1 %v4325_v11  ;;  %3132 = vmatprep.subr.bf16.mxu0 %v4331_v12  ;;  %v3902_v32 = vld [vmem:[%s6081_s0] ss:$52 sps:$4 sm:$0xff]   ;;  %v3904_v33 = vld [vmem:[%s6081_s0 + $0x4] ss:$52 sps:$4 sm:$0xff]   ;;  %v3905_v34 = vld [vmem:[%s6081_s0 + $0x8] ss:$52 sps:$4 sm:$0xff]  }
   0xe   :  { %3160 = vmatprep.subr.bf16.mxu1 %v4337_v13  ;;  %v3907_v35 = vld [vmem:[%s6081_s0 + $0xc] ss:$52 sps:$4 sm:$0xff]   ;;  %1021 = vmatprep.mubr.bf16.mxu0 %v3904_v33  ;;  %v4487_v40 = vld [vmem:[%s6080_s4 + $0x170] sm:$0xff]   ;;  %v4559_v52 = vld [vmem:[%s6080_s4 + $0x158] sm:$0xff]  }
   0xf   :  { %1070 = vmatprep.mubr.bf16.mxu1 %v3907_v35  ;;  %v4493_v41 = vld [vmem:[%s6080_s4 + $0x1f0] sm:$0xff]   ;;  %v4511_v44 = vld [vmem:[%s6080_s4 + $0x168] sm:$0xff]   ;;  %v4535_v48 = vld [vmem:[%s6080_s4 + $0x160] sm:$0xff]  }
  0x10   :  { %3133 = vmatpush3.bf16.msra.mxu0 %v4343_v14  ;;  %v4499_v42 = vld [vmem:[%s6080_s4 + $0x130] sm:$0xff]   ;;  %v4517_v45 = vld [vmem:[%s6080_s4 + $0x1e8] sm:$0xff]   ;;  %v4541_v49 = vld [vmem:[%s6080_s4 + $0x1e0] sm:$0xff]  }
  0x11   :  { %3161 = vmatpush3.bf16.msra.mxu1 %v4349_v15  ;;  %3134 = vmatprep.subr.bf16.mxu0 %v4355_v16  ;;  %v4505_v43 = vld [vmem:[%s6080_s4 + $0x1b0] sm:$0xff]   ;;  %v4523_v46 = vld [vmem:[%s6080_s4 + $0x128] sm:$0xff]   ;;  %v4547_v50 = vld [vmem:[%s6080_s4 + $0x120] sm:$0xff]  }
  0x12   :  { %3162 = vmatprep.subr.bf16.mxu1 %v4361_v17  ;;  %v4529_v47 = vld [vmem:[%s6080_s4 + $0x1a8] sm:$0xff]   ;;  %v4553_v51 = vld [vmem:[%s6080_s4 + $0x1a0] sm:$0xff]   ;;  %v4565_v53 = vld [vmem:[%s6080_s4 + $0x1d8] sm:$0xff]  }
  0x13   :  { %v4571_v54 = vld [vmem:[%s6080_s4 + $0x118] sm:$0xff]   ;;  %v3928_v56 = vld [vmem:[%s6081_s0 + $0x6c] ss:$52 sps:$4 sm:$0xff]   ;;  %v3930_v57 = vld [vmem:[%s6081_s0 + $0x74] ss:$52 sps:$4 sm:$0xff]  }
  0x14   :  { %3135 = vmatpush3.bf16.msra.mxu0 %v4367_v18  ;;  %v4577_v55 = vld [vmem:[%s6080_s4 + $0x198] sm:$0xff]   ;;  %v3933_v59 = vld [vmem:[%s6081_s0 + $0x70] ss:$52 sps:$4 sm:$0xff]   ;;  %v4625_v33 = vld [vmem:[%s6080_s4 + $0x1c8] sm:$0xff]  }
  0x15   :  { %3163 = vmatpush3.bf16.msra.mxu1 %v4373_v19  ;;  %3136 = vmatprep.subr.bf16.mxu0 %v4379_v20  ;;  %6177 = vst [vmem:[#allocation2_spill] sm:$0xff] %v4577_v55  ;;  %v3932_v58 = vld [vmem:[%s6081_s0 + $0x68] ss:$52 sps:$4 sm:$0xff]   ;;  %v4596_v60 = vld [vmem:[%s6080_s4 + $0x150] sm:$0xff]   ;;  %6180 = vst [vmem:[#allocation5_spill] sm:$0xff] %v4625_v33 }
  0x16   :  { %3164 = vmatprep.subr.bf16.mxu1 %v4385_v21  ;;  %v4601_v61 = vld [vmem:[%s6080_s4 + $0x1d0] sm:$0xff]   ;;  %v4637_v35 = vld [vmem:[%s6080_s4 + $0x188] sm:$0xff]  }
  0x17   :  { %6178 = vst [vmem:[#allocation3_spill] sm:$0xff] %v4601_v61  ;;  %v4607_v62 = vld [vmem:[%s6080_s4 + $0x110] sm:$0xff]   ;;  %6181 = vst [vmem:[#allocation6_spill] sm:$0xff] %v4637_v35 }
  0x18   :  { %3137 = vmatpush3.bf16.msra.mxu0 %v4391_v22  ;;  %v4613_v63 = vld [vmem:[%s6080_s4 + $0x190] sm:$0xff]  }
  0x19   :  { %3165 = vmatpush3.bf16.msra.mxu1 %v4397_v23  ;;  %3138 = vmatprep.subr.bf16.mxu0 %v4403_v24  ;;  %6179 = vst [vmem:[#allocation4_spill] sm:$0xff] %v4613_v63 }
  0x1a   :  { %3166 = vmatprep.subr.bf16.mxu1 %v4409_v25 }
  0x1c   :  { %3139 = vmatpush3.bf16.msra.mxu0 %v4415_v26 }
  0x1d   :  { %3167 = vmatpush3.bf16.msra.mxu1 %v4421_v27  ;;  %3140 = vmatprep.subr.bf16.mxu0 %v4427_v28 }
  0x1e   :  { %3168 = vmatprep.subr.bf16.mxu1 %v4433_v29 }
  0x20   :  { %3141 = vmatpush3.bf16.msra.mxu0 %v4439_v30 }
  0x21   :  { %3169 = vmatpush3.bf16.msra.mxu1 %v4445_v31  ;;  %3182 = vmatprep.subr.bf16.mxu0 %v4464_v36 }
  0x22   :  { %3210 = vmatprep.subr.bf16.mxu1 %v4469_v37 }
  0x23   :  { %1022 = vmatmul.mubr.bf16.vlgmr.msra.gmra.mxu0 %v3902_v32  ;;  %v4619_v32 = vld [vmem:[%s6080_s4 + $0x148] sm:$0xff]  }
  0x24   :  { %1071 = vmatmul.mubr.bf16.vlgmr.msra.gmra.mxu1 %v3905_v34  ;;  %3183 = vmatpush3.bf16.msra.mxu0 %v4475_v38  ;;  %v4631_v34 = vld [vmem:[%s6080_s4 + $0x108] sm:$0xff]  }
  0x25   :  { %3211 = vmatpush3.bf16.msra.mxu1 %v4481_v39  ;;  %3184 = vmatprep.subr.bf16.mxu0 %v4487_v40 }
  0x26   :  { %3212 = vmatprep.subr.bf16.mxu1 %v4493_v41  ;;  %1029 = vmatprep.mubr.bf16.mxu0 %v3928_v56  ;;  %v4643_v56 = vld [vmem:[%s6080_s4 + $0x140] sm:$0xff]  }
  0x27   :  { %1078 = vmatprep.mubr.bf16.mxu1 %v3930_v57  ;;  %v4649_v57 = vld [vmem:[%s6080_s4 + $0x1c0] sm:$0xff]  }
  0x28   :  { %3185 = vmatpush3.bf16.msra.mxu0 %v4499_v42  ;;  %6182 = vst [vmem:[#allocation7_spill] sm:$0xff] %v4649_v57 }
  0x29   :  { %3213 = vmatpush3.bf16.msra.mxu1 %v4505_v43  ;;  %3186 = vmatprep.subr.bf16.mxu0 %v4511_v44 }
  0x2a   :  { %3214 = vmatprep.subr.bf16.mxu1 %v4517_v45 }
  0x2b   :  { %1030 = vmatmul.mubr.bf16.gmra.mxu0 %v3932_v58  ;;  %v4655_v58 = vld [vmem:[%s6080_s4 + $0x100] sm:$0xff]  }
  0x2c   :  { %3187 = vmatpush3.bf16.msra.mxu0 %v4523_v46  ;;  %1079 = vmatmul.mubr.bf16.gmra.mxu1 %v3933_v59  ;;  %v4661_v59 = vld [vmem:[%s6080_s4 + $0x180] sm:$0xff]  }
  0x2d   :  { %3215 = vmatpush3.bf16.msra.mxu1 %v4529_v47  ;;  %3188 = vmatprep.subr.bf16.mxu0 %v4535_v48  ;;  %6183 = vst [vmem:[#allocation8_spill] sm:$0xff] %v4661_v59 }
  0x2e   :  { %3216 = vmatprep.subr.bf16.mxu1 %v4541_v49 }
  0x30   :  { %3189 = vmatpush3.bf16.msra.mxu0 %v4547_v50 }
  0x31   :  { %3217 = vmatpush3.bf16.msra.mxu1 %v4553_v51  ;;  %3190 = vmatprep.subr.bf16.mxu0 %v4559_v52 }
  0x32   :  { %3218 = vmatprep.subr.bf16.mxu1 %v4565_v53 }
  0x34   :  { %3191 = vmatpush3.bf16.msra.mxu0 %v4571_v54 }
  0x35   :  { %3219 = vmatpush3.bf16.msra.mxu1 %v4577_v55  ;;  %3192 = vmatprep.subr.bf16.mxu0 %v4596_v60  ;;  %v4691_v55 = vld [vmem:[%s6080_s4 + $0x238] sm:$0xff]  }
  0x36   :  { %3220 = vmatprep.subr.bf16.mxu1 %v4601_v61  ;;  %v4680_v61 = vld [vmem:[%s6080_s4 + $0x278] sm:$0xff]   ;;  %6185 = vst [vmem:[#allocation10_spill] sm:$0xff] %v4691_v55 }
  0x38   :  { %3193 = vmatpush3.bf16.msra.mxu0 %v4607_v62 }
  0x39   :  { %3221 = vmatpush3.bf16.msra.mxu1 %v4613_v63  ;;  %3194 = vmatprep.subr.bf16.mxu0 %v4619_v32  ;;  %v3951_v63 = vld [vmem:[%s6081_s0 + $0x1c] ss:$52 sps:$4 sm:$0xff]  }
  0x3a   :  { %3222 = vmatprep.subr.bf16.mxu1 %v4625_v33  ;;  %v3948_v33 = vld [vmem:[%s6081_s0 + $0x14] ss:$52 sps:$4 sm:$0xff]   ;;  %1168 = vmatprep.mubr.bf16.mxu1 %v3951_v63 }
  0x3b   :  { %1119 = vmatprep.mubr.bf16.mxu0 %v3948_v33  ;;  %v4697_v33 = vld [vmem:[%s6080_s4 + $0x2b8] sm:$0xff]   ;;  %v4703_v63 = vld [vmem:[%s6080_s4 + $0x270] sm:$0xff]  }
  0x3c   :  { %3195 = vmatpush3.bf16.msra.mxu0 %v4631_v34  ;;  %6186 = vst [vmem:[#allocation11_spill] sm:$0xff] %v4697_v33  ;;  %6187 = vst [vmem:[#allocation12_spill] sm:$0xff] %v4703_v63 }
  0x3d   :  { %3223 = vmatpush3.bf16.msra.mxu1 %v4637_v35  ;;  %3196 = vmatprep.subr.bf16.mxu0 %v4643_v56  ;;  %v3946_v35 = vld [vmem:[%s6081_s0 + $0x10] ss:$52 sps:$4 sm:$0xff]  }
  0x3e   :  { %3224 = vmatprep.subr.bf16.mxu1 %v4649_v57  ;;  %v3949_v57 = vld [vmem:[%s6081_s0 + $0x18] ss:$52 sps:$4 sm:$0xff]  }
  0x40   :  { %3197 = vmatpush3.bf16.msra.mxu0 %v4655_v58 }
  0x41   :  { %3225 = vmatpush3.bf16.msra.mxu1 %v4661_v59  ;;  %v4685_v59 = vld [vmem:[%s6080_s4 + $0x2f8] sm:$0xff]   ;;  %3238 = vmatprep.subr.bf16.mxu0 %v4680_v61 }
  0x42   :  { %6184 = vst [vmem:[#allocation9_spill] sm:$0xff] %v4685_v59  ;;  %3266 = vmatprep.subr.bf16.mxu1 %v4685_v59  ;;  %v4721_v59 = vld [vmem:[%s6080_s4 + $0x2b0] sm:$0xff]  }
  0x43   :  { %1120 = vmatmul.mubr.bf16.vlgmr.msra.gmra.mxu0 %v3946_v35  ;;  %v4709_v35 = vld [vmem:[%s6080_s4 + $0x2f0] sm:$0xff]   ;;  %6190 = vst [vmem:[#allocation15_spill] sm:$0xff] %v4721_v59 }
  0x44   :  { %1169 = vmatmul.mubr.bf16.vlgmr.msra.gmra.mxu1 %v3949_v57  ;;  %3239 = vmatpush3.bf16.msra.mxu0 %v4691_v55  ;;  %6188 = vst [vmem:[#allocation13_spill] sm:$0xff] %v4709_v35  ;;  %v4715_v57 = vld [vmem:[%s6080_s4 + $0x230] sm:$0xff]   ;;  %v4775_v55 = vld [vmem:[%s6080_s4 + $0x220] sm:$0xff]  }
  0x45   :  { %3267 = vmatpush3.bf16.msra.mxu1 %v4697_v33  ;;  %3240 = vmatprep.subr.bf16.mxu0 %v4703_v63  ;;  %6189 = vst [vmem:[#allocation14_spill] sm:$0xff] %v4715_v57  ;;  %v3960_v33 = vld [vmem:[%s6081_s0 + $0x7c] ss:$52 sps:$4 sm:$0xff]   ;;  %v3962_v63 = vld [vmem:[%s6081_s0 + $0x78] ss:$52 sps:$4 sm:$0xff]   ;;  %6197 = vst [vmem:[#allocation22_spill] sm:$0xff] %v4775_v55 }
  0x46   :  { %3268 = vmatprep.subr.bf16.mxu1 %v4709_v35  ;;  %1127 = vmatprep.mubr.bf16.mxu0 %v3960_v33  ;;  %v4734_v35 = vld [vmem:[%s6080_s4 + $0x268] sm:$0xff]  }
  0x47   :  { %6191 = vst [vmem:[#allocation16_spill] sm:$0xff] %v4734_v35  ;;  %v4749_v33 = vld [vmem:[%s6080_s4 + $0x228] sm:$0xff]  }
  0x48   :  { %3241 = vmatpush3.bf16.msra.mxu0 %v4715_v57  ;;  %v4739_v57 = vld [vmem:[%s6080_s4 + $0x2e8] sm:$0xff]   ;;  %6193 = vst [vmem:[#allocation18_spill] sm:$0xff] %v4749_v33 }
  0x49   :  { %3269 = vmatpush3.bf16.msra.mxu1 %v4721_v59  ;;  %6192 = vst [vmem:[#allocation17_spill] sm:$0xff] %v4739_v57  ;;  %3242 = vmatprep.subr.bf16.mxu0 %v4734_v35  ;;  %v3965_v59 = vld [vmem:[%s6081_s0 + $0x84] ss:$52 sps:$4 sm:$0xff]   ;;  %v3969_v35 = vld [vmem:[%s6081_s0 + $0x80] ss:$52 sps:$4 sm:$0xff]  }
  0x4a   :  { %3270 = vmatprep.subr.bf16.mxu1 %v4739_v57  ;;  %1176 = vmatprep.mubr.bf16.mxu1 %v3965_v59  ;;  %v4763_v57 = vld [vmem:[%s6080_s4 + $0x260] sm:$0xff]  }
  0x4b   :  { %1128 = vmatmul.mubr.bf16.gmra.mxu0 %v3962_v63  ;;  %v4754_v63 = vld [vmem:[%s6080_s4 + $0x2a8] sm:$0xff]   ;;  %6195 = vst [vmem:[#allocation20_spill] sm:$0xff] %v4763_v57  ;;  %v4769_v59 = vld [vmem:[%s6080_s4 + $0x2e0] sm:$0xff]  }
  0x4c   :  { %6194 = vst [vmem:[#allocation19_spill] sm:$0xff] %v4754_v63  ;;  %3243 = vmatpush3.bf16.msra.mxu0 %v4749_v33  ;;  %6196 = vst [vmem:[#allocation21_spill] sm:$0xff] %v4769_v59  ;;  %1177 = vmatmul.mubr.bf16.gmra.mxu1 %v3969_v35  ;;  %v4781_v33 = vld [vmem:[%s6080_s4 + $0x2a0] sm:$0xff]   ;;  %v4787_v35 = vld [vmem:[%s6080_s4 + $0x258] sm:$0xff]  }
  0x4d   :  { %3271 = vmatpush3.bf16.msra.mxu1 %v4754_v63  ;;  %3244 = vmatprep.subr.bf16.mxu0 %v4763_v57  ;;  %6198 = vst [vmem:[#allocation23_spill] sm:$0xff] %v4781_v33  ;;  %6199 = vst [vmem:[#allocation24_spill] sm:$0xff] %v4787_v35  ;;  %v4793_v63 = vld [vmem:[%s6080_s4 + $0x2d8] sm:$0xff]   ;;  %v3995_v57 = vld [vmem:[%s6081_s0 + $0x2c] ss:$52 sps:$4 sm:$0xff]  }
  0x4e   :  { %3272 = vmatprep.subr.bf16.mxu1 %v4769_v59  ;;  %6200 = vst [vmem:[#allocation25_spill] sm:$0xff] %v4793_v63  ;;  %v4799_v59 = vld [vmem:[%s6080_s4 + $0x218] sm:$0xff]   ;;  %1266 = vmatprep.mubr.bf16.mxu1 %v3995_v57  ;;  %v4002_v57 = vld [vmem:[%s6081_s0 + $0x94] ss:$52 sps:$4 sm:$0xff]  }
  0x4f   :  { %6201 = vst [vmem:[#allocation26_spill] sm:$0xff] %v4799_v59 }
  0x50   :  { %3245 = vmatpush3.bf16.msra.mxu0 %v4775_v55  ;;  %v4805_v55 = vld [vmem:[%s6080_s4 + $0x298] sm:$0xff]  }
  0x51   :  { %3273 = vmatpush3.bf16.msra.mxu1 %v4781_v33  ;;  %3246 = vmatprep.subr.bf16.mxu0 %v4787_v35  ;;  %6202 = vst [vmem:[#allocation27_spill] sm:$0xff] %v4805_v55  ;;  %v4811_v33 = vld [vmem:[%s6080_s4 + $0x250] sm:$0xff]  }
  0x52   :  { %3274 = vmatprep.subr.bf16.mxu1 %v4793_v63  ;;  %6203 = vst [vmem:[#allocation28_spill] sm:$0xff] %v4811_v33  ;;  %v4817_v35 = vld [vmem:[%s6080_s4 + $0x2d0] sm:$0xff]  }
  0x53   :  { %6204 = vst [vmem:[#allocation29_spill] sm:$0xff] %v4817_v35  ;;  %v4823_v63 = vld [vmem:[%s6080_s4 + $0x210] sm:$0xff]  }
  0x54   :  { %3247 = vmatpush3.bf16.msra.mxu0 %v4799_v59  ;;  %6205 = vst [vmem:[#allocation30_spill] sm:$0xff] %v4823_v63  ;;  %v4829_v59 = vld [vmem:[%s6080_s4 + $0x290] sm:$0xff]  }
  0x55   :  { %3275 = vmatpush3.bf16.msra.mxu1 %v4805_v55  ;;  %3248 = vmatprep.subr.bf16.mxu0 %v4811_v33  ;;  %6206 = vst [vmem:[#allocation31_spill] sm:$0xff] %v4829_v59  ;;  %v4835_v55 = vld [vmem:[%s6080_s4 + $0x248] sm:$0xff]  }
  0x56   :  { %3276 = vmatprep.subr.bf16.mxu1 %v4817_v35  ;;  %6207 = vst [vmem:[#allocation32_spill] sm:$0xff] %v4835_v55  ;;  %v4841_v33 = vld [vmem:[%s6080_s4 + $0x2c8] sm:$0xff]  }
  0x57   :  { %6208 = vst [vmem:[#allocation33_spill] sm:$0xff] %v4841_v33  ;;  %v4847_v35 = vld [vmem:[%s6080_s4 + $0x208] sm:$0xff]  }
  0x58   :  { %3249 = vmatpush3.bf16.msra.mxu0 %v4823_v63  ;;  %6209 = vst [vmem:[#allocation34_spill] sm:$0xff] %v4847_v35  ;;  %v4853_v63 = vld [vmem:[%s6080_s4 + $0x288] sm:$0xff]  }
  0x59   :  { %3277 = vmatpush3.bf16.msra.mxu1 %v4829_v59  ;;  %3250 = vmatprep.subr.bf16.mxu0 %v4835_v55  ;;  %6210 = vst [vmem:[#allocation35_spill] sm:$0xff] %v4853_v63  ;;  %v4859_v59 = vld [vmem:[%s6080_s4 + $0x240] sm:$0xff]  }
  0x5a   :  { %3278 = vmatprep.subr.bf16.mxu1 %v4841_v33  ;;  %6211 = vst [vmem:[#allocation36_spill] sm:$0xff] %v4859_v59  ;;  %v4865_v55 = vld [vmem:[%s6080_s4 + $0x2c0] sm:$0xff]  }
  0x5b   :  { %6212 = vst [vmem:[#allocation37_spill] sm:$0xff] %v4865_v55  ;;  %v4871_v33 = vld [vmem:[%s6080_s4 + $0x200] sm:$0xff]  }
  0x5c   :  { %3251 = vmatpush3.bf16.msra.mxu0 %v4847_v35  ;;  %6213 = vst [vmem:[#allocation38_spill] sm:$0xff] %v4871_v33  ;;  %v4877_v35 = vld [vmem:[%s6080_s4 + $0x280] sm:$0xff]  }
  0x5d   :  { %3279 = vmatpush3.bf16.msra.mxu1 %v4853_v63  ;;  %3252 = vmatprep.subr.bf16.mxu0 %v4859_v59  ;;  %6214 = vst [vmem:[#allocation39_spill] sm:$0xff] %v4877_v35  ;;  %v3990_v63 = vld [vmem:[%s6081_s0 + $0x20] ss:$52 sps:$4 sm:$0xff]   ;;  %v3992_v59 = vld [vmem:[%s6081_s0 + $0x24] ss:$52 sps:$4 sm:$0xff]  }
  0x5e   :  { %3280 = vmatprep.subr.bf16.mxu1 %v4865_v55  ;;  %v3993_v55 = vld [vmem:[%s6081_s0 + $0x28] ss:$52 sps:$4 sm:$0xff]   ;;  %1217 = vmatprep.mubr.bf16.mxu0 %v3992_v59  ;;  %v3998_v59 = vld [vmem:[%s6081_s0 + $0x8c] ss:$52 sps:$4 sm:$0xff]  }
  0x60   :  { %3253 = vmatpush3.bf16.msra.mxu0 %v4871_v33  ;;  %v4897_v33 = vld [vmem:[%s6080_s4 + $0x318] sm:$0xff]  }
  0x61   :  { %3281 = vmatpush3.bf16.msra.mxu1 %v4877_v35  ;;  %v4902_v35 = vld [vmem:[%s6080_s4 + $0x310] sm:$0xff]   ;;  %3822 = vmatprep.subr.bf16.mxu0 %v4897_v33 }
  0x62   :  { %3300 = vmatprep.subr.bf16.mxu1 %v4260_v0  ;;  %v4000_v0 = vld [vmem:[%s6081_s0 + $0x88] ss:$52 sps:$4 sm:$0xff]  }
  0x63   :  { %1218 = vmatmul.mubr.bf16.vlgmr.msra.gmra.mxu0 %v3990_v63  ;;  %v4935_v63 = vld [vmem:[%s6080_s4 + $0x300] sm:$0xff]  }
  0x64   :  { %1267 = vmatmul.mubr.bf16.vlgmr.msra.gmra.mxu1 %v3993_v55  ;;  %3823 = vmatpush3.bf16.msra.mxu0 %v4897_v33  ;;  %v4918_v55 = vld [vmem:[%s6080_s4 + $0x308] sm:$0xff]  }
  0x65   :  { %3301 = vmatpush3.bf16.msra.mxu1 %v4271_v2  ;;  %3824 = vmatprep.subr.bf16.mxu0 %v4902_v35  ;;  %v4004_v2 = vld [vmem:[%s6081_s0 + $0x90] ss:$52 sps:$4 sm:$0xff]  }
  0x66   :  { %3302 = vmatprep.subr.bf16.mxu1 %v4283_v4  ;;  %1225 = vmatprep.mubr.bf16.mxu0 %v3998_v59  ;;  %v4006_v4 = vld [vmem:[%s6081_s0 + $0x30] ss:$52 sps:$4 sm:$0xff]  }
  0x67   :  { %1274 = vmatprep.mubr.bf16.mxu1 %v4002_v57  ;;  %v4010_v59 = vld [vmem:[%s6082_s1 + $0x4] ss:$52 sps:$4 sm:$0xff]  }
  0x68   :  { %3825 = vmatpush3.bf16.msra.mxu0 %v4902_v35  ;;  %v4041_v57 = vld [vmem:[%s6082_s1 + $0x30] ss:$52 sps:$4 sm:$0xff]  }
  0x69   :  { %3303 = vmatpush3.bf16.msra.mxu1 %v4295_v6  ;;  %3826 = vmatprep.subr.bf16.mxu0 %v4918_v55  ;;  %v4007_v6 = vld [vmem:[%s6081_s0 + $0x98] ss:$52 sps:$4 sm:$0xff]  }
  0x6a   :  { %3304 = vmatprep.subr.bf16.mxu1 %v4307_v8  ;;  %v4013_v8 = vld [vmem:[%s6082_s1 + $0xc] ss:$52 sps:$4 sm:$0xff]  }
  0x6b   :  { %1226 = vmatmul.mubr.bf16.gmra.mxu0 %v4000_v0  ;;  %v6249_v0 = vld [vmem:[#allocation33_spill] sm:$0xff] }
  0x6c   :  { %3830 = vmatprep.mubr.msk.bf16.mxu0 %vm982_vm0, %v4006_v4  ;;  %1275 = vmatmul.mubr.bf16.gmra.mxu1 %v4004_v2  ;;  %v6250_v2 = vld [vmem:[#allocation35_spill] sm:$0xff]  ;;  %v6251_v4 = vld [vmem:[#allocation37_spill] sm:$0xff] }
  0x6d   :  { %3827 = vmatpush3.bf16.msra.mxu0 %v4918_v55  ;;  %3305 = vmatpush3.bf16.msra.mxu1 %v4319_v10  ;;  %v4017_v10 = vld [vmem:[%s6082_s1 + $0x74] ss:$52 sps:$4 sm:$0xff]  }
  0x6e   :  { %3828 = vmatprep.subr.bf16.mxu0 %v4935_v63  ;;  %3306 = vmatprep.subr.bf16.mxu1 %v4331_v12  ;;  %v4028_v12 = vld [vmem:[%s6082_s1 + $0x1c] ss:$52 sps:$4 sm:$0xff]  }
  0x6f   :  { %1528 = vmatprep.mubr.bf16.mxu1 %v4010_v59  ;;  %v4042_v59 = vld [vmem:[%s6082_s1 + $0x98] ss:$52 sps:$4 sm:$0xff]  }
  0x71   :  { %3829 = vmatpush3.bf16.msra.mxu0 %v4935_v63  ;;  %3307 = vmatpush3.bf16.msra.mxu1 %v4343_v14  ;;  %v4023_v14 = vld [vmem:[%s6082_s1 + $0x7c] ss:$52 sps:$4 sm:$0xff]  }
  0x72   :  { %3308 = vmatprep.subr.bf16.mxu1 %v4355_v16  ;;  %3328 = vmatprep.subr.bf16.mxu0 %v4265_v1  ;;  %v4008_v1 = vld [vmem:[%s6082_s1] ss:$52 sps:$4 sm:$0xff]  }
  0x73   :  { %v6216_v16 = vld [vmem:[#allocation10_spill] sm:$0xff] }
  0x74   :  { %3831 = vmatmul.mubr.msk.bf16.vlgmr.msra.gmra.mxu0 %vm982_vm0, %v4007_v6  ;;  %v6252_v6 = vld [vmem:[#allocation39_spill] sm:$0xff] }
  0x75   :  { %3309 = vmatpush3.bf16.msra.mxu1 %v4367_v18  ;;  %3329 = vmatpush3.bf16.msra.mxu0 %v4277_v3  ;;  %v4014_v3 = vld [vmem:[%s6082_s1 + $0x6c] ss:$52 sps:$4 sm:$0xff]   ;;  %v6218_v18 = vld [vmem:[#allocation12_spill] sm:$0xff] }
  0x76   :  { %3310 = vmatprep.subr.bf16.mxu1 %v4379_v20  ;;  %3330 = vmatprep.subr.bf16.mxu0 %v4289_v5  ;;  %v4016_v5 = vld [vmem:[%s6082_s1 + $0x68] ss:$52 sps:$4 sm:$0xff]   ;;  %v6219_v20 = vld [vmem:[#allocation4_spill] sm:$0xff] }
  0x77   :  { %1577 = vmatprep.mubr.bf16.mxu0 %v4013_v8  ;;  %v5127_v8 = vld [vmem:[%s6080_s4 + $0xf8] sm:$0xff]  }
  0x79   :  { %3311 = vmatpush3.bf16.msra.mxu1 %v4391_v22  ;;  %3331 = vmatpush3.bf16.msra.mxu0 %v4301_v7  ;;  %v4022_v7 = vld [vmem:[%s6082_s1 + $0x14] ss:$52 sps:$4 sm:$0xff]   ;;  %v6221_v22 = vld [vmem:[#allocation5_spill] sm:$0xff] }
  0x7a   :  { %3312 = vmatprep.subr.bf16.mxu1 %v4403_v24  ;;  %3332 = vmatprep.subr.bf16.mxu0 %v4313_v9  ;;  %v4011_v9 = vld [vmem:[%s6082_s1 + $0x8] ss:$52 sps:$4 sm:$0xff]   ;;  %v4034_v24 = vld [vmem:[%s6082_s1 + $0x24] ss:$52 sps:$4 sm:$0xff]  }
  0x7d   :  { %3313 = vmatpush3.bf16.msra.mxu1 %v4415_v26  ;;  %3333 = vmatpush3.bf16.msra.mxu0 %v4325_v11  ;;  %v4019_v11 = vld [vmem:[%s6082_s1 + $0x70] ss:$52 sps:$4 sm:$0xff]  }
  0x7e   :  { %3314 = vmatprep.subr.bf16.mxu1 %v4427_v28  ;;  %3334 = vmatprep.subr.bf16.mxu0 %v4337_v13  ;;  %v4020_v13 = vld [vmem:[%s6082_s1 + $0x10] ss:$52 sps:$4 sm:$0xff]  }
  0x7f   :  { %v6224_v26 = vld [vmem:[#allocation18_spill] sm:$0xff]  ;;  %v6226_v28 = vld [vmem:[#allocation20_spill] sm:$0xff] }
  0x81   :  { %3315 = vmatpush3.bf16.msra.mxu1 %v4439_v30  ;;  %3335 = vmatpush3.bf16.msra.mxu0 %v4349_v15  ;;  %v6215_v15 = vld [vmem:[#allocation2_spill] sm:$0xff]  ;;  %v6227_v30 = vld [vmem:[#allocation8_spill] sm:$0xff] }
  0x82   :  { %3336 = vmatprep.subr.bf16.mxu0 %v4361_v17  ;;  %3356 = vmatprep.subr.bf16.mxu1 %v4464_v36  ;;  %v6217_v17 = vld [vmem:[#allocation3_spill] sm:$0xff]  ;;  %v6229_v36 = vld [vmem:[#allocation24_spill] sm:$0xff] }
  0x84   :  { %1529 = vmatmul.mubr.bf16.vlgmr.msra.gmra.mxu1 %v4008_v1  ;;  %v4043_v1 = vld [vmem:[%s6082_s1 + $0x94] ss:$52 sps:$4 sm:$0xff]  }
  0x85   :  { %3337 = vmatpush3.bf16.msra.mxu0 %v4373_v19  ;;  %3357 = vmatpush3.bf16.msra.mxu1 %v4475_v38  ;;  %v4025_v19 = vld [vmem:[%s6082_s1 + $0x78] ss:$52 sps:$4 sm:$0xff]  }
  0x86   :  { %3338 = vmatprep.subr.bf16.mxu0 %v4385_v21  ;;  %3358 = vmatprep.subr.bf16.mxu1 %v4487_v40  ;;  %v6220_v21 = vld [vmem:[#allocation14_spill] sm:$0xff]  ;;  %v6232_v40 = vld [vmem:[#allocation11_spill] sm:$0xff] }
  0x87   :  { %1536 = vmatprep.mubr.bf16.mxu1 %v4014_v3  ;;  %v4029_v38 = vld [vmem:[%s6082_s1 + $0x84] ss:$52 sps:$4 sm:$0xff]   ;;  %v4051_v3 = vld [vmem:[%s6083_s2 + $0xc] ss:$52 sps:$4 sm:$0xff]  }
  0x89   :  { %3339 = vmatpush3.bf16.msra.mxu0 %v4397_v23  ;;  %3359 = vmatpush3.bf16.msra.mxu1 %v4499_v42  ;;  %v6222_v23 = vld [vmem:[#allocation16_spill] sm:$0xff]  ;;  %v6234_v42 = vld [vmem:[#allocation13_spill] sm:$0xff] }
  0x8a   :  { %3340 = vmatprep.subr.bf16.mxu0 %v4409_v25  ;;  %3360 = vmatprep.subr.bf16.mxu1 %v4511_v44  ;;  %v6223_v25 = vld [vmem:[#allocation6_spill] sm:$0xff] }
  0x8b   :  { %v6235_v44 = vld [vmem:[#allocation30_spill] sm:$0xff] }
  0x8c   :  { %1537 = vmatmul.mubr.bf16.gmra.mxu1 %v4016_v5  ;;  %v5140_v5 = vld [vmem:[%s6080_s4 + $0x38] sm:$0xff]  }
  0x8d   :  { %3341 = vmatpush3.bf16.msra.mxu0 %v4421_v27  ;;  %3361 = vmatpush3.bf16.msra.mxu1 %v4523_v46  ;;  %v6225_v27 = vld [vmem:[#allocation7_spill] sm:$0xff]  ;;  %v6237_v46 = vld [vmem:[#allocation32_spill] sm:$0xff] }
  0x8e   :  { %3342 = vmatprep.subr.bf16.mxu0 %v4433_v29  ;;  %3362 = vmatprep.subr.bf16.mxu1 %v4535_v48  ;;  %v4026_v29 = vld [vmem:[%s6082_s1 + $0x18] ss:$52 sps:$4 sm:$0xff]  }
  0x8f   :  { %1626 = vmatprep.mubr.bf16.mxu1 %v4022_v7  ;;  %v4040_v48 = vld [vmem:[%s6082_s1 + $0x2c] ss:$52 sps:$4 sm:$0xff]   ;;  %v5146_v7 = vld [vmem:[%s6080_s4 + $0xb8] sm:$0xff]  }
  0x91   :  { %3343 = vmatpush3.bf16.msra.mxu0 %v4445_v31  ;;  %3363 = vmatpush3.bf16.msra.mxu1 %v4547_v50  ;;  %v6228_v31 = vld [vmem:[#allocation22_spill] sm:$0xff]  ;;  %v6240_v50 = vld [vmem:[#allocation19_spill] sm:$0xff] }
  0x92   :  { %3364 = vmatprep.subr.bf16.mxu1 %v4559_v52  ;;  %3384 = vmatprep.subr.bf16.mxu0 %v4469_v37  ;;  %v6230_v37 = vld [vmem:[#allocation9_spill] sm:$0xff] }
  0x93   :  { %v6242_v52 = vld [vmem:[#allocation21_spill] sm:$0xff] }
  0x94   :  { %1578 = vmatmul.mubr.bf16.vlgmr.msra.gmra.mxu0 %v4011_v9  ;;  %v5152_v9 = vld [vmem:[%s6080_s4 + $0x70] sm:$0xff]  }
  0x95   :  { %3365 = vmatpush3.bf16.msra.mxu1 %v4571_v54  ;;  %3385 = vmatpush3.bf16.msra.mxu0 %v4481_v39  ;;  %v6231_v39 = vld [vmem:[#allocation26_spill] sm:$0xff] }
  0x96   :  { %3366 = vmatprep.subr.bf16.mxu1 %v4596_v60  ;;  %3386 = vmatprep.subr.bf16.mxu0 %v4493_v41  ;;  %v6233_v41 = vld [vmem:[#allocation28_spill] sm:$0xff]  ;;  %v6243_v54 = vld [vmem:[#allocation38_spill] sm:$0xff]  ;;  %v6244_v60 = vld [vmem:[#allocation23_spill] sm:$0xff] }
  0x97   :  { %1585 = vmatprep.mubr.bf16.mxu0 %v4017_v10  ;;  %v5158_v10 = vld [vmem:[%s6080_s4 + $0xf0] sm:$0xff]  }
  0x99   :  { %3367 = vmatpush3.bf16.msra.mxu1 %v4607_v62  ;;  %3387 = vmatpush3.bf16.msra.mxu0 %v4505_v43  ;;  %v4031_v43 = vld [vmem:[%s6082_s1 + $0x80] ss:$52 sps:$4 sm:$0xff]  }
  0x9a   :  { %3368 = vmatprep.subr.bf16.mxu1 %v4619_v32  ;;  %3388 = vmatprep.subr.bf16.mxu0 %v4517_v45  ;;  %v6236_v45 = vld [vmem:[#allocation15_spill] sm:$0xff] }
  0x9b   :  { %v4035_v62 = vld [vmem:[%s6082_s1 + $0x8c] ss:$52 sps:$4 sm:$0xff]  }
  0x9c   :  { %1586 = vmatmul.mubr.bf16.gmra.mxu0 %v4019_v11  ;;  %v6246_v32 = vld [vmem:[#allocation27_spill] sm:$0xff]  ;;  %v4045_v11 = vld [vmem:[%s6082_s1 + $0x90] ss:$52 sps:$4 sm:$0xff]  }
  0x9d   :  { %3369 = vmatpush3.bf16.msra.mxu1 %v4631_v34  ;;  %3389 = vmatpush3.bf16.msra.mxu0 %v4529_v47  ;;  %v6238_v47 = vld [vmem:[#allocation17_spill] sm:$0xff] }
  0x9e   :  { %3370 = vmatprep.subr.bf16.mxu1 %v4643_v56  ;;  %3390 = vmatprep.subr.bf16.mxu0 %v4541_v49  ;;  %v6239_v49 = vld [vmem:[#allocation34_spill] sm:$0xff]  ;;  %v6247_v34 = vld [vmem:[#allocation29_spill] sm:$0xff] }
  0x9f   :  { %1675 = vmatprep.mubr.bf16.mxu0 %v4028_v12  ;;  %v4037_v56 = vld [vmem:[%s6082_s1 + $0x88] ss:$52 sps:$4 sm:$0xff]  }
  0xa1   :  { %3371 = vmatpush3.bf16.msra.mxu1 %v4655_v58  ;;  %3391 = vmatpush3.bf16.msra.mxu0 %v4553_v51  ;;  %v6241_v51 = vld [vmem:[#allocation36_spill] sm:$0xff]  ;;  %v6248_v58 = vld [vmem:[#allocation31_spill] sm:$0xff] }
  0xa2   :  { %3392 = vmatprep.subr.bf16.mxu0 %v4565_v53  ;;  %3412 = vmatprep.subr.bf16.mxu1 %v4680_v61  ;;  %v4032_v53 = vld [vmem:[%s6082_s1 + $0x20] ss:$52 sps:$4 sm:$0xff]   ;;  %v6245_v61 = vld [vmem:[#allocation25_spill] sm:$0xff] }
  0xa4   :  { %1627 = vmatmul.mubr.bf16.vlgmr.msra.gmra.mxu1 %v4020_v13  ;;  %v5167_v13 = vld [vmem:[%s6080_s4 + $0x30] sm:$0xff]  }
  0xa5   :  { %3393 = vmatpush3.bf16.msra.mxu0 %v6215_v15  ;;  %3413 = vmatpush3.bf16.msra.mxu1 %v6216_v16  ;;  %v4048_v16 = vld [vmem:[%s6083_s2 + $0x4] ss:$52 sps:$4 sm:$0xff]  }
  0xa6   :  { %3394 = vmatprep.subr.bf16.mxu0 %v6217_v17  ;;  %3414 = vmatprep.subr.bf16.mxu1 %v6218_v18  ;;  %v5182_v17 = vld [vmem:[%s6080_s4 + $0x68] sm:$0xff]  }
  0xa7   :  { %1634 = vmatprep.mubr.bf16.mxu1 %v4023_v14  ;;  %v5173_v14 = vld [vmem:[%s6080_s4 + $0xb0] sm:$0xff]   ;;  %v5188_v18 = vld [vmem:[%s6080_s4 + $0xe8] sm:$0xff]  }
  0xa9   :  { %3395 = vmatpush3.bf16.msra.mxu0 %v6219_v20  ;;  %3415 = vmatpush3.bf16.msra.mxu1 %v6220_v21 }
  0xaa   :  { %3396 = vmatprep.subr.bf16.mxu0 %v6221_v22  ;;  %3416 = vmatprep.subr.bf16.mxu1 %v6222_v23 }
  0xac   :  { %1635 = vmatmul.mubr.bf16.gmra.mxu1 %v4025_v19 }
  0xad   :  { %3397 = vmatpush3.bf16.msra.mxu0 %v6223_v25  ;;  %3417 = vmatpush3.bf16.msra.mxu1 %v6224_v26  ;;  %v5200_v25 = vld [vmem:[%s6080_s4 + $0xa8] sm:$0xff]  }
  0xae   :  { %3398 = vmatprep.subr.bf16.mxu0 %v6225_v27  ;;  %3418 = vmatprep.subr.bf16.mxu1 %v6226_v28  ;;  %v5206_v27 = vld [vmem:[%s6080_s4 + $0x60] sm:$0xff]  }
  0xaf   :  { %1724 = vmatprep.mubr.bf16.mxu1 %v4034_v24  ;;  %v5194_v24 = vld [vmem:[%s6080_s4 + $0x28] sm:$0xff]   ;;  %v5212_v28 = vld [vmem:[%s6080_s4 + $0xe0] sm:$0xff]  }
  0xb1   :  { %3399 = vmatpush3.bf16.msra.mxu0 %v6227_v30  ;;  %3419 = vmatpush3.bf16.msra.mxu1 %v6228_v31 }
  0xb2   :  { %3420 = vmatprep.subr.bf16.mxu1 %v6229_v36  ;;  %3440 = vmatprep.subr.bf16.mxu0 %v6230_v37 }
  0xb4   :  { %1676 = vmatmul.mubr.bf16.vlgmr.msra.gmra.mxu0 %v4026_v29 }
  0xb5   :  { %3421 = vmatpush3.bf16.msra.mxu1 %v6231_v39  ;;  %3441 = vmatpush3.bf16.msra.mxu0 %v6232_v40  ;;  %v5226_v39 = vld [vmem:[%s6080_s4 + $0xa0] sm:$0xff]   ;;  %v5232_v40 = vld [vmem:[%s6080_s4 + $0x58] sm:$0xff]  }
  0xb6   :  { %3422 = vmatprep.subr.bf16.mxu1 %v6233_v41  ;;  %3442 = vmatprep.subr.bf16.mxu0 %v6234_v42  ;;  %v5238_v41 = vld [vmem:[%s6080_s4 + $0xd8] sm:$0xff]  }
  0xb7   :  { %1683 = vmatprep.mubr.bf16.mxu0 %v4029_v38  ;;  %v5220_v38 = vld [vmem:[%s6080_s4 + $0x20] sm:$0xff]  }
  0xb9   :  { %3423 = vmatpush3.bf16.msra.mxu1 %v6235_v44  ;;  %3443 = vmatpush3.bf16.msra.mxu0 %v6236_v45  ;;  %v5252_v44 = vld [vmem:[%s6080_s4 + $0x98] sm:$0xff]   ;;  %v5258_v45 = vld [vmem:[%s6080_s4 + $0x50] sm:$0xff]  }
  0xba   :  { %3424 = vmatprep.subr.bf16.mxu1 %v6237_v46  ;;  %3444 = vmatprep.subr.bf16.mxu0 %v6238_v47  ;;  %v5264_v46 = vld [vmem:[%s6080_s4 + $0xd0] sm:$0xff]  }
  0xbb   :  { %v5270_v47 = vld [vmem:[%s6080_s4 + $0x10] sm:$0xff]  }
  0xbc   :  { %1684 = vmatmul.mubr.bf16.gmra.mxu0 %v4031_v43  ;;  %v5246_v43 = vld [vmem:[%s6080_s4 + $0x18] sm:$0xff]  }
  0xbd   :  { %3425 = vmatpush3.bf16.msra.mxu1 %v6239_v49  ;;  %3445 = vmatpush3.bf16.msra.mxu0 %v6240_v50  ;;  %v5282_v49 = vld [vmem:[%s6080_s4 + $0x48] sm:$0xff]  }
  0xbe   :  { %3426 = vmatprep.subr.bf16.mxu1 %v6241_v51  ;;  %3446 = vmatprep.subr.bf16.mxu0 %v6242_v52  ;;  %v5288_v50 = vld [vmem:[%s6080_s4 + $0xc8] sm:$0xff]  }
  0xbf   :  { %1773 = vmatprep.mubr.bf16.mxu0 %v4040_v48  ;;  %v5276_v48 = vld [vmem:[%s6080_s4 + $0x90] sm:$0xff]   ;;  %v5294_v51 = vld [vmem:[%s6080_s4 + $0x8] sm:$0xff]  }
  0xc0   :  { %v5300_v52 = vld [vmem:[%s6080_s4 + $0x88] sm:$0xff]  }
  0xc1   :  { %3427 = vmatpush3.bf16.msra.mxu1 %v6243_v54  ;;  %3447 = vmatpush3.bf16.msra.mxu0 %v6244_v60  ;;  %v5312_v54 = vld [vmem:[%s6080_s4 + $0xc0] sm:$0xff]  }
  0xc2   :  { %3448 = vmatprep.subr.bf16.mxu0 %v6245_v61  ;;  %3834 = vmatprep.subr.bf16.mxu1 %v4897_v33 }
  0xc4   :  { %1725 = vmatmul.mubr.bf16.vlgmr.msra.gmra.mxu1 %v4032_v53  ;;  %v5306_v53 = vld [vmem:[%s6080_s4 + $0x40] sm:$0xff]  }
  0xc5   :  { %3449 = vmatpush3.bf16.msra.mxu0 %v6246_v32  ;;  %3835 = vmatpush3.bf16.msra.mxu1 %v4897_v33  ;;  %v4049_v32 = vld [vmem:[%s6083_s2 + $0x8] ss:$52 sps:$4 sm:$0xff]  }
  0xc6   :  { %3450 = vmatprep.subr.bf16.mxu0 %v6247_v34  ;;  %3836 = vmatprep.subr.bf16.mxu1 %v4902_v35 }
  0xc7   :  { %1732 = vmatprep.mubr.bf16.mxu1 %v4035_v62  ;;  %v4046_v62 = vld [vmem:[%s6083_s2] ss:$52 sps:$4 sm:$0xff]  }
  0xc9   :  { %3451 = vmatpush3.bf16.msra.mxu0 %v6248_v58  ;;  %3837 = vmatpush3.bf16.msra.mxu1 %v4902_v35  ;;  %v4038_v35 = vld [vmem:[%s6082_s1 + $0x28] ss:$52 sps:$4 sm:$0xff]   ;;  %v5330_v58 = vld [vmem:[%s6080_s4 + $0x80] sm:$0xff]  }
  0xca   :  { %3452 = vmatprep.subr.bf16.mxu0 %v6249_v0  ;;  %3838 = vmatprep.subr.bf16.mxu1 %v4918_v55 }
  0xcc   :  { %1733 = vmatmul.mubr.bf16.gmra.mxu1 %v4037_v56  ;;  %v5324_v56 = vld [vmem:[%s6080_s4] sm:$0xff]  }
  0xcd   :  { %3453 = vmatpush3.bf16.msra.mxu0 %v6250_v2  ;;  %3839 = vmatpush3.bf16.msra.mxu1 %v4918_v55  ;;  %v5121_v55 = vld [vmem:[%s6080_s4 + $0x78] sm:$0xff]  }
  0xce   :  { %3454 = vmatprep.subr.bf16.mxu0 %v6251_v4  ;;  %3840 = vmatprep.subr.bf16.mxu1 %v4935_v63  ;;  %v5336_v2 = vld [vmem:[%s6080_s4 + $0x178] sm:$0xff]  }
  0xcf   :  { %3842 = vmatprep.mubr.msk.bf16.mxu1 %vm982_vm0, %v4041_v57  ;;  %v5342_v4 = vld [vmem:[%s6080_s4 + $0x1f8] sm:$0xff]  }
  0xd1   :  { %3455 = vmatpush3.bf16.msra.mxu0 %v6252_v6  ;;  %3841 = vmatpush3.bf16.msra.mxu1 %v4935_v63 }
  0xd2   :  { %3474 = vmatprep.subr.bf16.mxu0 %v5121_v55  ;;  %3502 = vmatprep.subr.bf16.mxu1 %v5127_v8 }
  0xd4   :  { %1774 = vmatmul.mubr.bf16.vlgmr.msra.gmra.mxu0 %v4038_v35  ;;  %3843 = vmatmul.mubr.msk.bf16.vlgmr.msra.gmra.mxu1 %vm982_vm0, %v4042_v59 }
  0xd5   :  { %3475 = vmatpush3.bf16.msra.mxu0 %v5140_v5  ;;  %3503 = vmatpush3.bf16.msra.mxu1 %v5146_v7 }
  0xd6   :  { %3476 = vmatprep.subr.bf16.mxu0 %v5152_v9  ;;  %3504 = vmatprep.subr.bf16.mxu1 %v5158_v10 }
  0xd7   :  { %1781 = vmatprep.mubr.bf16.mxu0 %v4043_v1  ;;  %2088 = vmatprep.mubr.bf16.mxu1 %v4051_v3  ;;  %v4052_v1 = vld [vmem:[%s6083_s2 + $0x6c] ss:$52 sps:$4 sm:$0xff]   ;;  %v4054_v3 = vld [vmem:[%s6083_s2 + $0x74] ss:$52 sps:$4 sm:$0xff]  }
  0xd9   :  { %3477 = vmatpush3.bf16.msra.mxu0 %v5167_v13  ;;  %3505 = vmatpush3.bf16.msra.mxu1 %v5173_v14 }
  0xda   :  { %3478 = vmatprep.subr.bf16.mxu0 %v5182_v17  ;;  %3506 = vmatprep.subr.bf16.mxu1 %v5188_v18 }
  0xdc   :  { %1782 = vmatmul.mubr.bf16.gmra.mxu0 %v4045_v11 }
  0xdd   :  { %3479 = vmatpush3.bf16.msra.mxu0 %v5194_v24  ;;  %3507 = vmatpush3.bf16.msra.mxu1 %v5200_v25 }
  0xde   :  { %3480 = vmatprep.subr.bf16.mxu0 %v5206_v27  ;;  %3508 = vmatprep.subr.bf16.mxu1 %v5212_v28 }
  0xdf   :  { %2039 = vmatprep.mubr.bf16.mxu0 %v4048_v16  ;;  %v5362_v16 = vld [vmem:[%s6080_s4 + $0x1b8] sm:$0xff]  }
  0xe0   :  { %6253 = vst [vmem:[#allocation2_spill] sm:$0xff] %v5362_v16 }
  0xe1   :  { %3481 = vmatpush3.bf16.msra.mxu0 %v5220_v38  ;;  %3509 = vmatpush3.bf16.msra.mxu1 %v5226_v39 }
  0xe2   :  { %3482 = vmatprep.subr.bf16.mxu0 %v5232_v40  ;;  %3510 = vmatprep.subr.bf16.mxu1 %v5238_v41 }
  0xe3   :  { %v3142_v12 = vpop.f32.mrf.mxu0 }
  0xe4   :  { %v3170_v15 = vpop.f32.mrf.mxu1 }
  0xe5   :  { %v3143_v19 = vpop.f32.mrf.mxu0  ;;  %3483 = vmatpush3.bf16.msra.mxu0 %v5246_v43  ;;  %3511 = vmatpush3.bf16.msra.mxu1 %v5252_v44 }
  0xe6   :  { %v3144_v20 = vadd.f32 %v3143_v19, %v3142_v12  ;;  %v3171_v21 = vpop.f32.mrf.mxu1  ;;  %3484 = vmatprep.subr.bf16.mxu0 %v5258_v45  ;;  %3512 = vmatprep.subr.bf16.mxu1 %v5264_v46 }
  0xe7   :  { %v3172_v22 = vadd.f32 %v3171_v21, %v3170_v15  ;;  %v3145_v23 = vpop.f32.mrf.mxu0  ;;  %v5356_v15 = vld [vmem:[%s6080_s4 + $0x138] sm:$0xff]   ;;  %v5368_v21 = vld [vmem:[%s6080_s4 + $0x170] sm:$0xff]  }
  0xe8   :  { %v3173_v26 = vpop.f32.mrf.mxu1 }
  0xe9   :  { %v5215_v29 = vadd.f32 %v3172_v22, %v3144_v20  ;;  %v3146_v30 = vpop.f32.mrf.mxu0  ;;  %3485 = vmatpush3.bf16.msra.mxu0 %v5270_v47  ;;  %3513 = vmatpush3.bf16.msra.mxu1 %v5276_v48  ;;  %v5374_v22 = vld [vmem:[%s6080_s4 + $0x1f0] sm:$0xff]  }
  0xea   :  { %v3147_v31 = vadd.f32 %v3146_v30, %v3145_v23  ;;  %v3174_v36 = vpop.f32.mrf.mxu1  ;;  %3486 = vmatprep.subr.bf16.mxu0 %v5282_v49  ;;  %3514 = vmatprep.subr.bf16.mxu1 %v5288_v50  ;;  %6254 = vst [vmem:[#allocation10_spill] sm:$0xff] %v5374_v22  ;;  %v4056_v30 = vld [vmem:[%s6083_s2 + $0x68] ss:$52 sps:$4 sm:$0xff]  }
  0xeb   :  { %v3175_v37 = vadd.f32 %v3174_v36, %v3173_v26  ;;  %v3148_v60 = vpop.f32.mrf.mxu0  ;;  %v5388_v36 = vld [vmem:[%s6080_s4 + $0x130] sm:$0xff]  }
  0xec   :  { %v3176_v61 = vpop.f32.mrf.mxu1 }
  0xed   :  { %v5241_v42 = vadd.f32 %v3175_v37, %v3147_v31  ;;  %3487 = vmatpush3.bf16.msra.mxu0 %v5294_v51  ;;  %3515 = vmatpush3.bf16.msra.mxu1 %v5300_v52  ;;  %v3149_v34 = vpop.f32.mrf.mxu0  ;;  %v4057_v31 = vld [vmem:[%s6083_s2 + $0x70] ss:$52 sps:$4 sm:$0xff]  }
  0xee   :  { %3488 = vmatprep.subr.bf16.mxu0 %v5306_v53  ;;  %3516 = vmatprep.subr.bf16.mxu1 %v5312_v54  ;;  %v3150_v0 = vadd.f32 %v3149_v34, %v3148_v60  ;;  %v3177_v57 = vpop.f32.mrf.mxu1  ;;  %v5394_v37 = vld [vmem:[%s6080_s4 + $0x1b0] sm:$0xff]   ;;  %v5400_v60 = vld [vmem:[%s6080_s4 + $0x168] sm:$0xff]  }
  0xef   :  { %v3178_v35 = vadd.f32 %v3177_v57, %v3176_v61  ;;  %v3151_v59 = vpop.f32.mrf.mxu0  ;;  %6255 = vst [vmem:[#allocation3_spill] sm:$0xff] %v5394_v37  ;;  %v5406_v61 = vld [vmem:[%s6080_s4 + $0x1e8] sm:$0xff]  }
  0xf0   :  { %v3179_v6 = vpop.f32.mrf.mxu1  ;;  %6256 = vst [vmem:[#allocation12_spill] sm:$0xff] %v5406_v61  ;;  %v5418_v34 = vld [vmem:[%s6080_s4 + $0x128] sm:$0xff]  }
  0xf1   :  { %3489 = vmatpush3.bf16.msra.mxu0 %v5324_v56  ;;  %3517 = vmatpush3.bf16.msra.mxu1 %v5330_v58  ;;  %v5351_v11 = vadd.f32 %v3178_v35, %v3150_v0  ;;  %v3152_v12 = vpop.f32.mrf.mxu0  ;;  %v5424_v0 = vld [vmem:[%s6080_s4 + $0x1a8] sm:$0xff]   ;;  %v5430_v35 = vld [vmem:[%s6080_s4 + $0x160] sm:$0xff]  }
  0xf2   :  { %3530 = vmatprep.subr.bf16.mxu0 %v5336_v2  ;;  %3558 = vmatprep.subr.bf16.mxu1 %v5342_v4  ;;  %v3153_v19 = vadd.f32 %v3152_v12, %v3151_v59  ;;  %v3180_v20 = vpop.f32.mrf.mxu1  ;;  %6257 = vst [vmem:[#allocation4_spill] sm:$0xff] %v5424_v0  ;;  %v5436_v59 = vld [vmem:[%s6080_s4 + $0x1e0] sm:$0xff]  }
  0xf3   :  { %v3181_v23 = vadd.f32 %v3180_v20, %v3179_v6  ;;  %6258 = vst [vmem:[#allocation14_spill] sm:$0xff] %v5436_v59  ;;  %v5448_v20 = vld [vmem:[%s6080_s4 + $0x1a0] sm:$0xff]  }
  0xf4   :  { %2040 = vmatmul.mubr.bf16.vlgmr.msra.gmra.mxu0 %v4046_v62  ;;  %2089 = vmatmul.mubr.bf16.vlgmr.msra.gmra.mxu1 %v4049_v32  ;;  %v4060_v62 = vld [vmem:[%s6083_s2 + $0x14] ss:$52 sps:$4 sm:$0xff]   ;;  %v4063_v32 = vld [vmem:[%s6083_s2 + $0x1c] ss:$52 sps:$4 sm:$0xff]   ;;  %6259 = vst [vmem:[#allocation5_spill] sm:$0xff] %v5448_v20 }
  0xf5   :  { %3531 = vmatpush3.bf16.msra.mxu0 %v5356_v15  ;;  %3559 = vmatpush3.bf16.msra.mxu1 %v5362_v16  ;;  %v5377_v26 = vadd.f32 %v3181_v23, %v3153_v19  ;;  %v5442_v19 = vld [vmem:[%s6080_s4 + $0x120] sm:$0xff]  }
  0xf6   :  { %3532 = vmatprep.subr.bf16.mxu0 %v5368_v21  ;;  %3560 = vmatprep.subr.bf16.mxu1 %v5374_v22 }
  0xf7   :  { %2047 = vmatprep.mubr.bf16.mxu0 %v4052_v1  ;;  %2096 = vmatprep.mubr.bf16.mxu1 %v4054_v3 }
  0xf9   :  { %3533 = vmatpush3.bf16.msra.mxu0 %v5388_v36  ;;  %3561 = vmatpush3.bf16.msra.mxu1 %v5394_v37  ;;  %v5552_v37 = vld [vmem:[%s6080_s4 + $0x100] sm:$0xff]  }
  0xfa   :  { %3534 = vmatprep.subr.bf16.mxu0 %v5400_v60  ;;  %3562 = vmatprep.subr.bf16.mxu1 %v5406_v61  ;;  %6272 = vst [vmem:[#allocation13_spill] sm:$0xff] %v5552_v37 }
  0xfc   :  { %2048 = vmatmul.mubr.bf16.gmra.mxu0 %v4056_v30  ;;  %2097 = vmatmul.mubr.bf16.gmra.mxu1 %v4057_v31  ;;  %v5454_v31 = vld [vmem:[%s6080_s4 + $0x158] sm:$0xff]  }
  0xfd   :  { %3535 = vmatpush3.bf16.msra.mxu0 %v5418_v34  ;;  %3563 = vmatpush3.bf16.msra.mxu1 %v5424_v0  ;;  %v5475_v0 = vld [vmem:[%s6080_s4 + $0x198] sm:$0xff]  }
  0xfe   :  { %3536 = vmatprep.subr.bf16.mxu0 %v5430_v35  ;;  %3564 = vmatprep.subr.bf16.mxu1 %v5436_v59  ;;  %v5469_v59 = vld [vmem:[%s6080_s4 + $0x118] sm:$0xff]   ;;  %6261 = vst [vmem:[#allocation6_spill] sm:$0xff] %v5475_v0 }
  0xff   :  { %2137 = vmatprep.mubr.bf16.mxu0 %v4060_v62  ;;  %2186 = vmatprep.mubr.bf16.mxu1 %v4063_v32  ;;  %v5460_v62 = vld [vmem:[%s6080_s4 + $0x1d8] sm:$0xff]  }
 0x100   :  { %6260 = vst [vmem:[#allocation16_spill] sm:$0xff] %v5460_v62 }
 0x101   :  { %3537 = vmatpush3.bf16.msra.mxu0 %v5442_v19  ;;  %3565 = vmatpush3.bf16.msra.mxu1 %v5448_v20 }
 0x102   :  { %3538 = vmatprep.subr.bf16.mxu0 %v5454_v31  ;;  %3566 = vmatprep.subr.bf16.mxu1 %v5460_v62  ;;  %v5527_v62 = vld [vmem:[%s6080_s4 + $0x188] sm:$0xff]  }
 0x103   :  { %v3198_v57 = vpop.f32.mrf.mxu0  ;;  %6269 = vst [vmem:[#allocation26_spill] sm:$0xff] %v5527_v62 }
 0x104   :  { %v3226_v6 = vpop.f32.mrf.mxu1 }
 0x105   :  { %v3199_v1 = vpop.f32.mrf.mxu0  ;;  %3539 = vmatpush3.bf16.msra.mxu0 %v5469_v59  ;;  %3567 = vmatpush3.bf16.msra.mxu1 %v5475_v0 }
 0x106   :  { %v3200_v3 = vadd.f32 %v3199_v1, %v3198_v57  ;;  %v3227_v12 = vpop.f32.mrf.mxu1 }
 0x107   :  { %v3201_v23 = vpop.f32.mrf.mxu0  ;;  %v3228_v30 = vadd.f32 %v3227_v12, %v3226_v6 }
 0x108   :  { %v1122_v32 = vadd.f32 %v3200_v3, %v5215_v29  ;;  %v3229_v57 = vpop.f32.mrf.mxu1  ;;  %v5481_v3 = vld [vmem:[%s6080_s4 + $0x150] sm:$0xff]  }
 0x109   :  { %v3202_v1 = vpop.f32.mrf.mxu0  ;;  %6262 = vst [vmem:[#allocation18_spill] sm:$0xff] %v5481_v3  ;;  %3540 = vmatprep.subr.bf16.mxu0 %v5481_v3  ;;  %v4079_v3 = vld [vmem:[%s6083_s2 + $0x94] ss:$52 sps:$4 sm:$0xff]  }
 0x10a   :  { %v5464_v20 = vadd.f32 %v3228_v30, %v1122_v32  ;;  %v3203_v6 = vadd.f32 %v3202_v1, %v3201_v23  ;;  %v3230_v12 = vpop.f32.mrf.mxu1  ;;  %v5487_v23 = vld [vmem:[%s6080_s4 + $0x1d0] sm:$0xff]  }
 0x10b   :  { %v3231_v29 = vadd.f32 %v3230_v12, %v3229_v57  ;;  %6263 = vst [vmem:[#allocation7_spill] sm:$0xff] %v5487_v23  ;;  %3568 = vmatprep.subr.bf16.mxu1 %v5487_v23  ;;  %v3204_v32 = vpop.f32.mrf.mxu0  ;;  %v5496_v57 = vld [vmem:[%s6080_s4 + $0x110] sm:$0xff]  }
 0x10c   :  { %v1125_v30 = vadd.f32 %v3203_v6, %v5241_v42  ;;  %6264 = vst [vmem:[#allocation20_spill] sm:$0xff] %v5496_v57  ;;  %3541 = vmatpush3.bf16.msra.mxu0 %v5496_v57  ;;  %v5502_v12 = vld [vmem:[%s6080_s4 + $0x190] sm:$0xff]   ;;  %v5508_v42 = vld [vmem:[%s6080_s4 + $0x148] sm:$0xff]   ;;  %v3232_v61 = vpop.f32.mrf.mxu1 }
 0x10d   :  { %6265 = vst [vmem:[#allocation8_spill] sm:$0xff] %v5502_v12  ;;  %3569 = vmatpush3.bf16.msra.mxu1 %v5502_v12  ;;  %v3205_v23 = vpop.f32.mrf.mxu0  ;;  %6266 = vst [vmem:[#allocation22_spill] sm:$0xff] %v5508_v42  ;;  %3542 = vmatprep.subr.bf16.mxu0 %v5508_v42  ;;  %v5514_v6 = vld [vmem:[%s6080_s4 + $0x1c8] sm:$0xff]   ;;  %v4058_v42 = vld [vmem:[%s6083_s2 + $0x10] ss:$52 sps:$4 sm:$0xff]  }
 0x10e   :  { %v5491_v1 = vadd.f32 %v3231_v29, %v1125_v30  ;;  %6267 = vst [vmem:[#allocation24_spill] sm:$0xff] %v5514_v6  ;;  %3570 = vmatprep.subr.bf16.mxu1 %v5514_v6  ;;  %v3206_v29 = vadd.f32 %v3205_v23, %v3204_v32  ;;  %v5521_v12 = vld [vmem:[%s6080_s4 + $0x108] sm:$0xff]   ;;  %v5539_v23 = vld [vmem:[%s6080_s4 + $0x1c0] sm:$0xff]  }
 0x10f   :  { %v3207_v30 = vpop.f32.mrf.mxu0  ;;  %6268 = vst [vmem:[#allocation9_spill] sm:$0xff] %v5521_v12  ;;  %6271 = vst [vmem:[#allocation28_spill] sm:$0xff] %v5539_v23 }
 0x110   :  { %v1130_v0 = vadd.f32 %v3206_v29, %v5351_v11  ;;  %3543 = vmatpush3.bf16.msra.mxu0 %v5521_v12  ;;  %v5533_v11 = vld [vmem:[%s6080_s4 + $0x140] sm:$0xff]   ;;  %v3233_v29 = vpop.f32.mrf.mxu1 }
 0x111   :  { %3571 = vmatpush3.bf16.msra.mxu1 %v5527_v62  ;;  %v3208_v6 = vpop.f32.mrf.mxu0  ;;  %6270 = vst [vmem:[#allocation11_spill] sm:$0xff] %v5533_v11  ;;  %3544 = vmatprep.subr.bf16.mxu0 %v5533_v11  ;;  %v3234_v12 = vadd.f32 %v3233_v29, %v3232_v61  ;;  %v4061_v11 = vld [vmem:[%s6083_s2 + $0x18] ss:$52 sps:$4 sm:$0xff]   ;;  %v5558_v61 = vld [vmem:[%s6080_s4 + $0x180] sm:$0xff]  }
 0x112   :  { %3572 = vmatprep.subr.bf16.mxu1 %v5539_v23  ;;  %v3209_v32 = vadd.f32 %v3208_v6, %v3207_v30  ;;  %6273 = vst [vmem:[#allocation30_spill] sm:$0xff] %v5558_v61  ;;  %v5566_v30 = vld [vmem:[%s6080_s4 + $0x278] sm:$0xff]  }
 0x113   :  { %v5561_v6 = vadd.f32 %v3234_v12, %v1130_v0  ;;  %6274 = vst [vmem:[#allocation15_spill] sm:$0xff] %v5566_v30  ;;  %v4064_v0 = vld [vmem:[%s6083_s2 + $0x7c] ss:$52 sps:$4 sm:$0xff]   ;;  %v4067_v12 = vld [vmem:[%s6083_s2 + $0x84] ss:$52 sps:$4 sm:$0xff]  }
 0x114   :  { %v1133_v62 = vadd.f32 %v3209_v32, %v5377_v26  ;;  %3545 = vmatpush3.bf16.msra.mxu0 %v5552_v37  ;;  %v3235_v26 = vpop.f32.mrf.mxu1  ;;  %v5572_v32 = vld [vmem:[%s6080_s4 + $0x2f8] sm:$0xff]   ;;  %v5719_v37 = vld [vmem:[%s6080_s4 + $0x210] sm:$0xff]  }
 0x115   :  { %3573 = vmatpush3.bf16.msra.mxu1 %v5558_v61  ;;  %3586 = vmatprep.subr.bf16.mxu0 %v5566_v30  ;;  %6275 = vst [vmem:[#allocation32_spill] sm:$0xff] %v5572_v32  ;;  %v5584_v23 = vld [vmem:[%s6080_s4 + $0x238] sm:$0xff]   ;;  %6296 = vst [vmem:[#allocation45_spill] sm:$0xff] %v5719_v37 }
 0x116   :  { %3614 = vmatprep.subr.bf16.mxu1 %v5572_v32  ;;  %v3236_v29 = vpop.f32.mrf.mxu1  ;;  %6276 = vst [vmem:[#allocation17_spill] sm:$0xff] %v5584_v23  ;;  %v5590_v32 = vld [vmem:[%s6080_s4 + $0x2b8] sm:$0xff]  }
 0x117   :  { %v3237_v61 = vadd.f32 %v3236_v29, %v3235_v26  ;;  %2138 = vmatmul.mubr.bf16.vlgmr.msra.gmra.mxu0 %v4058_v42  ;;  %6277 = vst [vmem:[#allocation34_spill] sm:$0xff] %v5590_v32  ;;  %v5598_v42 = vld [vmem:[%s6080_s4 + $0x270] sm:$0xff]  }
 0x118   :  { %2187 = vmatmul.mubr.bf16.vlgmr.msra.gmra.mxu1 %v4061_v11  ;;  %3587 = vmatpush3.bf16.msra.mxu0 %v5584_v23  ;;  %6278 = vst [vmem:[#allocation19_spill] sm:$0xff] %v5598_v42  ;;  %v5604_v11 = vld [vmem:[%s6080_s4 + $0x2f0] sm:$0xff]  }
 0x119   :  { %3615 = vmatpush3.bf16.msra.mxu1 %v5590_v32  ;;  %v5593_v30 = vadd.f32 %v3237_v61, %v1133_v62  ;;  %3588 = vmatprep.subr.bf16.mxu0 %v5598_v42  ;;  %6279 = vst [vmem:[#allocation36_spill] sm:$0xff] %v5604_v11  ;;  %v4066_v62 = vld [vmem:[%s6083_s2 + $0x78] ss:$52 sps:$4 sm:$0xff]   ;;  %v4069_v61 = vld [vmem:[%s6083_s2 + $0x80] ss:$52 sps:$4 sm:$0xff]  }
 0x11a   :  { %3616 = vmatprep.subr.bf16.mxu1 %v5604_v11  ;;  %2145 = vmatprep.mubr.bf16.mxu0 %v4064_v0  ;;  %v5616_v26 = vld [vmem:[%s6080_s4 + $0x230] sm:$0xff]   ;;  %v5628_v0 = vld [vmem:[%s6080_s4 + $0x268] sm:$0xff]   ;;  %v4072_v11 = vld [vmem:[%s6083_s2 + $0x24] ss:$52 sps:$4 sm:$0xff]  }
 0x11b   :  { %2194 = vmatprep.mubr.bf16.mxu1 %v4067_v12  ;;  %6280 = vst [vmem:[#allocation21_spill] sm:$0xff] %v5616_v26  ;;  %v5622_v29 = vld [vmem:[%s6080_s4 + $0x2b0] sm:$0xff]   ;;  %6282 = vst [vmem:[#allocation23_spill] sm:$0xff] %v5628_v0  ;;  %v5634_v12 = vld [vmem:[%s6080_s4 + $0x2e8] sm:$0xff]  }
 0x11c   :  { %3589 = vmatpush3.bf16.msra.mxu0 %v5616_v26  ;;  %6281 = vst [vmem:[#allocation38_spill] sm:$0xff] %v5622_v29  ;;  %6283 = vst [vmem:[#allocation25_spill] sm:$0xff] %v5634_v12  ;;  %v5646_v32 = vld [vmem:[%s6080_s4 + $0x228] sm:$0xff]  }
 0x11d   :  { %3617 = vmatpush3.bf16.msra.mxu1 %v5622_v29  ;;  %3590 = vmatprep.subr.bf16.mxu0 %v5628_v0  ;;  %v4075_v29 = vld [vmem:[%s6083_s2 + $0x2c] ss:$52 sps:$4 sm:$0xff]   ;;  %6284 = vst [vmem:[#allocation27_spill] sm:$0xff] %v5646_v32 }
 0x11e   :  { %3618 = vmatprep.subr.bf16.mxu1 %v5634_v12  ;;  %v5652_v12 = vld [vmem:[%s6080_s4 + $0x2a8] sm:$0xff]   ;;  %v5658_v0 = vld [vmem:[%s6080_s4 + $0x260] sm:$0xff]  }
 0x11f   :  { %2146 = vmatmul.mubr.bf16.gmra.mxu0 %v4066_v62  ;;  %6285 = vst [vmem:[#allocation29_spill] sm:$0xff] %v5652_v12  ;;  %6286 = vst [vmem:[#allocation31_spill] sm:$0xff] %v5658_v0  ;;  %v5664_v62 = vld [vmem:[%s6080_s4 + $0x2e0] sm:$0xff]  }
 0x120   :  { %2195 = vmatmul.mubr.bf16.gmra.mxu1 %v4069_v61  ;;  %3591 = vmatpush3.bf16.msra.mxu0 %v5646_v32  ;;  %6287 = vst [vmem:[#allocation33_spill] sm:$0xff] %v5664_v62  ;;  %v5670_v61 = vld [vmem:[%s6080_s4 + $0x220] sm:$0xff]  }
 0x121   :  { %3619 = vmatpush3.bf16.msra.mxu1 %v5652_v12  ;;  %3592 = vmatprep.subr.bf16.mxu0 %v5658_v0  ;;  %6288 = vst [vmem:[#allocation35_spill] sm:$0xff] %v5670_v61  ;;  %v5676_v12 = vld [vmem:[%s6080_s4 + $0x2a0] sm:$0xff]  }
 0x122   :  { %3620 = vmatprep.subr.bf16.mxu1 %v5664_v62  ;;  %2235 = vmatprep.mubr.bf16.mxu0 %v4072_v11  ;;  %6289 = vst [vmem:[#allocation37_spill] sm:$0xff] %v5676_v12  ;;  %v5682_v11 = vld [vmem:[%s6080_s4 + $0x258] sm:$0xff]  }
 0x123   :  { %2284 = vmatprep.mubr.bf16.mxu1 %v4075_v29  ;;  %v3254_v0 = vpop.f32.mrf.mxu0  ;;  %6290 = vst [vmem:[#allocation39_spill] sm:$0xff] %v5682_v11  ;;  %v5688_v29 = vld [vmem:[%s6080_s4 + $0x2d8] sm:$0xff]  }
 0x124   :  { %3593 = vmatpush3.bf16.msra.mxu0 %v5670_v61  ;;  %6291 = vst [vmem:[#allocation40_spill] sm:$0xff] %v5688_v29  ;;  %v3282_v61 = vpop.f32.mrf.mxu1 }
 0x125   :  { %3621 = vmatpush3.bf16.msra.mxu1 %v5676_v12  ;;  %3594 = vmatprep.subr.bf16.mxu0 %v5682_v11  ;;  %v3255_v62 = vpop.f32.mrf.mxu0  ;;  %v5694_v12 = vld [vmem:[%s6080_s4 + $0x218] sm:$0xff]  }
 0x126   :  { %3622 = vmatprep.subr.bf16.mxu1 %v5688_v29  ;;  %6292 = vst [vmem:[#allocation41_spill] sm:$0xff] %v5694_v12  ;;  %v5700_v11 = vld [vmem:[%s6080_s4 + $0x298] sm:$0xff]   ;;  %v3256_v32 = vadd.f32 %v3255_v62, %v3254_v0  ;;  %v3283_v42 = vpop.f32.mrf.mxu1  ;;  %v5706_v29 = vld [vmem:[%s6080_s4 + $0x250] sm:$0xff]  }
 0x127   :  { %6293 = vst [vmem:[#allocation42_spill] sm:$0xff] %v5700_v11  ;;  %v3257_v26 = vpop.f32.mrf.mxu0  ;;  %6294 = vst [vmem:[#allocation43_spill] sm:$0xff] %v5706_v29 }
 0x128   :  { %3595 = vmatpush3.bf16.msra.mxu0 %v5694_v12  ;;  %v5712_v12 = vld [vmem:[%s6080_s4 + $0x2d0] sm:$0xff]   ;;  %v1220_v23 = vadd.f32 %v3256_v32, %v5464_v20  ;;  %v3285_v62 = vpop.f32.mrf.mxu1 }
 0x129   :  { %3623 = vmatpush3.bf16.msra.mxu1 %v5700_v11  ;;  %3596 = vmatprep.subr.bf16.mxu0 %v5706_v29  ;;  %6295 = vst [vmem:[#allocation44_spill] sm:$0xff] %v5712_v12  ;;  %v3284_v11 = vadd.f32 %v3283_v42, %v3282_v61  ;;  %v3258_v0 = vpop.f32.mrf.mxu0  ;;  %v5725_v29 = vld [vmem:[%s6080_s4 + $0x290] sm:$0xff]   ;;  %v5731_v42 = vld [vmem:[%s6080_s4 + $0x248] sm:$0xff]  }
 0x12a   :  { %3624 = vmatprep.subr.bf16.mxu1 %v5712_v12  ;;  %6297 = vst [vmem:[#allocation46_spill] sm:$0xff] %v5725_v29  ;;  %v3259_v12 = vadd.f32 %v3258_v0, %v3257_v26  ;;  %v3286_v32 = vpop.f32.mrf.mxu1  ;;  %6298 = vst [vmem:[#allocation47_spill] sm:$0xff] %v5731_v42  ;;  %v5737_v61 = vld [vmem:[%s6080_s4 + $0x2c8] sm:$0xff]  }
 0x12b   :  { %v1269_v57 = vadd.f32 %v3284_v11, %v1220_v23  ;;  %v3260_v20 = vpop.f32.mrf.mxu0  ;;  %6299 = vst [vmem:[#allocation48_spill] sm:$0xff] %v5737_v61  ;;  %v3287_v26 = vadd.f32 %v3286_v32, %v3285_v62  ;;  %v5744_v0 = vld [vmem:[%s6080_s4 + $0x208] sm:$0xff]   ;;  %v5756_v62 = vld [vmem:[%s6080_s4 + $0x240] sm:$0xff]  }
 0x12c   :  { %3597 = vmatpush3.bf16.msra.mxu0 %v5719_v37  ;;  %v3288_v11 = vpop.f32.mrf.mxu1  ;;  %6300 = vst [vmem:[#allocation49_spill] sm:$0xff] %v5744_v0  ;;  %6302 = vst [vmem:[#allocation51_spill] sm:$0xff] %v5756_v62  ;;  %v5762_v32 = vld [vmem:[%s6080_s4 + $0x2c0] sm:$0xff]  }
 0x12d   :  { %3625 = vmatpush3.bf16.msra.mxu1 %v5725_v29  ;;  %3598 = vmatprep.subr.bf16.mxu0 %v5731_v42  ;;  %v1223_v29 = vadd.f32 %v3259_v12, %v5491_v1  ;;  %v3261_v23 = vpop.f32.mrf.mxu0  ;;  %v5750_v42 = vld [vmem:[%s6080_s4 + $0x288] sm:$0xff]   ;;  %6303 = vst [vmem:[#allocation52_spill] sm:$0xff] %v5762_v32 }
 0x12e   :  { %3626 = vmatprep.subr.bf16.mxu1 %v5737_v61  ;;  %6301 = vst [vmem:[#allocation50_spill] sm:$0xff] %v5750_v42  ;;  %v3262_v61 = vadd.f32 %v3261_v23, %v3260_v20  ;;  %v3289_v12 = vpop.f32.mrf.mxu1  ;;  %v4070_v23 = vld [vmem:[%s6083_s2 + $0x20] ss:$52 sps:$4 sm:$0xff]  }
 0x12f   :  { %v1272_v37 = vadd.f32 %v3287_v26, %v1223_v29  ;;  %v3263_v1 = vpop.f32.mrf.mxu0  ;;  %v3290_v20 = vadd.f32 %v3289_v12, %v3288_v11 }
 0x130   :  { %3599 = vmatpush3.bf16.msra.mxu0 %v5744_v0  ;;  %v3291_v26 = vpop.f32.mrf.mxu1  ;;  %v5775_v0 = vld [vmem:[%s6080_s4 + $0x200] sm:$0xff]  }
 0x131   :  { %3627 = vmatpush3.bf16.msra.mxu1 %v5750_v42  ;;  %3600 = vmatprep.subr.bf16.mxu0 %v5756_v62  ;;  %v1228_v42 = vadd.f32 %v3262_v61, %v5561_v6  ;;  %v3264_v29 = vpop.f32.mrf.mxu0  ;;  %v4073_v62 = vld [vmem:[%s6083_s2 + $0x28] ss:$52 sps:$4 sm:$0xff]   ;;  %6304 = vst [vmem:[#allocation53_spill] sm:$0xff] %v5775_v0  ;;  %v5781_v6 = vld [vmem:[%s6080_s4 + $0x280] sm:$0xff]  }
 0x132   :  { %3628 = vmatprep.subr.bf16.mxu1 %v5762_v32  ;;  %v3265_v61 = vadd.f32 %v3264_v29, %v3263_v1  ;;  %v3292_v12 = vpop.f32.mrf.mxu1  ;;  %v5805_v1 = vld [vmem:[%s6080_s4 + $0x310] sm:$0xff]  }
 0x133   :  { %v1277_v11 = vadd.f32 %v3290_v20, %v1228_v42  ;;  %v3293_v22 = vadd.f32 %v3292_v12, %v3291_v26  ;;  %v6305_v20 = vld [vmem:[#allocation2_spill] sm:$0xff]  ;;  %v6309_v12 = vld [vmem:[#allocation3_spill] sm:$0xff] }
 0x134   :  { %3601 = vmatpush3.bf16.msra.mxu0 %v5775_v0  ;;  %v1231_v32 = vadd.f32 %v3265_v61, %v5593_v30  ;;  %v4076_v0 = vld [vmem:[%s6083_s2 + $0x8c] ss:$52 sps:$4 sm:$0xff]   ;;  %v3832_v16 = vpop.f32.mrf.mxu0 }
 0x135   :  { %3629 = vmatpush3.bf16.msra.mxu1 %v5781_v6  ;;  %3846 = vmatprep.subr.bf16.mxu0 %v4897_v33  ;;  %v5793_v42 = vadd.f32 %v3832_v16, %v1277_v11  ;;  %v5798_v33 = vld [vmem:[%s6080_s4 + $0x318] sm:$0xff]   ;;  %v6307_v26 = vld [vmem:[#allocation10_spill] sm:$0xff]  ;;  %v6308_v11 = vld [vmem:[#allocation20_spill] sm:$0xff] }
 0x136   :  { %3648 = vmatprep.subr.bf16.mxu1 %v5121_v55  ;;  %v1280_v55 = vadd.f32 %v3293_v22, %v1231_v32  ;;  %v1317_v30 = vpop.f32.mrf.mxu0  ;;  %v4081_v22 = vld [vmem:[%s6083_s2 + $0x90] ss:$52 sps:$4 sm:$0xff]  }
 0x137   :  { %2236 = vmatmul.mubr.bf16.vlgmr.msra.gmra.mxu0 %v4070_v23  ;;  %v5809_v16 = vadd.f32 %v1317_v30, %v1269_v57  ;;  %v4095_v23 = vld [vmem:[%s6084_s3 + $0x70] ss:$52 sps:$4 sm:$0xff]  }
 0x138   :  { %2285 = vmatmul.mubr.bf16.vlgmr.msra.gmra.mxu1 %v4073_v62  ;;  %3847 = vmatpush3.bf16.msra.mxu0 %v5798_v33  ;;  %v3833_v62 = vpop.f32.mrf.mxu0  ;;  %v6311_v30 = vld [vmem:[#allocation12_spill] sm:$0xff] }
 0x139   :  { %3649 = vmatpush3.bf16.msra.mxu1 %v5140_v5  ;;  %3848 = vmatprep.subr.bf16.mxu0 %v5805_v1  ;;  %v4078_v5 = vld [vmem:[%s6083_s2 + $0x88] ss:$52 sps:$4 sm:$0xff]   ;;  %v5817_v32 = vadd.f32 %v3833_v62, %v1280_v55  ;;  %v6310_v55 = vld [vmem:[#allocation22_spill] sm:$0xff] }
 0x13a   :  { %3650 = vmatprep.subr.bf16.mxu1 %v5152_v9  ;;  %2243 = vmatprep.mubr.bf16.mxu0 %v4076_v0  ;;  %v1320_v9 = vpop.f32.mrf.mxu0  ;;  %v4082_v0 = vld [vmem:[%s6083_s2 + $0x30] ss:$52 sps:$4 sm:$0xff]  }
 0x13b   :  { %2292 = vmatprep.mubr.bf16.mxu1 %v4079_v3  ;;  %v5824_v3 = vld [vmem:[%s6080_s4 + $0x308] sm:$0xff]   ;;  %v5828_v57 = vadd.f32 %v1320_v9, %v1272_v37 }
 0x13c   :  { %3849 = vmatpush3.bf16.msra.mxu0 %v5805_v1 }
 0x13d   :  { %3651 = vmatpush3.bf16.msra.mxu1 %v5167_v13  ;;  %3850 = vmatprep.subr.bf16.mxu0 %v5824_v3  ;;  %v4086_v13 = vld [vmem:[%s6084_s3 + $0x4] ss:$52 sps:$4 sm:$0xff]  }
 0x13e   :  { %3652 = vmatprep.subr.bf16.mxu1 %v5182_v17  ;;  %v4083_v17 = vld [vmem:[%s6083_s2 + $0x98] ss:$52 sps:$4 sm:$0xff]  }
 0x13f   :  { %2244 = vmatmul.mubr.bf16.gmra.mxu0 %v4078_v5  ;;  %v4104_v5 = vld [vmem:[%s6084_s3 + $0x1c] ss:$52 sps:$4 sm:$0xff]  }
 0x140   :  { %2293 = vmatmul.mubr.bf16.gmra.mxu1 %v4081_v22  ;;  %3851 = vmatpush3.bf16.msra.mxu0 %v5824_v3 }
 0x141   :  { %3653 = vmatpush3.bf16.msra.mxu1 %v5194_v24  ;;  %3852 = vmatprep.subr.bf16.mxu0 %v4935_v63  ;;  %v4089_v24 = vld [vmem:[%s6084_s3 + $0xc] ss:$52 sps:$4 sm:$0xff]  }
 0x142   :  { %3654 = vmatprep.subr.bf16.mxu1 %v5206_v27  ;;  %3854 = vmatprep.mubr.msk.bf16.mxu0 %vm982_vm0, %v4082_v0  ;;  %v6312_v0 = vld [vmem:[#allocation9_spill] sm:$0xff] }
 0x143   :  { %2550 = vmatprep.mubr.bf16.mxu1 %v4086_v13  ;;  %v6313_v13 = vld [vmem:[#allocation4_spill] sm:$0xff] }
 0x144   :  { %3853 = vmatpush3.bf16.msra.mxu0 %v4935_v63  ;;  %v3316_v27 = vpop.f32.mrf.mxu1 }
 0x145   :  { %3655 = vmatpush3.bf16.msra.mxu1 %v5220_v38  ;;  %3676 = vmatprep.subr.bf16.mxu0 %v5127_v8 }
 0x146   :  { %3656 = vmatprep.subr.bf16.mxu1 %v5232_v40  ;;  %v3317_v63 = vpop.f32.mrf.mxu1 }
 0x147   :  { %3855 = vmatmul.mubr.msk.bf16.vlgmr.msra.gmra.mxu0 %vm982_vm0, %v4083_v17  ;;  %v3318_v38 = vadd.f32 %v3317_v63, %v3316_v27  ;;  %v6315_v27 = vld [vmem:[#allocation14_spill] sm:$0xff] }
 0x148   :  { %3677 = vmatpush3.bf16.msra.mxu0 %v5146_v7  ;;  %2599 = vmatprep.mubr.bf16.mxu0 %v4089_v24  ;;  %v3319_v40 = vpop.f32.mrf.mxu1  ;;  %v6314_v24 = vld [vmem:[#allocation11_spill] sm:$0xff] }
 0x149   :  { %3657 = vmatpush3.bf16.msra.mxu1 %v5246_v43  ;;  %3678 = vmatprep.subr.bf16.mxu0 %v5158_v10 }
 0x14a   :  { %3658 = vmatprep.subr.bf16.mxu1 %v5258_v45  ;;  %v3320_v8 = vpop.f32.mrf.mxu1 }
 0x14b   :  { %v3321_v43 = vadd.f32 %v3320_v8, %v3319_v40  ;;  %v4096_v40 = vld [vmem:[%s6084_s3 + $0x10] ss:$52 sps:$4 sm:$0xff]  }
 0x14c   :  { %3679 = vmatpush3.bf16.msra.mxu0 %v5173_v14  ;;  %v3322_v37 = vpop.f32.mrf.mxu1  ;;  %v4084_v14 = vld [vmem:[%s6084_s3] ss:$52 sps:$4 sm:$0xff]  }
 0x14d   :  { %3659 = vmatpush3.bf16.msra.mxu1 %v5270_v47  ;;  %3680 = vmatprep.subr.bf16.mxu0 %v5188_v18 }
 0x14e   :  { %3660 = vmatprep.subr.bf16.mxu1 %v5282_v49  ;;  %v3323_v7 = vpop.f32.mrf.mxu1 }
 0x14f   :  { %v3324_v10 = vadd.f32 %v3323_v7, %v3322_v37  ;;  %v6317_v37 = vld [vmem:[#allocation5_spill] sm:$0xff] }
 0x150   :  { %3681 = vmatpush3.bf16.msra.mxu0 %v5200_v25  ;;  %v3325_v45 = vpop.f32.mrf.mxu1 }
 0x151   :  { %3661 = vmatpush3.bf16.msra.mxu1 %v5294_v51  ;;  %3682 = vmatprep.subr.bf16.mxu0 %v5212_v28  ;;  %v4090_v28 = vld [vmem:[%s6084_s3 + $0x6c] ss:$52 sps:$4 sm:$0xff]   ;;  %v4092_v51 = vld [vmem:[%s6084_s3 + $0x68] ss:$52 sps:$4 sm:$0xff]  }
 0x152   :  { %3662 = vmatprep.subr.bf16.mxu1 %v5306_v53  ;;  %v3326_v18 = vpop.f32.mrf.mxu1 }
 0x153   :  { %v3327_v25 = vadd.f32 %v3326_v18, %v3325_v45  ;;  %v4099_v18 = vld [vmem:[%s6084_s3 + $0x7c] ss:$52 sps:$4 sm:$0xff]  }
 0x154   :  { %3683 = vmatpush3.bf16.msra.mxu0 %v5226_v39  ;;  %v3344_v47 = vpop.f32.mrf.mxu0 }
 0x155   :  { %3663 = vmatpush3.bf16.msra.mxu1 %v5324_v56  ;;  %3684 = vmatprep.subr.bf16.mxu0 %v5238_v41  ;;  %v4098_v56 = vld [vmem:[%s6084_s3 + $0x14] ss:$52 sps:$4 sm:$0xff]  }
 0x156   :  { %3704 = vmatprep.subr.bf16.mxu1 %v5336_v2  ;;  %v3345_v49 = vpop.f32.mrf.mxu0 }
 0x157   :  { %v3346_v39 = vadd.f32 %v3345_v49, %v3344_v47  ;;  %v6320_v47 = vld [vmem:[#allocation6_spill] sm:$0xff]  ;;  %v6321_v49 = vld [vmem:[#allocation17_spill] sm:$0xff] }
 0x158   :  { %2551 = vmatmul.mubr.bf16.vlgmr.msra.gmra.mxu1 %v4084_v14  ;;  %3685 = vmatpush3.bf16.msra.mxu0 %v5252_v44  ;;  %v3347_v41 = vpop.f32.mrf.mxu0  ;;  %v6319_v14 = vld [vmem:[#allocation15_spill] sm:$0xff] }
 0x159   :  { %3705 = vmatpush3.bf16.msra.mxu1 %v5356_v15  ;;  %3686 = vmatprep.subr.bf16.mxu0 %v5264_v46  ;;  %v1580_v53 = vadd.f32 %v3346_v39, %v3318_v38 }
 0x15a   :  { %3706 = vmatprep.subr.bf16.mxu1 %v5368_v21  ;;  %2558 = vmatprep.mubr.bf16.mxu1 %v4090_v28  ;;  %v3348_v44 = vpop.f32.mrf.mxu0  ;;  %v4087_v21 = vld [vmem:[%s6084_s3 + $0x8] ss:$52 sps:$4 sm:$0xff]  }
 0x15b   :  { %v3349_v46 = vadd.f32 %v3348_v44, %v3347_v41  ;;  %v6322_v41 = vld [vmem:[#allocation7_spill] sm:$0xff] }
 0x15c   :  { %3687 = vmatpush3.bf16.msra.mxu0 %v5276_v48  ;;  %v3350_v2 = vpop.f32.mrf.mxu0 }
 0x15d   :  { %3707 = vmatpush3.bf16.msra.mxu1 %v5388_v36  ;;  %3688 = vmatprep.subr.bf16.mxu0 %v5288_v50  ;;  %v1583_v15 = vadd.f32 %v3349_v46, %v3321_v43  ;;  %v6316_v43 = vld [vmem:[#allocation13_spill] sm:$0xff] }
 0x15e   :  { %3708 = vmatprep.subr.bf16.mxu1 %v5400_v60  ;;  %v3351_v48 = vpop.f32.mrf.mxu0  ;;  %v4101_v46 = vld [vmem:[%s6084_s3 + $0x78] ss:$52 sps:$4 sm:$0xff]  }
 0x15f   :  { %v3352_v50 = vadd.f32 %v3351_v48, %v3350_v2  ;;  %v6324_v2 = vld [vmem:[#allocation8_spill] sm:$0xff] }
 0x160   :  { %2559 = vmatmul.mubr.bf16.gmra.mxu1 %v4092_v51  ;;  %3689 = vmatpush3.bf16.msra.mxu0 %v5300_v52  ;;  %v3353_v36 = vpop.f32.mrf.mxu0  ;;  %v6323_v51 = vld [vmem:[#allocation19_spill] sm:$0xff] }
 0x161   :  { %3709 = vmatpush3.bf16.msra.mxu1 %v5418_v34  ;;  %3690 = vmatprep.subr.bf16.mxu0 %v5312_v54  ;;  %v1588_v60 = vadd.f32 %v3352_v50, %v3324_v10  ;;  %v4093_v34 = vld [vmem:[%s6084_s3 + $0x74] ss:$52 sps:$4 sm:$0xff]  }
 0x162   :  { %3710 = vmatprep.subr.bf16.mxu1 %v5430_v35  ;;  %2648 = vmatprep.mubr.bf16.mxu1 %v4098_v56  ;;  %v3354_v52 = vpop.f32.mrf.mxu0  ;;  %v6318_v10 = vld [vmem:[#allocation16_spill] sm:$0xff] }
 0x163   :  { %v3355_v54 = vadd.f32 %v3354_v52, %v3353_v36  ;;  %v6326_v50 = vld [vmem:[#allocation24_spill] sm:$0xff] }
 0x164   :  { %3691 = vmatpush3.bf16.msra.mxu0 %v5330_v58  ;;  %v3372_v35 = vpop.f32.mrf.mxu1 }
 0x165   :  { %3711 = vmatpush3.bf16.msra.mxu1 %v5442_v19  ;;  %3732 = vmatprep.subr.bf16.mxu0 %v5342_v4  ;;  %v1591_v58 = vadd.f32 %v3355_v54, %v3327_v25  ;;  %v6306_v19 = vld [vmem:[#allocation18_spill] sm:$0xff] }
 0x166   :  { %3712 = vmatprep.subr.bf16.mxu1 %v5454_v31  ;;  %v3373_v29 = vpop.f32.mrf.mxu1 }
 0x167   :  { %2600 = vmatmul.mubr.bf16.vlgmr.msra.gmra.mxu0 %v4087_v21  ;;  %v3374_v31 = vadd.f32 %v3373_v29, %v3372_v35  ;;  %v6327_v21 = vld [vmem:[#allocation23_spill] sm:$0xff] }
 0x168   :  { %3733 = vmatpush3.bf16.msra.mxu0 %v6305_v20  ;;  %2607 = vmatprep.mubr.bf16.mxu0 %v4093_v34  ;;  %v3375_v4 = vpop.f32.mrf.mxu1  ;;  %v6328_v34 = vld [vmem:[#allocation26_spill] sm:$0xff]  ;;  %v6329_v35 = vld [vmem:[#allocation27_spill] sm:$0xff] }
 0x169   :  { %3713 = vmatpush3.bf16.msra.mxu1 %v5469_v59  ;;  %3734 = vmatprep.subr.bf16.mxu0 %v6307_v26  ;;  %v1629_v61 = vadd.f32 %v3374_v31, %v1580_v53  ;;  %v6331_v29 = vld [vmem:[#allocation31_spill] sm:$0xff] }
 0x16a   :  { %3714 = vmatprep.subr.bf16.mxu1 %v6306_v19  ;;  %v3376_v59 = vpop.f32.mrf.mxu1  ;;  %v4102_v31 = vld [vmem:[%s6084_s3 + $0x18] ss:$52 sps:$4 sm:$0xff]  }
 0x16b   :  { %v3377_v62 = vadd.f32 %v3376_v59, %v3375_v4  ;;  %v6335_v59 = vld [vmem:[#allocation32_spill] sm:$0xff] }
 0x16c   :  { %3735 = vmatpush3.bf16.msra.mxu0 %v6309_v12  ;;  %v3378_v22 = vpop.f32.mrf.mxu1  ;;  %v6334_v12 = vld [vmem:[#allocation39_spill] sm:$0xff] }
 0x16d   :  { %3715 = vmatpush3.bf16.msra.mxu1 %v6308_v11  ;;  %3736 = vmatprep.subr.bf16.mxu0 %v6311_v30  ;;  %v1632_v9 = vadd.f32 %v3377_v62, %v1583_v15  ;;  %v6325_v15 = vld [vmem:[#allocation21_spill] sm:$0xff] }
 0x16e   :  { %3716 = vmatprep.subr.bf16.mxu1 %v6310_v55  ;;  %v3379_v17 = vpop.f32.mrf.mxu1  ;;  %v4105_v30 = vld [vmem:[%s6084_s3 + $0x84] ss:$52 sps:$4 sm:$0xff]  }
 0x16f   :  { %2608 = vmatmul.mubr.bf16.gmra.mxu0 %v4095_v23  ;;  %v3380_v63 = vadd.f32 %v3379_v17, %v3378_v22  ;;  %v6332_v23 = vld [vmem:[#allocation30_spill] sm:$0xff]  ;;  %v6336_v22 = vld [vmem:[#allocation41_spill] sm:$0xff]  ;;  %v6339_v17 = vld [vmem:[#allocation36_spill] sm:$0xff] }
 0x170   :  { %3737 = vmatpush3.bf16.msra.mxu0 %v6313_v13  ;;  %2697 = vmatprep.mubr.bf16.mxu0 %v4104_v5  ;;  %v3381_v38 = vpop.f32.mrf.mxu1  ;;  %v6338_v13 = vld [vmem:[#allocation43_spill] sm:$0xff] }
 0x171   :  { %3717 = vmatpush3.bf16.msra.mxu1 %v6312_v0  ;;  %3738 = vmatprep.subr.bf16.mxu0 %v6315_v27  ;;  %v1637_v8 = vadd.f32 %v3380_v63, %v1588_v60  ;;  %v4110_v60 = vld [vmem:[%s6084_s3 + $0x24] ss:$52 sps:$4 sm:$0xff]   ;;  %v4107_v63 = vld [vmem:[%s6084_s3 + $0x80] ss:$52 sps:$4 sm:$0xff]  }
 0x172   :  { %3718 = vmatprep.subr.bf16.mxu1 %v6314_v24  ;;  %v3382_v7 = vpop.f32.mrf.mxu1 }
 0x173   :  { %v3383_v45 = vadd.f32 %v3382_v7, %v3381_v38  ;;  %v6343_v7 = vld [vmem:[#allocation25_spill] sm:$0xff] }
 0x174   :  { %3739 = vmatpush3.bf16.msra.mxu0 %v6317_v37  ;;  %v3400_v25 = vpop.f32.mrf.mxu0  ;;  %v6342_v37 = vld [vmem:[#allocation47_spill] sm:$0xff] }
 0x175   :  { %3719 = vmatpush3.bf16.msra.mxu1 %v6316_v43  ;;  %3740 = vmatprep.subr.bf16.mxu0 %v6318_v10  ;;  %v1640_v28 = vadd.f32 %v3383_v45, %v1591_v58  ;;  %v6330_v58 = vld [vmem:[#allocation28_spill] sm:$0xff] }
 0x176   :  { %3760 = vmatprep.subr.bf16.mxu1 %v6319_v14  ;;  %v3401_v39 = vpop.f32.mrf.mxu0  ;;  %v4116_v14 = vld [vmem:[%s6084_s3 + $0x2c] ss:$52 sps:$4 sm:$0xff]  }
 0x177   :  { %v3402_v53 = vadd.f32 %v3401_v39, %v3400_v25  ;;  %v6344_v25 = vld [vmem:[#allocation49_spill] sm:$0xff] }
 0x178   :  { %2649 = vmatmul.mubr.bf16.vlgmr.msra.gmra.mxu1 %v4096_v40  ;;  %3741 = vmatpush3.bf16.msra.mxu0 %v6320_v47  ;;  %v3403_v44 = vpop.f32.mrf.mxu0  ;;  %v6340_v40 = vld [vmem:[#allocation45_spill] sm:$0xff] }
 0x179   :  { %3761 = vmatpush3.bf16.msra.mxu1 %v6321_v49  ;;  %3742 = vmatprep.subr.bf16.mxu0 %v6322_v41  ;;  %v1678_v56 = vadd.f32 %v3402_v53, %v1629_v61  ;;  %v6333_v61 = vld [vmem:[#allocation35_spill] sm:$0xff]  ;;  %v6347_v39 = vld [vmem:[#allocation33_spill] sm:$0xff]  ;;  %v4108_v53 = vld [vmem:[%s6084_s3 + $0x20] ss:$52 sps:$4 sm:$0xff]  }
 0x17a   :  { %3762 = vmatprep.subr.bf16.mxu1 %v6323_v51  ;;  %2656 = vmatprep.mubr.bf16.mxu1 %v4099_v18  ;;  %v3404_v48 = vpop.f32.mrf.mxu0  ;;  %v6346_v49 = vld [vmem:[#allocation51_spill] sm:$0xff] }
 0x17b   :  { %v3405_v36 = vadd.f32 %v3404_v48, %v3403_v44  ;;  %v4111_v48 = vld [vmem:[%s6084_s3 + $0x8c] ss:$52 sps:$4 sm:$0xff]  }
 0x17c   :  { %3743 = vmatpush3.bf16.msra.mxu0 %v6324_v2  ;;  %v3406_v52 = vpop.f32.mrf.mxu0 }
 0x17d   :  { %3763 = vmatpush3.bf16.msra.mxu1 %v6325_v15  ;;  %3744 = vmatprep.subr.bf16.mxu0 %v6326_v50  ;;  %v1681_v54 = vadd.f32 %v3405_v36, %v1632_v9  ;;  %v6337_v9 = vld [vmem:[#allocation34_spill] sm:$0xff]  ;;  %v6350_v15 = vld [vmem:[#allocation40_spill] sm:$0xff] }
 0x17e   :  { %3764 = vmatprep.subr.bf16.mxu1 %v6327_v21  ;;  %v3407_v20 = vpop.f32.mrf.mxu0 }
 0x17f   :  { %v3408_v19 = vadd.f32 %v3407_v20, %v3406_v52  ;;  %v6351_v52 = vld [vmem:[#allocation42_spill] sm:$0xff] }
 0x180   :  { %2657 = vmatmul.mubr.bf16.gmra.mxu1 %v4101_v46  ;;  %3745 = vmatpush3.bf16.msra.mxu0 %v6328_v34  ;;  %v3409_v26 = vpop.f32.mrf.mxu0  ;;  %v6348_v46 = vld [vmem:[#allocation53_spill] sm:$0xff]  ;;  %v6352_v34 = vld [vmem:[#allocation44_spill] sm:$0xff] }
 0x181   :  { %3765 = vmatpush3.bf16.msra.mxu1 %v6329_v35  ;;  %3746 = vmatprep.subr.bf16.mxu0 %v6330_v58  ;;  %v1686_v4 = vadd.f32 %v3408_v19, %v1637_v8  ;;  %v6341_v8 = vld [vmem:[#allocation38_spill] sm:$0xff]  ;;  %v4113_v19 = vld [vmem:[%s6084_s3 + $0x88] ss:$52 sps:$4 sm:$0xff]  }
 0x182   :  { %3766 = vmatprep.subr.bf16.mxu1 %v6331_v29  ;;  %2746 = vmatprep.mubr.bf16.mxu1 %v4110_v60  ;;  %v3410_v11 = vpop.f32.mrf.mxu0 }
 0x183   :  { %v3411_v55 = vadd.f32 %v3410_v11, %v3409_v26  ;;  %v6353_v26 = vld [vmem:[#allocation46_spill] sm:$0xff] }
 0x184   :  { %3747 = vmatpush3.bf16.msra.mxu0 %v6332_v23  ;;  %v3428_v62 = vpop.f32.mrf.mxu1  ;;  %v4117_v11 = vld [vmem:[%s6084_s3 + $0x30] ss:$52 sps:$4 sm:$0xff]  }
 0x185   :  { %3767 = vmatpush3.bf16.msra.mxu1 %v6333_v61  ;;  %3788 = vmatprep.subr.bf16.mxu0 %v6335_v59  ;;  %v1689_v5 = vadd.f32 %v3411_v55, %v1640_v28  ;;  %v6345_v28 = vld [vmem:[#allocation29_spill] sm:$0xff] }
 0x186   :  { %3768 = vmatprep.subr.bf16.mxu1 %v6334_v12  ;;  %v3429_v0 = vpop.f32.mrf.mxu1 }
 0x187   :  { %2698 = vmatmul.mubr.bf16.vlgmr.msra.gmra.mxu0 %v4102_v31  ;;  %v3430_v24 = vadd.f32 %v3429_v0, %v3428_v62 }
 0x188   :  { %3789 = vmatpush3.bf16.msra.mxu0 %v6337_v9  ;;  %2705 = vmatprep.mubr.bf16.mxu0 %v4105_v30  ;;  %v3431_v27 = vpop.f32.mrf.mxu1  ;;  %v6355_v30 = vld [vmem:[#allocation50_spill] sm:$0xff] }
 0x189   :  { %3769 = vmatpush3.bf16.msra.mxu1 %v6336_v22  ;;  %3790 = vmatprep.subr.bf16.mxu0 %v6339_v17  ;;  %v1727_v38 = vadd.f32 %v3430_v24, %v1678_v56  ;;  %v6349_v56 = vld [vmem:[#allocation37_spill] sm:$0xff]  ;;  %v4221_v22 = vld [vmem:[%s6080_s4 + $0x300] sm:$0xff]  }
 0x18a   :  { %3770 = vmatprep.subr.bf16.mxu1 %v6338_v13  ;;  %v3432_v43 = vpop.f32.mrf.mxu1  ;;  %v4114_v17 = vld [vmem:[%s6084_s3 + $0x28] ss:$52 sps:$4 sm:$0xff]  }
 0x18b   :  { %v3433_v10 = vadd.f32 %v3432_v43, %v3431_v27 }
 0x18c   :  { %3791 = vmatpush3.bf16.msra.mxu0 %v6341_v8  ;;  %v3434_v45 = vpop.f32.mrf.mxu1 }
 0x18d   :  { %3771 = vmatpush3.bf16.msra.mxu1 %v6340_v40  ;;  %3792 = vmatprep.subr.bf16.mxu0 %v6343_v7  ;;  %v1730_v18 = vadd.f32 %v3433_v10, %v1681_v54 }
 0x18e   :  { %3772 = vmatprep.subr.bf16.mxu1 %v6342_v37  ;;  %v3435_v47 = vpop.f32.mrf.mxu1 }
 0x18f   :  { %2706 = vmatmul.mubr.bf16.gmra.mxu0 %v4107_v63  ;;  %v3436_v41 = vadd.f32 %v3435_v47, %v3434_v45  ;;  %v4119_v63 = vld [vmem:[%s6084_s3 + $0x94] ss:$52 sps:$4 sm:$0xff]  }
 0x190   :  { %3793 = vmatpush3.bf16.msra.mxu0 %v6345_v28  ;;  %2795 = vmatprep.mubr.bf16.mxu0 %v4116_v14  ;;  %v3437_v51 = vpop.f32.mrf.mxu1 }
 0x191   :  { %3773 = vmatpush3.bf16.msra.mxu1 %v6344_v25  ;;  %3794 = vmatprep.subr.bf16.mxu0 %v6347_v39  ;;  %v1735_v44 = vadd.f32 %v3436_v41, %v1686_v4  ;;  %v6354_v4 = vld [vmem:[#allocation48_spill] sm:$0xff] }
 0x192   :  { %3774 = vmatprep.subr.bf16.mxu1 %v6346_v49  ;;  %v3438_v2 = vpop.f32.mrf.mxu1 }
 0x193   :  { %v3439_v50 = vadd.f32 %v3438_v2, %v3437_v51 }
 0x194   :  { %3795 = vmatpush3.bf16.msra.mxu0 %v6349_v56  ;;  %v3456_v21 = vpop.f32.mrf.mxu0  ;;  %v3844_v36 = vpop.f32.mrf.mxu1 }
 0x195   :  { %3775 = vmatpush3.bf16.msra.mxu1 %v6348_v46  ;;  %3796 = vmatprep.subr.bf16.mxu0 %v6350_v15  ;;  %v1738_v60 = vadd.f32 %v3439_v50, %v1689_v5  ;;  %v6356_v5 = vld [vmem:[#allocation52_spill] sm:$0xff] }
 0x196   :  { %3858 = vmatprep.subr.bf16.mxu1 %v5798_v33  ;;  %v3457_v54 = vpop.f32.mrf.mxu0  ;;  %v1824_v35 = vpop.f32.mrf.mxu1 }
 0x197   :  { %v3458_v20 = vadd.f32 %v3457_v54, %v3456_v21 }
 0x198   :  { %2747 = vmatmul.mubr.bf16.vlgmr.msra.gmra.mxu1 %v4108_v53  ;;  %3797 = vmatpush3.bf16.msra.mxu0 %v6351_v52  ;;  %v3459_v58 = vpop.f32.mrf.mxu0  ;;  %v3845_v29 = vpop.f32.mrf.mxu1 }
 0x199   :  { %3859 = vmatpush3.bf16.msra.mxu1 %v5798_v33  ;;  %3798 = vmatprep.subr.bf16.mxu0 %v6352_v34  ;;  %v1776_v31 = vadd.f32 %v3458_v20, %v1727_v38 }
 0x19a   :  { %2754 = vmatprep.mubr.bf16.mxu1 %v4111_v48  ;;  %3860 = vmatprep.subr.bf16.mxu1 %v5805_v1  ;;  %v3460_v33 = vpop.f32.mrf.mxu0  ;;  %v1827_v59 = vpop.f32.mrf.mxu1 }
 0x19b   :  { %v3461_v23 = vadd.f32 %v3460_v33, %v3459_v58  ;;  %v5997_v61 = vadd.f32 %v1824_v35, %v1776_v31 }
 0x19c   :  { %3799 = vmatpush3.bf16.msra.mxu0 %v6353_v26  ;;  %v3462_v12 = vpop.f32.mrf.mxu0 }
 0x19d   :  { %3861 = vmatpush3.bf16.msra.mxu1 %v5805_v1  ;;  %3800 = vmatprep.subr.bf16.mxu0 %v6354_v4  ;;  %v1839_v55 = vmax.f32 %v5809_v16, %v5997_v61  ;;  %v1779_v1 = vadd.f32 %v3461_v23, %v1730_v18 }
 0x19e   :  { %3862 = vmatprep.subr.bf16.mxu1 %v5824_v3  ;;  %v3463_v62 = vpop.f32.mrf.mxu0 }
 0x19f   :  { %v3464_v9 = vadd.f32 %v3463_v62, %v3462_v12  ;;  %v6010_v0 = vadd.f32 %v1827_v59, %v1779_v1 }
 0x1a0   :  { %2755 = vmatmul.mubr.bf16.gmra.mxu1 %v4113_v19  ;;  %3801 = vmatpush3.bf16.msra.mxu0 %v6355_v30  ;;  %v3465_v13 = vpop.f32.mrf.mxu0 }
 0x1a1   :  { %3863 = vmatpush3.bf16.msra.mxu1 %v5824_v3  ;;  %3802 = vmatprep.subr.bf16.mxu0 %v6356_v5  ;;  %v4118_v3 = vld [vmem:[%s6084_s3 + $0x98] ss:$52 sps:$4 sm:$0xff]   ;;  %v1784_v24 = vadd.f32 %v3464_v9, %v1735_v44  ;;  %v1840_v27 = vmax.f32 %v5828_v57, %v6010_v0 }
 0x1a2   :  { %3864 = vmatprep.subr.bf16.mxu1 %v4221_v22  ;;  %3866 = vmatprep.mubr.msk.bf16.mxu1 %vm982_vm0, %v4117_v11  ;;  %v3466_v38 = vpop.f32.mrf.mxu0 }
 0x1a3   :  { %v6025_v40 = vadd.f32 %v3844_v36, %v1784_v24  ;;  %v3467_v8 = vadd.f32 %v3466_v38, %v3465_v13 }
 0x1a4   :  { %3803 = vmatpush3.bf16.msra.mxu0 %v5781_v6  ;;  %v4121_v6 = vld [vmem:[%s6084_s3 + $0x90] ss:$52 sps:$4 sm:$0xff]  }
 0x1a5   :  { %3865 = vmatpush3.bf16.msra.mxu1 %v4221_v22  ;;  %v1787_v43 = vadd.f32 %v3467_v8, %v1738_v60  ;;  %v1841_v37 = vmax.f32 %v5793_v42, %v6025_v40 }
 0x1a7   :  { %2796 = vmatmul.mubr.bf16.vlgmr.msra.gmra.mxu0 %v4114_v17  ;;  %v6030_v7 = vadd.f32 %v3845_v29, %v1787_v43 }
 0x1a8   :  { %3867 = vmatmul.mubr.msk.bf16.vlgmr.msra.gmra.mxu1 %vm982_vm0, %v4118_v3  ;;  %2803 = vmatprep.mubr.bf16.mxu0 %v4119_v63 }
 0x1a9   :  { %v1842_v10 = vmax.f32 %v5817_v32, %v6030_v7 }
 0x1af   :  { %2804 = vmatmul.mubr.bf16.gmra.mxu0 %v4121_v6 }
 0x1b4   :  { %v3490_v14 = vpop.f32.mrf.mxu0  ;;  %v3518_v45 = vpop.f32.mrf.mxu1 }
 0x1b6   :  { %v3491_v18 = vpop.f32.mrf.mxu0  ;;  %v3519_v25 = vpop.f32.mrf.mxu1 }
 0x1b7   :  { %v3492_v28 = vadd.f32 %v3491_v18, %v3490_v14  ;;  %v3520_v47 = vadd.f32 %v3519_v25, %v3518_v45 }
 0x1b8   :  { %v3493_v49 = vpop.f32.mrf.mxu0  ;;  %v3521_v39 = vpop.f32.mrf.mxu1 }
 0x1b9   :  { %v2091_v41 = vadd.f32 %v3520_v47, %v3492_v28 }
 0x1ba   :  { %v3494_v51 = vpop.f32.mrf.mxu0  ;;  %v3522_v53 = vpop.f32.mrf.mxu1 }
 0x1bb   :  { %v3495_v44 = vadd.f32 %v3494_v51, %v3493_v49  ;;  %v3523_v46 = vadd.f32 %v3522_v53, %v3521_v39 }
 0x1bc   :  { %v3496_v56 = vpop.f32.mrf.mxu0  ;;  %v3524_v2 = vpop.f32.mrf.mxu1 }
 0x1bd   :  { %v2094_v15 = vadd.f32 %v3523_v46, %v3495_v44 }
 0x1be   :  { %v3497_v48 = vpop.f32.mrf.mxu0  ;;  %v3525_v50 = vpop.f32.mrf.mxu1 }
 0x1bf   :  { %v3498_v21 = vadd.f32 %v3497_v48, %v3496_v56  ;;  %v3526_v36 = vadd.f32 %v3525_v50, %v3524_v2 }
 0x1c0   :  { %v3499_v60 = vpop.f32.mrf.mxu0  ;;  %v3527_v52 = vpop.f32.mrf.mxu1 }
 0x1c1   :  { %v2099_v54 = vadd.f32 %v3526_v36, %v3498_v21 }
 0x1c2   :  { %v3500_v34 = vpop.f32.mrf.mxu0  ;;  %v3528_v35 = vpop.f32.mrf.mxu1 }
 0x1c3   :  { %v3501_v20 = vadd.f32 %v3500_v34, %v3499_v60  ;;  %v3529_v58 = vadd.f32 %v3528_v35, %v3527_v52 }
 0x1c5   :  { %v2102_v29 = vadd.f32 %v3529_v58, %v3501_v20 }
 0x1d7   :  { %v3546_v19 = vpop.f32.mrf.mxu0 }
 0x1d8   :  { %v3574_v26 = vpop.f32.mrf.mxu1 }
 0x1d9   :  { %v3547_v31 = vpop.f32.mrf.mxu0 }
 0x1da   :  { %v3575_v33 = vpop.f32.mrf.mxu1  ;;  %v3548_v4 = vadd.f32 %v3547_v31, %v3546_v19 }
 0x1db   :  { %v3576_v23 = vadd.f32 %v3575_v33, %v3574_v26  ;;  %v3549_v11 = vpop.f32.mrf.mxu0 }
 0x1dc   :  { %v3577_v12 = vpop.f32.mrf.mxu1  ;;  %v2140_v59 = vadd.f32 %v3548_v4, %v2091_v41 }
 0x1dd   :  { %v3550_v30 = vpop.f32.mrf.mxu0 }
 0x1de   :  { %v3578_v1 = vpop.f32.mrf.mxu1  ;;  %v2189_v62 = vadd.f32 %v3576_v23, %v2140_v59  ;;  %v3551_v5 = vadd.f32 %v3550_v30, %v3549_v11 }
 0x1df   :  { %v3579_v22 = vadd.f32 %v3578_v1, %v3577_v12  ;;  %v3552_v9 = vpop.f32.mrf.mxu0 }
 0x1e0   :  { %v3580_v13 = vpop.f32.mrf.mxu1  ;;  %v2143_v17 = vadd.f32 %v3551_v5, %v2094_v15 }
 0x1e1   :  { %v3553_v3 = vpop.f32.mrf.mxu0 }
 0x1e2   :  { %v3581_v24 = vpop.f32.mrf.mxu1  ;;  %v2192_v63 = vadd.f32 %v3579_v22, %v2143_v17  ;;  %v3554_v38 = vadd.f32 %v3553_v3, %v3552_v9 }
 0x1e3   :  { %v3582_v8 = vadd.f32 %v3581_v24, %v3580_v13  ;;  %v3555_v43 = vpop.f32.mrf.mxu0 }
 0x1e4   :  { %v3583_v6 = vpop.f32.mrf.mxu1  ;;  %v2148_v14 = vadd.f32 %v3554_v38, %v2099_v54 }
 0x1e5   :  { %v3556_v45 = vpop.f32.mrf.mxu0 }
 0x1e6   :  { %v3584_v18 = vpop.f32.mrf.mxu1  ;;  %v2197_v25 = vadd.f32 %v3582_v8, %v2148_v14  ;;  %v3557_v28 = vadd.f32 %v3556_v45, %v3555_v43 }
 0x1e7   :  { %v3585_v47 = vadd.f32 %v3584_v18, %v3583_v6 }
 0x1e8   :  { %v2151_v49 = vadd.f32 %v3557_v28, %v2102_v29 }
 0x1ea   :  { %v2200_v39 = vadd.f32 %v3585_v47, %v2151_v49 }
 0x1f7   :  { %v3602_v41 = vpop.f32.mrf.mxu0 }
 0x1f8   :  { %v3630_v51 = vpop.f32.mrf.mxu1 }
 0x1f9   :  { %v3603_v53 = vpop.f32.mrf.mxu0 }
 0x1fa   :  { %v3631_v44 = vpop.f32.mrf.mxu1  ;;  %v3604_v21 = vadd.f32 %v3603_v53, %v3602_v41 }
 0x1fb   :  { %v3605_v46 = vpop.f32.mrf.mxu0  ;;  %v3632_v58 = vadd.f32 %v3631_v44, %v3630_v51 }
 0x1fc   :  { %v3633_v56 = vpop.f32.mrf.mxu1  ;;  %v2238_v20 = vadd.f32 %v3604_v21, %v2189_v62 }
 0x1fd   :  { %v3606_v2 = vpop.f32.mrf.mxu0 }
 0x1fe   :  { %v3634_v15 = vpop.f32.mrf.mxu1  ;;  %v3607_v29 = vadd.f32 %v3606_v2, %v3605_v46  ;;  %v2287_v5 = vadd.f32 %v3632_v58, %v2238_v20 }
 0x1ff   :  { %v3608_v48 = vpop.f32.mrf.mxu0  ;;  %v3635_v11 = vadd.f32 %v3634_v15, %v3633_v56 }
 0x200   :  { %v3636_v50 = vpop.f32.mrf.mxu1  ;;  %v2241_v59 = vadd.f32 %v3607_v29, %v2192_v63 }
 0x201   :  { %v3609_v36 = vpop.f32.mrf.mxu0 }
 0x202   :  { %v3637_v60 = vpop.f32.mrf.mxu1  ;;  %v3610_v52 = vadd.f32 %v3609_v36, %v3608_v48  ;;  %v2290_v38 = vadd.f32 %v3635_v11, %v2241_v59 }
 0x203   :  { %v3638_v54 = vadd.f32 %v3637_v60, %v3636_v50  ;;  %v3611_v34 = vpop.f32.mrf.mxu0 }
 0x204   :  { %v3639_v35 = vpop.f32.mrf.mxu1  ;;  %v2246_v19 = vadd.f32 %v3610_v52, %v2197_v25 }
 0x205   :  { %v3612_v26 = vpop.f32.mrf.mxu0 }
 0x206   :  { %v3640_v31 = vpop.f32.mrf.mxu1  ;;  %v3613_v33 = vadd.f32 %v3612_v26, %v3611_v34  ;;  %v2295_v23 = vadd.f32 %v3638_v54, %v2246_v19 }
 0x207   :  { %v3641_v4 = vadd.f32 %v3640_v31, %v3639_v35  ;;  %v3856_v12 = vpop.f32.mrf.mxu0 }
 0x208   :  { %v2249_v30 = vadd.f32 %v3613_v33, %v2200_v39  ;;  %v2344_v1 = vadd.f32 %v3856_v12, %v2295_v23 }
 0x209   :  { %v2335_v22 = vpop.f32.mrf.mxu0 }
 0x20a   :  { %v6040_v9 = vmax.f32 %v1841_v37, %v2344_v1  ;;  %v2336_v62 = vadd.f32 %v2335_v22, %v2287_v5  ;;  %v2298_v13 = vadd.f32 %v3641_v4, %v2249_v30 }
 0x20b   :  { %v3857_v17 = vpop.f32.mrf.mxu0 }
 0x20c   :  { %v6045_v3 = vmax.f32 %v1839_v55, %v2336_v62  ;;  %v2347_v24 = vadd.f32 %v3857_v17, %v2298_v13 }
 0x20d   :  { %v2338_v63 = vpop.f32.mrf.mxu0 }
 0x20e   :  { %v6050_v8 = vmax.f32 %v1842_v10, %v2347_v24  ;;  %v2339_v43 = vadd.f32 %v2338_v63, %v2290_v38 }
 0x210   :  { %v6055_v42 = vmax.f32 %v1840_v27, %v2339_v43 }
 0x218   :  { %v3664_v40 = vpop.f32.mrf.mxu1 }
 0x21a   :  { %v3665_v37 = vpop.f32.mrf.mxu1 }
 0x21b   :  { %v3666_v58 = vadd.f32 %v3665_v37, %v3664_v40 }
 0x21c   :  { %v3667_v6 = vpop.f32.mrf.mxu1 }
 0x21e   :  { %v3668_v16 = vpop.f32.mrf.mxu1 }
 0x21f   :  { %v3669_v11 = vadd.f32 %v3668_v16, %v3667_v6 }
 0x220   :  { %v3670_v61 = vpop.f32.mrf.mxu1 }
 0x222   :  { %v3671_v14 = vpop.f32.mrf.mxu1 }
 0x223   :  { %v3672_v1 = vadd.f32 %v3671_v14, %v3670_v61 }
 0x224   :  { %v3673_v18 = vpop.f32.mrf.mxu1 }
 0x226   :  { %v3674_v28 = vpop.f32.mrf.mxu1 }
 0x227   :  { %v3692_v55 = vpop.f32.mrf.mxu0 }
 0x229   :  { %v3693_v45 = vpop.f32.mrf.mxu0 }
 0x22a   :  { %v3694_v34 = vadd.f32 %v3693_v45, %v3692_v55 }
 0x22b   :  { %v3695_v25 = vpop.f32.mrf.mxu0 }
 0x22c   :  { %v2602_v26 = vadd.f32 %v3694_v34, %v3666_v58 }
 0x22d   :  { %v3696_v32 = vpop.f32.mrf.mxu0 }
 0x22e   :  { %v3697_v31 = vadd.f32 %v3696_v32, %v3695_v25  ;;  %v3675_v25 = vadd.f32 %v3674_v28, %v3673_v18  ;;  %v3117_v18 = vld [vmem:[%s6085_s5] ss:$0 sm:$0xff] }
 0x22f   :  { %v3698_v10 = vpop.f32.mrf.mxu0 }
 0x230   :  { %v2605_v13 = vadd.f32 %v3697_v31, %v3669_v11 }
 0x231   :  { %v3699_v49 = vpop.f32.mrf.mxu0 }
 0x232   :  { %v3700_v5 = vadd.f32 %v3699_v49, %v3698_v10 }
 0x233   :  { %v3701_v57 = vpop.f32.mrf.mxu0 }
 0x234   :  { %v2610_v32 = vadd.f32 %v3700_v5, %v3672_v1 }
 0x235   :  { %v3702_v27 = vpop.f32.mrf.mxu0 }
 0x236   :  { %v3703_v6 = vadd.f32 %v3702_v27, %v3701_v57 }
 0x238   :  { %v3720_v7 = vpop.f32.mrf.mxu1 }
 0x23a   :  { %v3721_v47 = vpop.f32.mrf.mxu1 }
 0x23b   :  { %v3722_v29 = vadd.f32 %v3721_v47, %v3720_v7 }
 0x23c   :  { %v3723_v39 = vpop.f32.mrf.mxu1 }
 0x23d   :  { %v2651_v12 = vadd.f32 %v3722_v29, %v2602_v26 }
 0x23e   :  { %v3724_v0 = vpop.f32.mrf.mxu1 }
 0x23f   :  { %v3725_v59 = vadd.f32 %v3724_v0, %v3723_v39 }
 0x240   :  { %v3726_v41 = vpop.f32.mrf.mxu1 }
 0x241   :  { %v2654_v40 = vadd.f32 %v3725_v59, %v2605_v13 }
 0x242   :  { %v3727_v53 = vpop.f32.mrf.mxu1 }
 0x243   :  { %v3728_v38 = vadd.f32 %v3727_v53, %v3726_v41 }
 0x244   :  { %v3729_v46 = vpop.f32.mrf.mxu1 }
 0x245   :  { %v2659_v10 = vadd.f32 %v3728_v38, %v2610_v32 }
 0x246   :  { %v3730_v2 = vpop.f32.mrf.mxu1 }
 0x247   :  { %v3748_v51 = vpop.f32.mrf.mxu0  ;;  %v3731_v49 = vadd.f32 %v3730_v2, %v3729_v46 }
 0x249   :  { %v3749_v44 = vpop.f32.mrf.mxu0 }
 0x24a   :  { %v3750_v33 = vadd.f32 %v3749_v44, %v3748_v51  ;;  %v2613_v44 = vadd.f32 %v3703_v6, %v3675_v25 }
 0x24b   :  { %v3751_v56 = vpop.f32.mrf.mxu0 }
 0x24c   :  { %v2700_v17 = vadd.f32 %v3750_v33, %v2651_v12 }
 0x24d   :  { %v3752_v15 = vpop.f32.mrf.mxu0 }
 0x24e   :  { %v3753_v24 = vadd.f32 %v3752_v15, %v3751_v56 }
 0x24f   :  { %v3754_v50 = vpop.f32.mrf.mxu0 }
 0x250   :  { %v2703_v47 = vadd.f32 %v3753_v24, %v2654_v40 }
 0x251   :  { %v3755_v60 = vpop.f32.mrf.mxu0 }
 0x252   :  { %v3756_v61 = vadd.f32 %v3755_v60, %v3754_v50  ;;  %v2662_v50 = vadd.f32 %v3731_v49, %v2613_v44 }
 0x253   :  { %v3757_v35 = vpop.f32.mrf.mxu0 }
 0x254   :  { %v2708_v27 = vadd.f32 %v3756_v61, %v2659_v10 }
 0x255   :  { %v3758_v4 = vpop.f32.mrf.mxu0 }
 0x256   :  { %v3759_v56 = vadd.f32 %v3758_v4, %v3757_v35 }
 0x258   :  { %v3776_v48 = vpop.f32.mrf.mxu1 }
 0x25a   :  { %v3777_v21 = vpop.f32.mrf.mxu1 }
 0x25b   :  { %v3778_v30 = vadd.f32 %v3777_v21, %v3776_v48 }
 0x25c   :  { %v3779_v36 = vpop.f32.mrf.mxu1 }
 0x25d   :  { %v2749_v37 = vadd.f32 %v3778_v30, %v2700_v17 }
 0x25e   :  { %v3780_v52 = vpop.f32.mrf.mxu1 }
 0x25f   :  { %v3781_v55 = vadd.f32 %v3780_v52, %v3779_v36 }
 0x260   :  { %v3782_v54 = vpop.f32.mrf.mxu1 }
 0x261   :  { %v2752_v0 = vadd.f32 %v3781_v55, %v2703_v47 }
 0x262   :  { %v3783_v20 = vpop.f32.mrf.mxu1 }
 0x263   :  { %v3784_v51 = vadd.f32 %v3783_v20, %v3782_v54  ;;  %v2711_v54 = vadd.f32 %v3759_v56, %v2662_v50 }
 0x264   :  { %v3785_v19 = vpop.f32.mrf.mxu1 }
 0x265   :  { %v2757_v2 = vadd.f32 %v3784_v51, %v2708_v27 }
 0x266   :  { %v3786_v23 = vpop.f32.mrf.mxu1 }
 0x267   :  { %v3804_v22 = vpop.f32.mrf.mxu0  ;;  %v3787_v21 = vadd.f32 %v3786_v23, %v3785_v19 }
 0x268   :  { %v3868_v62 = vpop.f32.mrf.mxu1 }
 0x269   :  { %v3805_v63 = vpop.f32.mrf.mxu0  ;;  %v2760_v29 = vadd.f32 %v3787_v21, %v2711_v54 }
 0x26a   :  { %v2846_v43 = vpop.f32.mrf.mxu1  ;;  %v3806_v45 = vadd.f32 %v3805_v63, %v3804_v22 }
 0x26b   :  { %v3807_v16 = vpop.f32.mrf.mxu0 }
 0x26c   :  { %v3869_v7 = vpop.f32.mrf.mxu1  ;;  %v2798_v14 = vadd.f32 %v3806_v45, %v2749_v37 }
 0x26d   :  { %v3808_v39 = vpop.f32.mrf.mxu0 }
 0x26e   :  { %v3809_v41 = vadd.f32 %v3808_v39, %v3807_v16  ;;  %v2847_v53 = vadd.f32 %v2846_v43, %v2798_v14  ;;  %v2849_v57 = vpop.f32.mrf.mxu1 }
 0x26f   :  { %v3810_v28 = vpop.f32.mrf.mxu0 }
 0x270   :  { %v2861_v15 = vmax.f32 %v6045_v3, %v2847_v53  ;;  %v2801_v48 = vadd.f32 %v3809_v41, %v2752_v0 }
 0x271   :  { %v3811_v46 = vpop.f32.mrf.mxu0 }
 0x272   :  { %v2872_v36 = vadd.f32 %v3117_v18, %v2861_v15  ;;  %v3812_v60 = vadd.f32 %v3811_v46, %v3810_v28  ;;  %v2850_v52 = vadd.f32 %v2849_v57, %v2801_v48 }
 0x273   :  { %v3813_v34 = vpop.f32.mrf.mxu0 }
 0x274   :  { %v2876_v35 = vmax.f32 %v2872_v36, 0.0  ;;  %v2806_v20 = vadd.f32 %v3812_v60, %v2757_v2  ;;  %v2862_v58 = vmax.f32 %v6055_v42, %v2850_v52 }
 0x275   :  { %v3814_v26 = vpop.f32.mrf.mxu0 }
 0x276   :  { %v3122_v31 = vpack.c.bf16 %v2876_v35, %v2876_v35  ;;  %v2855_v33 = vadd.f32 %v3868_v62, %v2806_v20  ;;  %v2873_v3 = vadd.f32 %v3117_v18, %v2862_v58  ;;  %v3815_v4 = vadd.f32 %v3814_v26, %v3813_v34 }
 0x278   :  { %2897 = vst.msk [vmem:[%s6086_s6] sm:$0xf] %vm2896_vm1, %v3122_v31  ;;  %v2863_v19 = vmax.f32 %v6040_v9, %v2855_v33  ;;  %v2877_v23 = vmax.f32 %v2873_v3, 0.0  ;;  %v2809_v11 = vadd.f32 %v3815_v4, %v2760_v29 }
 0x27a   :  { %v2874_v12 = vadd.f32 %v3117_v18, %v2863_v19  ;;  %v3123_v59 = vpack.c.bf16 %v2877_v23, %v2877_v23  ;;  %v2858_v30 = vadd.f32 %v3869_v7, %v2809_v11 }
 0x27c   :  { %v2878_v42 = vmax.f32 %v2874_v12, 0.0  ;;  %2898 = vst.msk [vmem:[%s6086_s6 + $0x4] sm:$0xf] %vm2896_vm1, %v3123_v59  ;;  %v2864_v1 = vmax.f32 %v6050_v8, %v2858_v30 }
 0x27e   :  { %v3124_v5 = vpack.c.bf16 %v2878_v42, %v2878_v42  ;;  %v2875_v22 = vadd.f32 %v3117_v18, %v2864_v1 }
 0x280   :  { %2899 = vst.msk [vmem:[%s6086_s6 + $0x8] sm:$0xf] %vm2896_vm1, %v3124_v5  ;;  %v2879_v9 = vmax.f32 %v2875_v22, 0.0 }
 0x282   :  { %v3125_v62 = vpack.c.bf16 %v2879_v9, %v2879_v9 }
 0x284   :  { %2900 = vst.msk [vmem:[%s6086_s6 + $0xc] sm:$0xf] %vm2896_vm1, %v3125_v62 }

// kernel: _forward.5
= control target key start
LH: loop header
LB: loop body
LE: loop exit
PB: predicated region body
PF: predicated region fallthrough
CT: control target
= control target key end

     0   :  { %vm669_vm0 = vcmask 261120   ;;  %vm1632_vm1 = vmmov 0   ;;  %s2142_s1 = inlined_call_operand.vmem [shape: bf16[800,256], index: 1, kind: input, shape index: {}]   ;;  %s2143_s0 = inlined_call_operand.vmem [shape: bf16[8,800], index: 0, kind: input, shape index: {}]   ;;  %s2144_s4 = inlined_call_operand.vmem [shape: bf16[128,128], index: 4, kind: input, shape index: {}]   ;;  %s2145_s9 = inlined_call_operand.vmem [shape: bf16[128,128], index: 9, kind: input, shape index: {}]   ;;  %s2146_s7 = inlined_call_operand.vmem [shape: bf16[128,128], index: 7, kind: input, shape index: {}]   ;;  %s2147_s2 = inlined_call_operand.vmem [shape: f32[1,256], index: 2, kind: input, shape index: {}]   ;;  %s2148_s3 = inlined_call_operand.vmem [shape: f32[1,256], index: 3, kind: input, shape index: {}]   ;;  %s2149_s5 = inlined_call_operand.vmem [shape: f32[1,128], index: 5, kind: input, shape index: {}]   ;;  %s2150_s6 = inlined_call_operand.vmem [shape: f32[1,128], index: 6, kind: input, shape index: {}]   ;;  %s2151_s10 = inlined_call_operand.vmem [shape: f32[1,128], index: 10, kind: input, shape index: {}]   ;;  %s2152_s12 = inlined_call_operand.vmem [shape: f32[8,128], index: 12, kind: output, shape index: {1}]   ;;  %s2153_s8 = inlined_call_operand.vmem [shape: f32[1,128], index: 8, kind: input, shape index: {}]   ;;  %s2154_s11 = inlined_call_operand.vmem [shape: f32[8,128], index: 11, kind: output, shape index: {0}]  }
   0x1   :  { %v1449_v0 = vld [vmem:[%s2142_s1 + $0x74] ss:$8 sps:$4 sm:$0xff]   ;;  %v1453_v2 = vld [vmem:[%s2142_s1 + $0x70] ss:$8 sps:$4 sm:$0xff]   ;;  %v1455_v4 = vld [vmem:[%s2142_s1 + $0x64] ss:$8 sps:$4 sm:$0xff]  }
   0x2   :  { %v1451_v1 = vld [vmem:[%s2142_s1 + $0x174] ss:$8 sps:$4 sm:$0xff]   ;;  %673 = vmatprep.subr.bf16.mxu0 %v1449_v0  ;;  %v1454_v3 = vld [vmem:[%s2142_s1 + $0x170] ss:$8 sps:$4 sm:$0xff]   ;;  %v1457_v5 = vld [vmem:[%s2142_s1 + $0x164] ss:$8 sps:$4 sm:$0xff]  }
   0x3   :  { %714 = vmatprep.subr.bf16.mxu1 %v1451_v1  ;;  %674 = vmatpush1.bf16.msra.mxu0 %v1453_v2  ;;  %v1459_v6 = vld [vmem:[%s2142_s1 + $0x60] ss:$8 sps:$4 sm:$0xff]   ;;  %v1461_v8 = vld [vmem:[%s2142_s1 + $0x54] ss:$8 sps:$4 sm:$0xff]   ;;  %v1465_v10 = vld [vmem:[%s2142_s1 + $0x50] ss:$8 sps:$4 sm:$0xff]  }
   0x4   :  { %715 = vmatpush1.bf16.msra.mxu1 %v1454_v3  ;;  %675 = vmatprep.subr.bf16.mxu0 %v1455_v4  ;;  %v1460_v7 = vld [vmem:[%s2142_s1 + $0x160] ss:$8 sps:$4 sm:$0xff]   ;;  %v1463_v9 = vld [vmem:[%s2142_s1 + $0x154] ss:$8 sps:$4 sm:$0xff]   ;;  %v1466_v11 = vld [vmem:[%s2142_s1 + $0x150] ss:$8 sps:$4 sm:$0xff]  }
   0x5   :  { %716 = vmatprep.subr.bf16.mxu1 %v1457_v5  ;;  %v1467_v12 = vld [vmem:[%s2142_s1 + $0x44] ss:$8 sps:$4 sm:$0xff]   ;;  %v1471_v14 = vld [vmem:[%s2142_s1 + $0x40] ss:$8 sps:$4 sm:$0xff]   ;;  %v1473_v16 = vld [vmem:[%s2142_s1 + $0x34] ss:$8 sps:$4 sm:$0xff]  }
   0x6   :  { %v1469_v13 = vld [vmem:[%s2142_s1 + $0x144] ss:$8 sps:$4 sm:$0xff]   ;;  %v1472_v15 = vld [vmem:[%s2142_s1 + $0x140] ss:$8 sps:$4 sm:$0xff]   ;;  %v1475_v17 = vld [vmem:[%s2142_s1 + $0x134] ss:$8 sps:$4 sm:$0xff]  }
   0x7   :  { %676 = vmatpush1.bf16.msra.mxu0 %v1459_v6  ;;  %v1477_v18 = vld [vmem:[%s2142_s1 + $0x30] ss:$8 sps:$4 sm:$0xff]   ;;  %v1479_v20 = vld [vmem:[%s2142_s1 + $0x24] ss:$8 sps:$4 sm:$0xff]   ;;  %v1483_v22 = vld [vmem:[%s2142_s1 + $0x20] ss:$8 sps:$4 sm:$0xff]  }
   0x8   :  { %717 = vmatpush1.bf16.msra.mxu1 %v1460_v7  ;;  %677 = vmatprep.subr.bf16.mxu0 %v1461_v8  ;;  %v1478_v19 = vld [vmem:[%s2142_s1 + $0x130] ss:$8 sps:$4 sm:$0xff]   ;;  %v1481_v21 = vld [vmem:[%s2142_s1 + $0x124] ss:$8 sps:$4 sm:$0xff]   ;;  %v1484_v23 = vld [vmem:[%s2142_s1 + $0x120] ss:$8 sps:$4 sm:$0xff]  }
   0x9   :  { %718 = vmatprep.subr.bf16.mxu1 %v1463_v9  ;;  %v1485_v24 = vld [vmem:[%s2142_s1 + $0x14] ss:$8 sps:$4 sm:$0xff]   ;;  %v1489_v26 = vld [vmem:[%s2142_s1 + $0x10] ss:$8 sps:$4 sm:$0xff]   ;;  %v1491_v28 = vld [vmem:[%s2142_s1 + $0x4] ss:$8 sps:$4 sm:$0xff]  }
   0xa   :  { %v1487_v25 = vld [vmem:[%s2142_s1 + $0x114] ss:$8 sps:$4 sm:$0xff]   ;;  %v1490_v27 = vld [vmem:[%s2142_s1 + $0x110] ss:$8 sps:$4 sm:$0xff]   ;;  %v1493_v29 = vld [vmem:[%s2142_s1 + $0x104] ss:$8 sps:$4 sm:$0xff]  }
   0xb   :  { %678 = vmatpush1.bf16.msra.mxu0 %v1465_v10  ;;  %v1495_v30 = vld [vmem:[%s2142_s1] ss:$8 sps:$4 sm:$0xff]   ;;  %v1497_v32 = vld [vmem:[%s2142_s1 + $0xf4] ss:$8 sps:$4 sm:$0xff]   ;;  %v1501_v34 = vld [vmem:[%s2142_s1 + $0xf0] ss:$8 sps:$4 sm:$0xff]  }
   0xc   :  { %719 = vmatpush1.bf16.msra.mxu1 %v1466_v11  ;;  %679 = vmatprep.subr.bf16.mxu0 %v1467_v12  ;;  %v1496_v31 = vld [vmem:[%s2142_s1 + $0x100] ss:$8 sps:$4 sm:$0xff]   ;;  %v1499_v33 = vld [vmem:[%s2142_s1 + $0x1f4] ss:$8 sps:$4 sm:$0xff]   ;;  %v1502_v35 = vld [vmem:[%s2142_s1 + $0x1f0] ss:$8 sps:$4 sm:$0xff]  }
   0xd   :  { %720 = vmatprep.subr.bf16.mxu1 %v1469_v13  ;;  %v1503_v36 = vld [vmem:[%s2142_s1 + $0xe4] ss:$8 sps:$4 sm:$0xff]   ;;  %v1507_v38 = vld [vmem:[%s2142_s1 + $0xe0] ss:$8 sps:$4 sm:$0xff]   ;;  %v1509_v40 = vld [vmem:[%s2142_s1 + $0xd4] ss:$8 sps:$4 sm:$0xff]  }
   0xe   :  { %v1505_v37 = vld [vmem:[%s2142_s1 + $0x1e4] ss:$8 sps:$4 sm:$0xff]   ;;  %v1508_v39 = vld [vmem:[%s2142_s1 + $0x1e0] ss:$8 sps:$4 sm:$0xff]   ;;  %v1511_v41 = vld [vmem:[%s2142_s1 + $0x1d4] ss:$8 sps:$4 sm:$0xff]  }
   0xf   :  { %680 = vmatpush1.bf16.msra.mxu0 %v1471_v14  ;;  %v1513_v42 = vld [vmem:[%s2142_s1 + $0xd0] ss:$8 sps:$4 sm:$0xff]   ;;  %v1515_v44 = vld [vmem:[%s2142_s1 + $0xc4] ss:$8 sps:$4 sm:$0xff]   ;;  %v1519_v46 = vld [vmem:[%s2142_s1 + $0xc0] ss:$8 sps:$4 sm:$0xff]  }
  0x10   :  { %721 = vmatpush1.bf16.msra.mxu1 %v1472_v15  ;;  %681 = vmatprep.subr.bf16.mxu0 %v1473_v16  ;;  %v1514_v43 = vld [vmem:[%s2142_s1 + $0x1d0] ss:$8 sps:$4 sm:$0xff]   ;;  %v1517_v45 = vld [vmem:[%s2142_s1 + $0x1c4] ss:$8 sps:$4 sm:$0xff]   ;;  %v1520_v48 = vld [vmem:[%s2142_s1 + $0x1c0] ss:$8 sps:$4 sm:$0xff]  }
  0x11   :  { %722 = vmatprep.subr.bf16.mxu1 %v1475_v17  ;;  %v41_v47 = vld [vmem:[%s2143_s0] sm:$0xff]  ;;  %v42_v50 = vld [vmem:[%s2143_s0 + $0x8] sm:$0xff]  ;;  %v1521_v51 = vld [vmem:[%s2142_s1 + $0xb4] ss:$8 sps:$4 sm:$0xff]   ;;  %v1630_v17 = vmov 0  }
  0x12   :  { %v1224_v49 = vcombine.high %v41_v47, %v41_v47  ;;  %v1226_v52 = vcombine.high %v42_v50, %v42_v50  ;;  %v1523_v53 = vld [vmem:[%s2142_s1 + $0x1b4] ss:$8 sps:$4 sm:$0xff]   ;;  %v1525_v54 = vld [vmem:[%s2142_s1 + $0xb0] ss:$8 sps:$4 sm:$0xff]   ;;  %v1527_v56 = vld [vmem:[%s2142_s1 + $0xa4] ss:$8 sps:$4 sm:$0xff]   ;;  %v1223_v5 = vcombine.low %v41_v47, %v41_v47  ;;  %v1225_v6 = vcombine.low %v42_v50, %v42_v50 }
  0x13   :  { %682 = vmatpush1.bf16.msra.mxu0 %v1477_v18  ;;  %v1526_v55 = vld [vmem:[%s2142_s1 + $0x1b0] ss:$8 sps:$4 sm:$0xff]   ;;  %v1529_v57 = vld [vmem:[%s2142_s1 + $0x1a4] ss:$8 sps:$4 sm:$0xff]   ;;  %v1531_v58 = vld [vmem:[%s2142_s1 + $0xa0] ss:$8 sps:$4 sm:$0xff]  }
  0x14   :  { %723 = vmatpush1.bf16.msra.mxu1 %v1478_v19  ;;  %683 = vmatprep.subr.bf16.mxu0 %v1479_v20  ;;  %v1532_v59 = vld [vmem:[%s2142_s1 + $0x1a0] ss:$8 sps:$4 sm:$0xff]   ;;  %v1533_v60 = vld [vmem:[%s2142_s1 + $0x94] ss:$8 sps:$4 sm:$0xff]   ;;  %v1537_v62 = vld [vmem:[%s2142_s1 + $0x90] ss:$8 sps:$4 sm:$0xff]  }
  0x15   :  { %724 = vmatprep.subr.bf16.mxu1 %v1481_v21  ;;  %705 = vmatprep.mubr.bf16.mxu0 %v1224_v49  ;;  %v1535_v61 = vld [vmem:[%s2142_s1 + $0x194] ss:$8 sps:$4 sm:$0xff]   ;;  %v1538_v63 = vld [vmem:[%s2142_s1 + $0x190] ss:$8 sps:$4 sm:$0xff]   ;;  %v1539_v0 = vld [vmem:[%s2142_s1 + $0x84] ss:$8 sps:$4 sm:$0xff]  }
  0x16   :  { %746 = vmatprep.mubr.bf16.mxu1 %v1226_v52  ;;  %v1541_v1 = vld [vmem:[%s2142_s1 + $0x184] ss:$8 sps:$4 sm:$0xff]   ;;  %v1543_v2 = vld [vmem:[%s2142_s1 + $0x80] ss:$8 sps:$4 sm:$0xff]   ;;  %v1552_v4 = vld [vmem:[%s2142_s1 + $0x274] ss:$8 sps:$4 sm:$0xff]  }
  0x17   :  { %684 = vmatpush1.bf16.msra.mxu0 %v1483_v22  ;;  %v1544_v3 = vld [vmem:[%s2142_s1 + $0x180] ss:$8 sps:$4 sm:$0xff]   ;;  %v1550_v7 = vld [vmem:[%s2142_s1 + $0x270] ss:$8 sps:$4 sm:$0xff]   ;;  %v1594_v8 = vld [vmem:[%s2142_s1 + $0x314] ss:$8 sps:$4 sm:$0xff]  }
  0x18   :  { %725 = vmatpush1.bf16.msra.mxu1 %v1484_v23  ;;  %685 = vmatprep.subr.bf16.mxu0 %v1485_v24  ;;  %v1592_v9 = vld [vmem:[%s2142_s1 + $0x310] ss:$8 sps:$4 sm:$0xff]   ;;  %v1555_v10 = vld [vmem:[%s2142_s1 + $0x264] ss:$8 sps:$4 sm:$0xff]   ;;  %v1553_v12 = vld [vmem:[%s2142_s1 + $0x260] ss:$8 sps:$4 sm:$0xff]  }
  0x19   :  { %726 = vmatprep.subr.bf16.mxu1 %v1487_v25  ;;  %v1600_v11 = vld [vmem:[%s2142_s1 + $0x304] ss:$8 sps:$4 sm:$0xff]   ;;  %v1598_v13 = vld [vmem:[%s2142_s1 + $0x300] ss:$8 sps:$4 sm:$0xff]   ;;  %v1923_v14 = vld [vmem:[%s2143_s0 + $0x10] sm:$0xff]  ;;  %v1631_v47 = vmov 0.0  }
  0x1a   :  { %v1558_v15 = vld [vmem:[%s2142_s1 + $0x254] ss:$8 sps:$4 sm:$0xff]   ;;  %v1228_v16 = vcombine.high %v1923_v14, %v1923_v14  ;;  %v1547_v18 = vld [vmem:[%s2143_s0 + $0x18] ss:$0 sps:$4 sm:$0xff]   ;;  %v1561_v20 = vld [vmem:[%s2142_s1 + $0x244] ss:$8 sps:$4 sm:$0xff]  }
  0x1b   :  { %686 = vmatpush1.bf16.msra.mxu0 %v1489_v26  ;;  %v1556_v19 = vld [vmem:[%s2142_s1 + $0x250] ss:$8 sps:$4 sm:$0xff]   ;;  %v1559_v21 = vld [vmem:[%s2142_s1 + $0x240] ss:$8 sps:$4 sm:$0xff]   ;;  %v1564_v22 = vld [vmem:[%s2142_s1 + $0x234] ss:$8 sps:$4 sm:$0xff]  }
  0x1c   :  { %727 = vmatpush1.bf16.msra.mxu1 %v1490_v27  ;;  %687 = vmatprep.subr.bf16.mxu0 %v1491_v28  ;;  %v1562_v23 = vld [vmem:[%s2142_s1 + $0x230] ss:$8 sps:$4 sm:$0xff]   ;;  %v1567_v24 = vld [vmem:[%s2142_s1 + $0x224] ss:$8 sps:$4 sm:$0xff]   ;;  %v1565_v25 = vld [vmem:[%s2142_s1 + $0x220] ss:$8 sps:$4 sm:$0xff]  }
  0x1d   :  { %728 = vmatprep.subr.bf16.mxu1 %v1493_v29  ;;  %v1570_v26 = vld [vmem:[%s2142_s1 + $0x214] ss:$8 sps:$4 sm:$0xff]   ;;  %v1568_v27 = vld [vmem:[%s2142_s1 + $0x210] ss:$8 sps:$4 sm:$0xff]   ;;  %v1573_v28 = vld [vmem:[%s2142_s1 + $0x204] ss:$8 sps:$4 sm:$0xff]  }
  0x1e   :  { %v1571_v29 = vld [vmem:[%s2142_s1 + $0x200] ss:$8 sps:$4 sm:$0xff]   ;;  %v1607_v49 = vld [vmem:[%s2145_s9 + $0x38] sm:$0xff]   ;;  %v1608_v50 = vld [vmem:[%s2144_s4 + $0x30] sm:$0xff]  }
  0x1f   :  { %688 = vmatpush1.bf16.msra.mxu0 %v1495_v30  ;;  %v1576_v30 = vld [vmem:[%s2142_s1 + $0x2f4] ss:$8 sps:$4 sm:$0xff]   ;;  %v1610_v52 = vld [vmem:[%s2144_s4 + $0x28] sm:$0xff]  }
  0x20   :  { %729 = vmatpush1.bf16.msra.mxu1 %v1496_v31  ;;  %689 = vmatprep.subr.bf16.mxu0 %v1497_v32  ;;  %v1574_v31 = vld [vmem:[%s2142_s1 + $0x2f0] ss:$8 sps:$4 sm:$0xff]   ;;  %v1579_v32 = vld [vmem:[%s2142_s1 + $0x2e4] ss:$8 sps:$4 sm:$0xff]  }
  0x21   :  { %730 = vmatprep.subr.bf16.mxu1 %v1499_v33  ;;  %v1577_v33 = vld [vmem:[%s2142_s1 + $0x2e0] ss:$8 sps:$4 sm:$0xff]  }
  0x23   :  { %690 = vmatpush2.bf16.msra.mxu0 %v1501_v34  ;;  %v1582_v34 = vld [vmem:[%s2142_s1 + $0x2d4] ss:$8 sps:$4 sm:$0xff]  }
  0x24   :  { %731 = vmatpush2.bf16.msra.mxu1 %v1502_v35  ;;  %691 = vmatprep.subr.bf16.mxu0 %v1503_v36  ;;  %v1580_v35 = vld [vmem:[%s2142_s1 + $0x2d0] ss:$8 sps:$4 sm:$0xff]   ;;  %v1585_v36 = vld [vmem:[%s2142_s1 + $0x2c4] ss:$8 sps:$4 sm:$0xff]  }
  0x25   :  { %732 = vmatprep.subr.bf16.mxu1 %v1505_v37  ;;  %v1583_v37 = vld [vmem:[%s2142_s1 + $0x2c0] ss:$8 sps:$4 sm:$0xff]  }
  0x27   :  { %692 = vmatpush2.bf16.msra.mxu0 %v1507_v38  ;;  %v1588_v38 = vld [vmem:[%s2142_s1 + $0x2b4] ss:$8 sps:$4 sm:$0xff]  }
  0x28   :  { %733 = vmatpush2.bf16.msra.mxu1 %v1508_v39  ;;  %693 = vmatprep.subr.bf16.mxu0 %v1509_v40  ;;  %v1586_v39 = vld [vmem:[%s2142_s1 + $0x2b0] ss:$8 sps:$4 sm:$0xff]   ;;  %v1591_v40 = vld [vmem:[%s2142_s1 + $0x2a4] ss:$8 sps:$4 sm:$0xff]  }
  0x29   :  { %734 = vmatprep.subr.bf16.mxu1 %v1511_v41  ;;  %v1589_v41 = vld [vmem:[%s2142_s1 + $0x2a0] ss:$8 sps:$4 sm:$0xff]  }
  0x2b   :  { %694 = vmatpush2.bf16.msra.mxu0 %v1513_v42  ;;  %v1597_v42 = vld [vmem:[%s2142_s1 + $0x294] ss:$8 sps:$4 sm:$0xff]  }
  0x2c   :  { %735 = vmatpush2.bf16.msra.mxu1 %v1514_v43  ;;  %695 = vmatprep.subr.bf16.mxu0 %v1515_v44  ;;  %v1595_v43 = vld [vmem:[%s2142_s1 + $0x290] ss:$8 sps:$4 sm:$0xff]   ;;  %v1603_v44 = vld [vmem:[%s2142_s1 + $0x284] ss:$8 sps:$4 sm:$0xff]  }
  0x2d   :  { %736 = vmatprep.subr.bf16.mxu1 %v1517_v45  ;;  %v1601_v45 = vld [vmem:[%s2142_s1 + $0x280] ss:$8 sps:$4 sm:$0xff]  }
  0x2f   :  { %696 = vmatpush2.bf16.msra.mxu0 %v1519_v46  ;;  %v1227_v46 = vcombine.low %v1923_v14, %v1923_v14 }
  0x30   :  { %737 = vmatpush2.bf16.msra.mxu1 %v1520_v48  ;;  %697 = vmatprep.subr.bf16.mxu0 %v1521_v51  ;;  %v1606_v48 = vld [vmem:[%s2144_s4 + $0x38] sm:$0xff]   ;;  %v1609_v51 = vld [vmem:[%s2145_s9 + $0x30] sm:$0xff]  }
  0x31   :  { %738 = vmatprep.subr.bf16.mxu1 %v1523_v53  ;;  %v1611_v53 = vld [vmem:[%s2145_s9 + $0x28] sm:$0xff]  }
  0x33   :  { %698 = vmatpush2.bf16.msra.mxu0 %v1525_v54  ;;  %v1612_v54 = vld [vmem:[%s2144_s4 + $0x20] sm:$0xff]  }
  0x34   :  { %739 = vmatpush2.bf16.msra.mxu1 %v1526_v55  ;;  %699 = vmatprep.subr.bf16.mxu0 %v1527_v56  ;;  %v1613_v55 = vld [vmem:[%s2145_s9 + $0x20] sm:$0xff]   ;;  %v1614_v56 = vld [vmem:[%s2144_s4 + $0x18] sm:$0xff]  }
  0x35   :  { %740 = vmatprep.subr.bf16.mxu1 %v1529_v57  ;;  %v1615_v57 = vld [vmem:[%s2145_s9 + $0x18] sm:$0xff]  }
  0x37   :  { %700 = vmatpush2.bf16.msra.mxu0 %v1531_v58  ;;  %v1616_v58 = vld [vmem:[%s2144_s4 + $0x10] sm:$0xff]  }
  0x38   :  { %741 = vmatpush2.bf16.msra.mxu1 %v1532_v59  ;;  %701 = vmatprep.subr.bf16.mxu0 %v1533_v60  ;;  %v1617_v59 = vld [vmem:[%s2145_s9 + $0x10] sm:$0xff]   ;;  %v1618_v60 = vld [vmem:[%s2144_s4 + $0x8] sm:$0xff]  }
  0x39   :  { %742 = vmatprep.subr.bf16.mxu1 %v1535_v61  ;;  %v1619_v61 = vld [vmem:[%s2145_s9 + $0x8] sm:$0xff]  }
  0x3b   :  { %702 = vmatpush2.bf16.msra.mxu0 %v1537_v62  ;;  %v1620_v62 = vld [vmem:[%s2144_s4] sm:$0xff]  }
  0x3c   :  { %743 = vmatpush2.bf16.msra.mxu1 %v1538_v63  ;;  %703 = vmatprep.subr.bf16.mxu0 %v1539_v0  ;;  %v1621_v63 = vld [vmem:[%s2145_s9] sm:$0xff]  }
  0x3d   :  { %744 = vmatprep.subr.bf16.mxu1 %v1541_v1 }
  0x3f   :  { %704 = vmatpush2.bf16.msra.mxu0 %v1543_v2 }
  0x40   :  { %745 = vmatpush2.bf16.msra.mxu1 %v1544_v3  ;;  %755 = vmatprep.subr.bf16.mxu0 %v1552_v4 }
  0x41   :  { %808 = vmatprep.subr.bf16.mxu1 %v1594_v8 }
  0x42   :  { %706 = vmatmul.mubr.bf16.vlgmr.msra.gmra.mxu0 %v1223_v5 }
  0x43   :  { %747 = vmatmul.mubr.bf16.vlgmr.msra.gmra.mxu1 %v1225_v6  ;;  %756 = vmatpush1.bf16.msra.mxu0 %v1550_v7 }
  0x44   :  { %809 = vmatpush1.bf16.msra.mxu1 %v1592_v9  ;;  %757 = vmatprep.subr.bf16.mxu0 %v1555_v10 }
  0x45   :  { %810 = vmatprep.subr.bf16.mxu1 %v1600_v11  ;;  %828 = vmatprep.mubr.bf16.mxu1 %v1630_v17 }
  0x46   :  { %787 = vmatprep.mubr.bf16.mxu0 %v1228_v16 }
  0x47   :  { %758 = vmatpush1.bf16.msra.mxu0 %v1553_v12  ;;  %v839_v12 = vlaneseq }
  0x48   :  { %811 = vmatpush1.bf16.msra.mxu1 %v1598_v13  ;;  %759 = vmatprep.subr.bf16.mxu0 %v1558_v15  ;;  %v837_v15 = vld [vmem:[%s2147_s2] sm:$0x3] }
  0x49   :  { %1386 = vmatprep.subr.bf16.mxu1 %v1631_v47  ;;  %v840_v13 = vshrl.u32 %v839_v12, 7 }
  0x4b   :  { %1330 = vmatmul.mubr.msk.bf16.vlgmr.msra.gmra.mxu1 %vm669_vm0, %v1547_v18  ;;  %760 = vmatpush1.bf16.msra.mxu0 %v1556_v19  ;;  %v841_v14 = vsub.s32 0, %v840_v13  ;;  %v845_v17 = vsub.s32 1, %v840_v13  ;;  %v851_v19 = vld [vmem:[%s2148_s3] sm:$0x3] }
  0x4c   :  { %761 = vmatprep.subr.bf16.mxu0 %v1561_v20  ;;  %1387 = vmatpush3.bf16.msra.mxu1 %v1606_v48  ;;  %v1629_v48 = vld [vmem:[%s2146_s7] sm:$0xff]  }
  0x4d   :  { %1388 = vmatprep.subr.bf16.mxu1 %v1631_v47  ;;  %1402 = vmatprep.mubr.msk.bf16.mxu1 %vm1632_vm1, %v1631_v47 }
  0x4f   :  { %762 = vmatpush1.bf16.msra.mxu0 %v1559_v21 }
  0x50   :  { %763 = vmatprep.subr.bf16.mxu0 %v1564_v22  ;;  %1389 = vmatpush3.bf16.msra.mxu1 %v1608_v50  ;;  %v842_v22 = vrot.slane %v837_v15, %v841_v14 }
  0x51   :  { %1390 = vmatprep.subr.bf16.mxu1 %v1631_v47 }
  0x53   :  { %764 = vmatpush1.bf16.msra.mxu0 %v1562_v23 }
  0x54   :  { %765 = vmatprep.subr.bf16.mxu0 %v1567_v24  ;;  %1391 = vmatpush3.bf16.msra.mxu1 %v1610_v52  ;;  %v1350_v52 = vld [vmem:[%s2151_s10] ss:$0 sm:$0xff] }
  0x55   :  { %1392 = vmatprep.subr.bf16.mxu1 %v1631_v47 }
  0x57   :  { %766 = vmatpush1.bf16.msra.mxu0 %v1565_v25  ;;  %v856_v25 = vrot.slane %v851_v19, %v841_v14 }
  0x58   :  { %767 = vmatprep.subr.bf16.mxu0 %v1570_v26  ;;  %1393 = vmatpush3.bf16.msra.mxu1 %v1612_v54 }
  0x59   :  { %1394 = vmatprep.subr.bf16.mxu1 %v1631_v47 }
  0x5b   :  { %768 = vmatpush1.bf16.msra.mxu0 %v1568_v27  ;;  %v846_v27 = vrot.slane %v837_v15, %v845_v17 }
  0x5c   :  { %769 = vmatprep.subr.bf16.mxu0 %v1573_v28  ;;  %1395 = vmatpush3.bf16.msra.mxu1 %v1614_v56 }
  0x5d   :  { %1396 = vmatprep.subr.bf16.mxu1 %v1631_v47 }
  0x5f   :  { %770 = vmatpush1.bf16.msra.mxu0 %v1571_v29 }
  0x60   :  { %771 = vmatprep.subr.bf16.mxu0 %v1576_v30  ;;  %1397 = vmatpush3.bf16.msra.mxu1 %v1616_v58 }
  0x61   :  { %1398 = vmatprep.subr.bf16.mxu1 %v1631_v47 }
  0x63   :  { %772 = vmatpush2.bf16.msra.mxu0 %v1574_v31  ;;  %v860_v31 = vrot.slane %v851_v19, %v845_v17 }
  0x64   :  { %773 = vmatprep.subr.bf16.mxu0 %v1579_v32  ;;  %1399 = vmatpush3.bf16.msra.mxu1 %v1618_v60 }
  0x65   :  { %1400 = vmatprep.subr.bf16.mxu1 %v1631_v47 }
  0x67   :  { %774 = vmatpush2.bf16.msra.mxu0 %v1577_v33 }
  0x68   :  { %775 = vmatprep.subr.bf16.mxu0 %v1582_v34  ;;  %1401 = vmatpush3.bf16.msra.mxu1 %v1620_v62 }
  0x69   :  { %1406 = vmatprep.subr.bf16.mxu1 %v1631_v47 }
  0x6b   :  { %776 = vmatpush2.bf16.msra.mxu0 %v1580_v35 }
  0x6c   :  { %777 = vmatprep.subr.bf16.mxu0 %v1585_v36 }
  0x6f   :  { %778 = vmatpush2.bf16.msra.mxu0 %v1583_v37  ;;  %v1622_v37 = vld [vmem:[%s2146_s7 + $0x38] sm:$0xff]  }
  0x70   :  { %779 = vmatprep.subr.bf16.mxu0 %v1588_v38 }
  0x73   :  { %780 = vmatpush2.bf16.msra.mxu0 %v1586_v39 }
  0x74   :  { %781 = vmatprep.subr.bf16.mxu0 %v1591_v40 }
  0x77   :  { %782 = vmatpush2.bf16.msra.mxu0 %v1589_v41  ;;  %v1623_v41 = vld [vmem:[%s2146_s7 + $0x30] sm:$0xff]  }
  0x78   :  { %783 = vmatprep.subr.bf16.mxu0 %v1597_v42  ;;  %v1624_v42 = vld [vmem:[%s2146_s7 + $0x28] sm:$0xff]  }
  0x7b   :  { %784 = vmatpush2.bf16.msra.mxu0 %v1595_v43  ;;  %v1625_v43 = vld [vmem:[%s2146_s7 + $0x20] sm:$0xff]  }
  0x7c   :  { %785 = vmatprep.subr.bf16.mxu0 %v1603_v44  ;;  %v1626_v44 = vld [vmem:[%s2146_s7 + $0x18] sm:$0xff]  }
  0x7f   :  { %786 = vmatpush2.bf16.msra.mxu0 %v1601_v45  ;;  %v1627_v45 = vld [vmem:[%s2146_s7 + $0x10] sm:$0xff]  }
  0x80   :  { %1426 = vmatprep.subr.bf16.mxu0 %v1631_v47 }
  0x82   :  { %788 = vmatmul.mubr.bf16.vlgmr.msra.gmra.mxu0 %v1227_v46  ;;  %v1628_v46 = vld [vmem:[%s2146_s7 + $0x8] sm:$0xff]  }
  0x83   :  { %1427 = vmatpush3.bf16.msra.mxu0 %v1607_v49  ;;  %1442 = vmatprep.mubr.msk.bf16.mxu0 %vm1632_vm1, %v1631_v47  ;;  %v1339_v49 = vld [vmem:[%s2149_s5] ss:$0 sm:$0xff] }
  0x84   :  { %1428 = vmatprep.subr.bf16.mxu0 %v1631_v47 }
  0x87   :  { %1429 = vmatpush3.bf16.msra.mxu0 %v1609_v51  ;;  %v1340_v51 = vld [vmem:[%s2150_s6] ss:$0 sm:$0xff] }
  0x88   :  { %1430 = vmatprep.subr.bf16.mxu0 %v1631_v47 }
  0x8b   :  { %1431 = vmatpush3.bf16.msra.mxu0 %v1611_v53 }
  0x8c   :  { %1432 = vmatprep.subr.bf16.mxu0 %v1631_v47 }
  0x8f   :  { %1433 = vmatpush3.bf16.msra.mxu0 %v1613_v55 }
  0x90   :  { %1434 = vmatprep.subr.bf16.mxu0 %v1631_v47 }
  0x93   :  { %1435 = vmatpush3.bf16.msra.mxu0 %v1615_v57 }
  0x94   :  { %1436 = vmatprep.subr.bf16.mxu0 %v1631_v47 }
  0x97   :  { %1437 = vmatpush3.bf16.msra.mxu0 %v1617_v59 }
  0x98   :  { %1438 = vmatprep.subr.bf16.mxu0 %v1631_v47 }
  0x9b   :  { %1439 = vmatpush3.bf16.msra.mxu0 %v1619_v61 }
  0x9c   :  { %1440 = vmatprep.subr.bf16.mxu0 %v1631_v47 }
  0x9f   :  { %1441 = vmatpush3.bf16.msra.mxu0 %v1621_v63 }
 0x102   :  { %v707_v0 = vpop.f32.mrf.mxu0 }
 0x103   :  { %v748_v1 = vpop.f32.mrf.mxu1 }
 0x104   :  { %v709_v2 = vpop.f32.mrf.mxu0  ;;  %v749_v16 = vadd.f32 %v748_v1, %v707_v0  ;;  %v1341_v0 = vld [vmem:[%s2153_s8] ss:$0 sm:$0xff] }
 0x105   :  { %v750_v3 = vpop.f32.mrf.mxu1 }
 0x106   :  { %v711_v4 = vpop.f32.mrf.mxu0  ;;  %v751_v20 = vadd.f32 %v750_v3, %v709_v2 }
 0x107   :  { %v752_v5 = vpop.f32.mrf.mxu1 }
 0x108   :  { %v712_v6 = vpop.f32.mrf.mxu0 }
 0x109   :  { %v753_v7 = vpop.f32.mrf.mxu1 }
 0x10b   :  { %v830_v8 = vpop.f32.mrf.mxu1 }
 0x10d   :  { %v832_v9 = vpop.f32.mrf.mxu1 }
 0x10f   :  { %v834_v10 = vpop.f32.mrf.mxu1 }
 0x111   :  { %v835_v11 = vpop.f32.mrf.mxu1 }
 0x142   :  { %v789_v18 = vpop.f32.mrf.mxu0 }
 0x143   :  { %v790_v21 = vadd.f32 %v789_v18, %v749_v16 }
 0x144   :  { %v791_v23 = vpop.f32.mrf.mxu0 }
 0x145   :  { %v831_v24 = vadd.f32 %v830_v8, %v790_v21  ;;  %v792_v26 = vadd.f32 %v791_v23, %v751_v20 }
 0x146   :  { %v793_v28 = vpop.f32.mrf.mxu0 }
 0x147   :  { %v849_v29 = vmul.f32 %v842_v22, %v831_v24  ;;  %v833_v30 = vadd.f32 %v832_v9, %v792_v26 }
 0x148   :  { %v794_v32 = vpop.f32.mrf.mxu0 }
 0x149   :  { %v863_v33 = vadd.f32 %v856_v25, %v849_v29  ;;  %v850_v34 = vmul.f32 %v846_v27, %v833_v30 }
 0x14b   :  { %v865_v35 = vmax.f32 %v863_v33, 0.0  ;;  %v864_v36 = vadd.f32 %v860_v31, %v850_v34 }
 0x14d   :  { %v866_v38 = vmax.f32 %v864_v36, 0.0  ;;  %v867_v39 = vpack.c.bf16 %v865_v35, %v865_v35 }
 0x14f   :  { %1403 = vmatmul.mubr.bf16.vlgmr.msra.gmra.mxu1 %v867_v39  ;;  %v868_v40 = vpack.c.bf16 %v866_v38, %v866_v38 }
 0x150   :  { %1407 = vmatpush3.bf16.msra.mxu1 %v1622_v37  ;;  %1422 = vmatprep.mubr.msk.bf16.mxu1 %vm1632_vm1, %v1631_v47 }
 0x151   :  { %1443 = vmatmul.mubr.bf16.vlgmr.msra.gmra.mxu0 %v868_v40  ;;  %1408 = vmatprep.subr.bf16.mxu1 %v1631_v47 }
 0x154   :  { %1409 = vmatpush3.bf16.msra.mxu1 %v1623_v41 }
 0x155   :  { %1410 = vmatprep.subr.bf16.mxu1 %v1631_v47 }
 0x158   :  { %1411 = vmatpush3.bf16.msra.mxu1 %v1624_v42 }
 0x159   :  { %1412 = vmatprep.subr.bf16.mxu1 %v1631_v47 }
 0x15c   :  { %1413 = vmatpush3.bf16.msra.mxu1 %v1625_v43 }
 0x15d   :  { %1414 = vmatprep.subr.bf16.mxu1 %v1631_v47 }
 0x160   :  { %1415 = vmatpush3.bf16.msra.mxu1 %v1626_v44 }
 0x161   :  { %1416 = vmatprep.subr.bf16.mxu1 %v1631_v47 }
 0x164   :  { %1417 = vmatpush3.bf16.msra.mxu1 %v1627_v45 }
 0x165   :  { %1418 = vmatprep.subr.bf16.mxu1 %v1631_v47 }
 0x168   :  { %1419 = vmatpush3.bf16.msra.mxu1 %v1628_v46 }
 0x169   :  { %1420 = vmatprep.subr.bf16.mxu1 %v1631_v47 }
 0x16c   :  { %1421 = vmatpush3.bf16.msra.mxu1 %v1629_v48 }
 0x20f   :  { %v967_v50 = vpop.f32.mrf.mxu1 }
 0x210   :  { %v980_v53 = vmul.f32 %v1339_v49, %v967_v50 }
 0x211   :  { %v1404_v47 = vpop.f32.mrf.mxu1  ;;  %v1208_v54 = vpop.f32.mrf.mxu0 }
 0x212   :  { %v988_v55 = vadd.f32 %v1340_v51, %v980_v53  ;;  %v1209_v56 = vadd.f32 %v1350_v52, %v1208_v54 }
 0x213   :  { %v970_v57 = vpop.f32.mrf.mxu1  ;;  %v1444_v58 = vpop.f32.mrf.mxu0 }
 0x214   :  { %v989_v59 = vmax.f32 %v988_v55, 0.0  ;;  %1214 = vst [vmem:[%s2152_s12] sm:$0xff] %v1209_v56 }
 0x215   :  { %v1405_v60 = vpop.f32.mrf.mxu1  ;;  %v1211_v61 = vpop.f32.mrf.mxu0 }
 0x216   :  { %v990_v62 = vpack.c.bf16 %v989_v59, %v989_v59 }
 0x217   :  { %v1445_v63 = vpop.f32.mrf.mxu0 }
 0x218   :  { %1423 = vmatmul.mubr.bf16.vlgmr.msra.gmra.mxu1 %v990_v62 }
 0x2d8   :  { %v1096_v1 = vpop.f32.mrf.mxu1 }
 0x2d9   :  { %v1097_v2 = vadd.f32 %v1341_v0, %v1096_v1 }
 0x2da   :  { %v1424_v3 = vpop.f32.mrf.mxu1 }
 0x2db   :  { %1102 = vst [vmem:[%s2154_s11] sm:$0xff] %v1097_v2 }
 0x2dc   :  { %v1099_v4 = vpop.f32.mrf.mxu1 }
 0x2de   :  { %v1425_v5 = vpop.f32.mrf.mxu1 }

</bundles_post_ra>
